<compile_context>
chip_gen: v7x
topology: tpu7x:2x2x1
jax: 0.10.0
libtpu: 0.0.40
codegen_flags: <defaults>
</compile_context>

<pallas_src>
import jax
import jax.numpy as jnp
import numpy as np
from jax import lax
from jax.experimental import pallas as pl
from jax.experimental.pallas import tpu as pltpu


def _resblock_kernel(x_ref, w1_ref, w2_ref, alpha_ref, o_ref, pad_ref):
    # x_ref:     (1, H, W, C)   unpadded input tile (one batch element), f32
    # w1_ref:    (9*C, C)       conv1 weights, row index = kh*3*C + kw*C + cin
    # w2_ref:    (9*C, C)       conv2 weights (same layout)
    # alpha_ref: (1, 1)         PReLU slope (single shared parameter), f32
    # o_ref:     (1, H, W, C)   output tile, f32
    # pad_ref:   (H+2, W+2, C)  persistent f32 VMEM scratch for the padded activation
    H, W, C = o_ref.shape[1], o_ref.shape[2], o_ref.shape[3]
    mxu_dtype = w1_ref.dtype          # f32, or bf16 on the mixed-precision path

    x = x_ref[0]                      # (H, W, C) f32, reused for the residual
    alpha = alpha_ref[0, 0]

    # Zero only the 1-pixel halo; the interior is always fully overwritten below.
    # (Done every grid step, not once, so it is correct under megacore sharding.)
    zrow = jnp.zeros((1, W + 2, C), pad_ref.dtype)
    zcol = jnp.zeros((H + 2, 1, C), pad_ref.dtype)
    pad_ref[0:1, :, :] = zrow
    pad_ref[H + 1:H + 2, :, :] = zrow
    pad_ref[:, 0:1, :] = zcol
    pad_ref[:, W + 1:W + 2, :] = zcol

    def conv3x3(w_ref):
        # im2col: stack the 9 shifted views along the contraction axis and run a
        # single (H*W, 9C) @ (9C, C) MXU matmul with f32 accumulation.
        cols = [pad_ref[kh:kh + H, kw:kw + W, :].reshape(H * W, C)
                for kh in range(3) for kw in range(3)]
        pat = jnp.concatenate(cols, axis=1)                 # (H*W, 9C) f32
        return jnp.dot(pat.astype(mxu_dtype), w_ref[...],
                       preferred_element_type=jnp.float32)  # (H*W, C) f32

    # ---- conv1 -> PReLU (elementwise work kept in f32; v5e VPU has no bf16) ----
    pad_ref[1:H + 1, 1:W + 1, :] = x
    a1 = conv3x3(w1_ref)
    y1 = jnp.where(a1 > 0, a1, alpha * a1)

    # ---- conv2 (reuse the same scratch; halo is still zero) ----
    pad_ref[1:H + 1, 1:W + 1, :] = y1.reshape(H, W, C)
    a2 = conv3x3(w2_ref)

    # ---- residual add in f32 ----
    o_ref[0] = (a2.reshape(H, W, C) + x).astype(o_ref.dtype)


def _torch_oihw_to_slab(w_oihw, dtype):
    # (O, I, 3, 3) -> (kh, kw, I, O) -> (9*I, O); row index = kh*3*I + kw*I + cin,
    # matching the column order of the in-kernel im2col concatenation.
    O, I = w_oihw.shape[0], w_oihw.shape[1]
    return jnp.transpose(w_oihw, (2, 3, 1, 0)).reshape(9 * I, O).astype(dtype)


def resblock_pallas(x_nchw, w1_oihw, w2_oihw, alpha, *, compute_dtype=jnp.float32):
    """x_nchw: (N, C, H, W) float32. Returns (N, C, H, W) float32.

    compute_dtype controls the MXU operand dtype (float32 or bfloat16);
    accumulation, PReLU and the residual add are always float32.
    """
    N, C, H, W = x_nchw.shape
    x_nhwc = jnp.transpose(x_nchw, (0, 2, 3, 1)).astype(jnp.float32)   # NCHW -> NHWC

    w1 = _torch_oihw_to_slab(w1_oihw, compute_dtype)                    # (9C, C)
    w2 = _torch_oihw_to_slab(w2_oihw, compute_dtype)
    alpha_arr = jnp.asarray(alpha, jnp.float32).reshape(1, 1)

    itemsize = jnp.dtype(compute_dtype).itemsize
    cost = pl.CostEstimate(
        flops=2 * 2 * N * H * W * (9 * C) * C,          # two convs, 2*M*K*N each
        transcendentals=0,
        bytes_accessed=int(2 * N * H * W * C * 4 + 2 * 9 * C * C * itemsize),
    )

    out_nhwc = pl.pallas_call(
        _resblock_kernel,
        out_shape=jax.ShapeDtypeStruct((N, H, W, C), jnp.float32),
        grid_spec=pltpu.PrefetchScalarGridSpec(
            num_scalar_prefetch=0,
            grid=(N,),
            in_specs=[
                pl.BlockSpec((1, H, W, C), lambda n: (n, 0, 0, 0)),    # unpadded x
                pl.BlockSpec((9 * C, C), lambda n: (0, 0)),            # conv1 slab
                pl.BlockSpec((9 * C, C), lambda n: (0, 0)),            # conv2 slab
                pl.BlockSpec((1, 1), lambda n: (0, 0)),                # PReLU alpha
            ],
            out_specs=pl.BlockSpec((1, H, W, C), lambda n: (n, 0, 0, 0)),
            scratch_shapes=[pltpu.VMEM((H + 2, W + 2, C), jnp.float32)],
        ),
        compiler_params=pltpu.CompilerParams(dimension_semantics=("parallel",)),
        cost_estimate=cost,
    )(x_nhwc, w1, w2, alpha_arr)

    return jnp.transpose(out_nhwc, (0, 3, 1, 2))                        # NHWC -> NCHW


def resblock_reference(x_nchw, w1_oihw, w2_oihw, alpha):
    """Pure-JAX reference mirroring the PyTorch forward (for correctness check)."""
    dn = lax.conv_dimension_numbers(x_nchw.shape, w1_oihw.shape, ("NCHW", "OIHW", "NCHW"))
    y = lax.conv_general_dilated(x_nchw, w1_oihw, (1, 1), ((1, 1), (1, 1)),
                                 dimension_numbers=dn)
    y = jnp.where(y > 0, y, alpha * y)
    y = lax.conv_general_dilated(y, w2_oihw, (1, 1), ((1, 1), (1, 1)),
                                 dimension_numbers=dn)
    return y + x_nchw


if __name__ == "__main__":
    key = jax.random.PRNGKey(0)
    N, C, H, W = 2, 4, 16, 16          # small shapes consistent with resblock(dim=4)

    kx, k1, k2 = jax.random.split(key, 3)
    x = jax.random.normal(kx, (N, C, H, W), dtype=jnp.float32)
    fan_in = C * 3 * 3
    w1 = jax.random.normal(k1, (C, C, 3, 3), dtype=jnp.float32) / np.sqrt(fan_in)
    w2 = jax.random.normal(k2, (C, C, 3, 3), dtype=jnp.float32) / np.sqrt(fan_in)
    alpha = jnp.float32(0.25)          # PyTorch PReLU default init

    ref = jax.block_until_ready(resblock_reference(x, w1, w2, alpha))

    # Default f32 MXU path: bit-tight vs. the reference.
    out_f32 = jax.block_until_ready(resblock_pallas(x, w1, w2, alpha))
    np.testing.assert_allclose(np.asarray(out_f32), np.asarray(ref),
                               rtol=1e-5, atol=1e-5)

    # bf16 MXU-operand path (f32 accumulation / f32 residual) — the v6e/v7x recipe.
    out_bf16 = jax.block_until_ready(
        resblock_pallas(x, w1, w2, alpha, compute_dtype=jnp.bfloat16))
    np.testing.assert_allclose(np.asarray(out_bf16), np.asarray(ref),
                               rtol=5e-2, atol=5e-2)

    print("KERNEL_OK")
</pallas_src>

<mosaic_0001>
module attributes {stable_mosaic.version = 11 : i64} {
  func.func @_resblock_kernel(%arg0: i32, %arg1: memref<1x16x16x4xf32, #tpu.memory_space<vmem>>, %arg2: memref<36x4xf32, #tpu.memory_space<vmem>>, %arg3: memref<36x4xf32, #tpu.memory_space<vmem>>, %arg4: memref<1x1xf32, #tpu.memory_space<vmem>>, %arg5: memref<1x16x16x4xf32, #tpu.memory_space<vmem>>, %arg6: memref<18x18x4xf32, #tpu.memory_space<vmem>>) attributes {dimension_semantics = [#tpu.dimension_semantics<parallel>], iteration_bounds = array<i64: 2>, scalar_prefetch = 0 : i64, scratch_operands = 1 : i64, tpu.core_type = #tpu.core_type<tc>, window_params = [{transform_indices = @transform_0, window_bounds = array<i64: 1, 16, 16, 4>}, {pipeline_mode = #tpu.pipeline_mode<synchronous>, transform_indices = @transform_1, window_bounds = array<i64: 36, 4>}, {pipeline_mode = #tpu.pipeline_mode<synchronous>, transform_indices = @transform_2, window_bounds = array<i64: 36, 4>}, {pipeline_mode = #tpu.pipeline_mode<synchronous>, transform_indices = @transform_3, window_bounds = array<i64: 1, 1>}, {transform_indices = @transform_4, window_bounds = array<i64: 1, 16, 16, 4>}]} {
    %c0 = arith.constant 0 : index
    %c0_0 = arith.constant 0 : index
    %c0_1 = arith.constant 0 : index
    %c0_2 = arith.constant 0 : index
    %0 = vector.load %arg1[%c0, %c0_0, %c0_1, %c0_2] : memref<1x16x16x4xf32, #tpu.memory_space<vmem>>, vector<1x16x16x4xf32>
    %1 = vector.shape_cast %0 : vector<1x16x16x4xf32> to vector<16x16x4xf32>
    %c0_3 = arith.constant 0 : index
    %c0_4 = arith.constant 0 : index
    %2 = vector.load %arg4[%c0_3, %c0_4] : memref<1x1xf32, #tpu.memory_space<vmem>>, vector<1x1xf32>
    %3 = vector.extract %2[0, 0] : f32 from vector<1x1xf32>
    %cst = arith.constant 0.000000e+00 : f32
    %4 = vector.broadcast %cst : f32 to vector<1x18x4xf32>
    %cst_5 = arith.constant 0.000000e+00 : f32
    %5 = vector.broadcast %cst_5 : f32 to vector<18x1x4xf32>
    %c0_6 = arith.constant 0 : index
    %c0_7 = arith.constant 0 : index
    %c0_8 = arith.constant 0 : index
    %6 = vector.load %arg6[%c0_6, %c0_7, %c0_8] : memref<18x18x4xf32, #tpu.memory_space<vmem>>, vector<1x18x4xf32>
    tpu.vector_store %arg6[%c0_6, %c0_7, %c0_8], %4 {strides = array<i32>} : memref<18x18x4xf32, #tpu.memory_space<vmem>>, vector<1x18x4xf32>,
    %c17 = arith.constant 17 : index
    %c0_9 = arith.constant 0 : index
    %c0_10 = arith.constant 0 : index
    %7 = vector.load %arg6[%c17, %c0_9, %c0_10] : memref<18x18x4xf32, #tpu.memory_space<vmem>>, vector<1x18x4xf32>
    tpu.vector_store %arg6[%c17, %c0_9, %c0_10], %4 {strides = array<i32>} : memref<18x18x4xf32, #tpu.memory_space<vmem>>, vector<1x18x4xf32>,
    %c0_11 = arith.constant 0 : index
    %c0_12 = arith.constant 0 : index
    %c0_13 = arith.constant 0 : index
    %8 = vector.load %arg6[%c0_11, %c0_12, %c0_13] : memref<18x18x4xf32, #tpu.memory_space<vmem>>, vector<18x1x4xf32>
    tpu.vector_store %arg6[%c0_11, %c0_12, %c0_13], %5 {strides = array<i32>} : memref<18x18x4xf32, #tpu.memory_space<vmem>>, vector<18x1x4xf32>,
    %c0_14 = arith.constant 0 : index
    %c17_15 = arith.constant 17 : index
    %c0_16 = arith.constant 0 : index
    %9 = vector.load %arg6[%c0_14, %c17_15, %c0_16] : memref<18x18x4xf32, #tpu.memory_space<vmem>>, vector<18x1x4xf32>
    tpu.vector_store %arg6[%c0_14, %c17_15, %c0_16], %5 {strides = array<i32>} : memref<18x18x4xf32, #tpu.memory_space<vmem>>, vector<18x1x4xf32>,
    %c1 = arith.constant 1 : index
    %c1_17 = arith.constant 1 : index
    %c0_18 = arith.constant 0 : index
    %10 = vector.load %arg6[%c1, %c1_17, %c0_18] : memref<18x18x4xf32, #tpu.memory_space<vmem>>, vector<16x16x4xf32>
    tpu.vector_store %arg6[%c1, %c1_17, %c0_18], %1 {strides = array<i32>} : memref<18x18x4xf32, #tpu.memory_space<vmem>>, vector<16x16x4xf32>,
    %c0_19 = arith.constant 0 : index
    %c0_20 = arith.constant 0 : index
    %c0_21 = arith.constant 0 : index
    %11 = vector.load %arg6[%c0_19, %c0_20, %c0_21] : memref<18x18x4xf32, #tpu.memory_space<vmem>>, vector<16x16x4xf32>
    %12 = vector.shape_cast %11 : vector<16x16x4xf32> to vector<256x4xf32>
    %c0_22 = arith.constant 0 : index
    %c1_23 = arith.constant 1 : index
    %c0_24 = arith.constant 0 : index
    %13 = vector.load %arg6[%c0_22, %c1_23, %c0_24] : memref<18x18x4xf32, #tpu.memory_space<vmem>>, vector<16x16x4xf32>
    %14 = vector.shape_cast %13 : vector<16x16x4xf32> to vector<256x4xf32>
    %c0_25 = arith.constant 0 : index
    %c2 = arith.constant 2 : index
    %c0_26 = arith.constant 0 : index
    %15 = vector.load %arg6[%c0_25, %c2, %c0_26] : memref<18x18x4xf32, #tpu.memory_space<vmem>>, vector<16x16x4xf32>
    %16 = vector.shape_cast %15 : vector<16x16x4xf32> to vector<256x4xf32>
    %c1_27 = arith.constant 1 : index
    %c0_28 = arith.constant 0 : index
    %c0_29 = arith.constant 0 : index
    %17 = vector.load %arg6[%c1_27, %c0_28, %c0_29] : memref<18x18x4xf32, #tpu.memory_space<vmem>>, vector<16x16x4xf32>
    %18 = vector.shape_cast %17 : vector<16x16x4xf32> to vector<256x4xf32>
    %c1_30 = arith.constant 1 : index
    %c1_31 = arith.constant 1 : index
    %c0_32 = arith.constant 0 : index
    %19 = vector.load %arg6[%c1_30, %c1_31, %c0_32] : memref<18x18x4xf32, #tpu.memory_space<vmem>>, vector<16x16x4xf32>
    %20 = vector.shape_cast %19 : vector<16x16x4xf32> to vector<256x4xf32>
    %c1_33 = arith.constant 1 : index
    %c2_34 = arith.constant 2 : index
    %c0_35 = arith.constant 0 : index
    %21 = vector.load %arg6[%c1_33, %c2_34, %c0_35] : memref<18x18x4xf32, #tpu.memory_space<vmem>>, vector<16x16x4xf32>
    %22 = vector.shape_cast %21 : vector<16x16x4xf32> to vector<256x4xf32>
    %c2_36 = arith.constant 2 : index
    %c0_37 = arith.constant 0 : index
    %c0_38 = arith.constant 0 : index
    %23 = vector.load %arg6[%c2_36, %c0_37, %c0_38] : memref<18x18x4xf32, #tpu.memory_space<vmem>>, vector<16x16x4xf32>
    %24 = vector.shape_cast %23 : vector<16x16x4xf32> to vector<256x4xf32>
    %c2_39 = arith.constant 2 : index
    %c1_40 = arith.constant 1 : index
    %c0_41 = arith.constant 0 : index
    %25 = vector.load %arg6[%c2_39, %c1_40, %c0_41] : memref<18x18x4xf32, #tpu.memory_space<vmem>>, vector<16x16x4xf32>
    %26 = vector.shape_cast %25 : vector<16x16x4xf32> to vector<256x4xf32>
    %c2_42 = arith.constant 2 : index
    %c2_43 = arith.constant 2 : index
    %c0_44 = arith.constant 0 : index
    %27 = vector.load %arg6[%c2_42, %c2_43, %c0_44] : memref<18x18x4xf32, #tpu.memory_space<vmem>>, vector<16x16x4xf32>
    %28 = vector.shape_cast %27 : vector<16x16x4xf32> to vector<256x4xf32>
    %29 = tpu.concatenate %12, %14, %16, %18, %20, %22, %24, %26, %28 in 1 : vector<256x4xf32>, vector<256x4xf32>, vector<256x4xf32>, vector<256x4xf32>, vector<256x4xf32>, vector<256x4xf32>, vector<256x4xf32>, vector<256x4xf32>, vector<256x4xf32> -> vector<256x36xf32>
    %c0_45 = arith.constant 0 : index
    %c0_46 = arith.constant 0 : index
    %30 = vector.load %arg2[%c0_45, %c0_46] : memref<36x4xf32, #tpu.memory_space<vmem>>, vector<36x4xf32>
    %cst_47 = arith.constant dense<0.000000e+00> : vector<256x4xf32>
    %31 = tpu.matmul %29, %30, %cst_47 {dimension_numbers = #tpu.dot_dimension_numbers<[1], [0], [0], [1], [0, 0, 1, 1], [], []>} : vector<256x36xf32>, vector<36x4xf32>, vector<256x4xf32> -> vector<256x4xf32>
    %cst_48 = arith.constant 0.000000e+00 : f32
    %32 = vector.broadcast %cst_48 : f32 to vector<256x4xf32>
    %33 = arith.cmpf ogt, %31, %32 : vector<256x4xf32>
    %34 = vector.broadcast %3 : f32 to vector<256x4xf32>
    %35 = arith.mulf %34, %31 : vector<256x4xf32>
    %36 = arith.select %33, %31, %35 : vector<256x4xi1>, vector<256x4xf32>
    %37 = vector.shape_cast %36 : vector<256x4xf32> to vector<16x16x4xf32>
    %c1_49 = arith.constant 1 : index
    %c1_50 = arith.constant 1 : index
    %c0_51 = arith.constant 0 : index
    %38 = vector.load %arg6[%c1_49, %c1_50, %c0_51] : memref<18x18x4xf32, #tpu.memory_space<vmem>>, vector<16x16x4xf32>
    tpu.vector_store %arg6[%c1_49, %c1_50, %c0_51], %37 {strides = array<i32>} : memref<18x18x4xf32, #tpu.memory_space<vmem>>, vector<16x16x4xf32>,
    %c0_52 = arith.constant 0 : index
    %c0_53 = arith.constant 0 : index
    %c0_54 = arith.constant 0 : index
    %39 = vector.load %arg6[%c0_52, %c0_53, %c0_54] : memref<18x18x4xf32, #tpu.memory_space<vmem>>, vector<16x16x4xf32>
    %40 = vector.shape_cast %39 : vector<16x16x4xf32> to vector<256x4xf32>
    %c0_55 = arith.constant 0 : index
    %c1_56 = arith.constant 1 : index
    %c0_57 = arith.constant 0 : index
    %41 = vector.load %arg6[%c0_55, %c1_56, %c0_57] : memref<18x18x4xf32, #tpu.memory_space<vmem>>, vector<16x16x4xf32>
    %42 = vector.shape_cast %41 : vector<16x16x4xf32> to vector<256x4xf32>
    %c0_58 = arith.constant 0 : index
    %c2_59 = arith.constant 2 : index
    %c0_60 = arith.constant 0 : index
    %43 = vector.load %arg6[%c0_58, %c2_59, %c0_60] : memref<18x18x4xf32, #tpu.memory_space<vmem>>, vector<16x16x4xf32>
    %44 = vector.shape_cast %43 : vector<16x16x4xf32> to vector<256x4xf32>
    %c1_61 = arith.constant 1 : index
    %c0_62 = arith.constant 0 : index
    %c0_63 = arith.constant 0 : index
    %45 = vector.load %arg6[%c1_61, %c0_62, %c0_63] : memref<18x18x4xf32, #tpu.memory_space<vmem>>, vector<16x16x4xf32>
    %46 = vector.shape_cast %45 : vector<16x16x4xf32> to vector<256x4xf32>
    %c1_64 = arith.constant 1 : index
    %c1_65 = arith.constant 1 : index
    %c0_66 = arith.constant 0 : index
    %47 = vector.load %arg6[%c1_64, %c1_65, %c0_66] : memref<18x18x4xf32, #tpu.memory_space<vmem>>, vector<16x16x4xf32>
    %48 = vector.shape_cast %47 : vector<16x16x4xf32> to vector<256x4xf32>
    %c1_67 = arith.constant 1 : index
    %c2_68 = arith.constant 2 : index
    %c0_69 = arith.constant 0 : index
    %49 = vector.load %arg6[%c1_67, %c2_68, %c0_69] : memref<18x18x4xf32, #tpu.memory_space<vmem>>, vector<16x16x4xf32>
    %50 = vector.shape_cast %49 : vector<16x16x4xf32> to vector<256x4xf32>
    %c2_70 = arith.constant 2 : index
    %c0_71 = arith.constant 0 : index
    %c0_72 = arith.constant 0 : index
    %51 = vector.load %arg6[%c2_70, %c0_71, %c0_72] : memref<18x18x4xf32, #tpu.memory_space<vmem>>, vector<16x16x4xf32>
    %52 = vector.shape_cast %51 : vector<16x16x4xf32> to vector<256x4xf32>
    %c2_73 = arith.constant 2 : index
    %c1_74 = arith.constant 1 : index
    %c0_75 = arith.constant 0 : index
    %53 = vector.load %arg6[%c2_73, %c1_74, %c0_75] : memref<18x18x4xf32, #tpu.memory_space<vmem>>, vector<16x16x4xf32>
    %54 = vector.shape_cast %53 : vector<16x16x4xf32> to vector<256x4xf32>
    %c2_76 = arith.constant 2 : index
    %c2_77 = arith.constant 2 : index
    %c0_78 = arith.constant 0 : index
    %55 = vector.load %arg6[%c2_76, %c2_77, %c0_78] : memref<18x18x4xf32, #tpu.memory_space<vmem>>, vector<16x16x4xf32>
    %56 = vector.shape_cast %55 : vector<16x16x4xf32> to vector<256x4xf32>
    %57 = tpu.concatenate %40, %42, %44, %46, %48, %50, %52, %54, %56 in 1 : vector<256x4xf32>, vector<256x4xf32>, vector<256x4xf32>, vector<256x4xf32>, vector<256x4xf32>, vector<256x4xf32>, vector<256x4xf32>, vector<256x4xf32>, vector<256x4xf32> -> vector<256x36xf32>
    %c0_79 = arith.constant 0 : index
    %c0_80 = arith.constant 0 : index
    %58 = vector.load %arg3[%c0_79, %c0_80] : memref<36x4xf32, #tpu.memory_space<vmem>>, vector<36x4xf32>
    %cst_81 = arith.constant dense<0.000000e+00> : vector<256x4xf32>
    %59 = tpu.matmul %57, %58, %cst_81 {dimension_numbers = #tpu.dot_dimension_numbers<[1], [0], [0], [1], [0, 0, 1, 1], [], []>} : vector<256x36xf32>, vector<36x4xf32>, vector<256x4xf32> -> vector<256x4xf32>
    %60 = vector.shape_cast %59 : vector<256x4xf32> to vector<16x16x4xf32>
    %61 = arith.addf %60, %1 : vector<16x16x4xf32>
    %c0_82 = arith.constant 0 : index
    %c0_83 = arith.constant 0 : index
    %c0_84 = arith.constant 0 : index
    %c0_85 = arith.constant 0 : index
    %62 = vector.load %arg5[%c0_82, %c0_83, %c0_84, %c0_85] : memref<1x16x16x4xf32, #tpu.memory_space<vmem>>, vector<1x16x16x4xf32>
    %63 = vector.shape_cast %62 : vector<1x16x16x4xf32> to vector<16x16x4xf32>
    %64 = vector.shape_cast %61 : vector<16x16x4xf32> to vector<1x16x16x4xf32>
    tpu.vector_store %arg5[%c0_82, %c0_83, %c0_84, %c0_85], %64 {strides = array<i32>} : memref<1x16x16x4xf32, #tpu.memory_space<vmem>>, vector<1x16x16x4xf32>,
    return
  }
  func.func @transform_0(%arg0: i32) -> (i32, i32, i32, i32) {
    %c0_i32 = arith.constant 0 : i32
    %c0_i32_0 = arith.constant 0 : i32
    %c0_i32_1 = arith.constant 0 : i32
    %c0_i32_2 = arith.constant 0 : i32
    return %arg0, %c0_i32, %c0_i32_0, %c0_i32_1 : i32, i32, i32, i32
  }
  func.func @transform_1(%arg0: i32) -> (i32, i32) {
    %c0_i32 = arith.constant 0 : i32
    %c0_i32_0 = arith.constant 0 : i32
    %c0_i32_1 = arith.constant 0 : i32
    return %c0_i32, %c0_i32_0 : i32, i32
  }
  func.func @transform_2(%arg0: i32) -> (i32, i32) {
    %c0_i32 = arith.constant 0 : i32
    %c0_i32_0 = arith.constant 0 : i32
    %c0_i32_1 = arith.constant 0 : i32
    return %c0_i32, %c0_i32_0 : i32, i32
  }
  func.func @transform_3(%arg0: i32) -> (i32, i32) {
    %c0_i32 = arith.constant 0 : i32
    %c0_i32_0 = arith.constant 0 : i32
    %c0_i32_1 = arith.constant 0 : i32
    return %c0_i32, %c0_i32_0 : i32, i32
  }
  func.func @transform_4(%arg0: i32) -> (i32, i32, i32, i32) {
    %c0_i32 = arith.constant 0 : i32
    %c0_i32_0 = arith.constant 0 : i32
    %c0_i32_1 = arith.constant 0 : i32
    %c0_i32_2 = arith.constant 0 : i32
    return %arg0, %c0_i32, %c0_i32_0, %c0_i32_1 : i32, i32, i32, i32
  }
}

</mosaic_0001>

<bundles_post_ra>
// kernel: tpu_custom_call.1
= control target key start
LH: loop header
LB: loop body
LE: loop exit
PB: predicated region body
PF: predicated region fallthrough
CT: control target
= control target key end

     0   :  { %s4752_s17 = smov 0   ;;  %s7769_s0 = inlined_call_operand.vmem [shape: f32[2,16,16,4], index: 0, kind: input, shape index: {}]   ;;  %s7770_s1 = inlined_call_operand.vmem [shape: f32[36,4], index: 1, kind: input, shape index: {}]   ;;  %s7771_s2 = inlined_call_operand.vmem [shape: f32[36,4], index: 2, kind: input, shape index: {}]   ;;  %s7772_s3 = inlined_call_operand.<no memory space> [shape: f32[1,1], index: 3, kind: input, shape index: {}]   ;;  %s7773_s4 = inlined_call_operand.vmem [shape: f32[2,16,16,4], index: 4, kind: output, shape index: {}]  }
   0x1   :  { %v9_v0 = vstv %s7772_s3 }
   0x2   :  { %10 = vst [vmem:[#allocation3] sm:$0x1] %v9_v0 }
   0x3 LB: > { %s4365_s18 = sadd.s32 4294967295, %s4713_s17   ;;  %p4369_p0 = scmp.ge.s32.totalorder %s4713_s17, 1  ;;  %s4713_s17 = sphi %s4752_s17, %s16_s17  }
   0x4   : > { %p164_p1 = scmp.lt.s32.totalorder %s4713_s17, 3 }
   0x6   : > { %p165_p2 = pnand %p4369_p0, %p164_p1 }
   0x8   : > { %168 = sbr.rel (%p165_p2) target bundleno = 1667 (0x683), region = 36 }
   0xf   : > { %vm234_vm0 = vcmask 31744   ;;  %vm237_vm1 = vcmask 25600   ;;  %p4762_p3 = scmp.lt.s32.totalorder %s4365_s18, 1  ;;  %vm243_vm2 = vcmask 24576   ;;  %v4715_v1 = vmov 0.0   ;;  %s4716_s23 = smov 4  }
  0x10   : > { %235 = vst.msk [vmem:[#allocation2] sm:$0xff] %vm234_vm0, %v4715_v1  ;;  %236 = vst.msk [vmem:[#allocation2 + $0x8] sm:$0xff] %vm234_vm0, %v4715_v1  ;;  %s4717_s24 = smov 8   ;;  %s4718_s25 = smov 12   ;;  %vm1991_vm3 = vcmask 1043456   ;;  %vm1658_vm4 = vcmask 64512  }
  0x11   : > { %240 = vst.msk [vmem:[#allocation2 + $0x198] sm:$0xff] %vm234_vm0, %v4715_v1  ;;  %241 = vst.msk [vmem:[#allocation2 + $0x1a0] sm:$0xff] %vm234_vm0, %v4715_v1  ;;  %s8405_s18 = smov (!%p4762_p3, %s4365_s18), 1  ;;  %s4719_s26 = smov 16   ;;  %vm1691_vm5 = vcmask 97280   ;;  %vm1724_vm6 = vcmask 130048  }
  0x12   : > { %238 = vst.msk [vmem:[#allocation2 + $0x10] sm:$0x3] %vm237_vm1, %v4715_v1  ;;  %242 = vst.msk [vmem:[#allocation2 + $0x1a8] sm:$0x3] %vm237_vm1, %v4715_v1  ;;  %s4442_s19 = sshll.u32 %s8405_s18, 8  ;;  %s4720_s27 = smov 20  }
  0x13   : > { %245 = vst.msk [vmem:[#allocation2 + $0x18] sm:$0x1] %vm243_vm2, %v4715_v1  ;;  %246 = vst.msk [vmem:[#allocation2 + $0x30] sm:$0x1] %vm243_vm2, %v4715_v1  ;;  %s4818_s22 = scalar_lea.vmem %s7769_s0, %s4442_s19  ;;  %s4721_s28 = smov 24   ;;  %vm1757_vm7 = vcmask 162816  }
  0x14   : > { %247 = vst.msk [vmem:[#allocation2 + $0x48] sm:$0x1] %vm243_vm2, %v4715_v1  ;;  %248 = vst.msk [vmem:[#allocation2 + $0x60] sm:$0x1] %vm243_vm2, %v4715_v1  ;;  %v4821_v2 = vld [vmem:[%s4818_s22] sm:$0xff]  ;;  %v4824_v3 = vld [vmem:[%s4818_s22 + $0x10] sm:$0xff] }
  0x15   : > { %249 = vst.msk [vmem:[#allocation2 + $0x78] sm:$0x1] %vm243_vm2, %v4715_v1  ;;  %250 = vst.msk [vmem:[#allocation2 + $0x90] sm:$0x1] %vm243_vm2, %v4715_v1  ;;  %v4827_v4 = vld [vmem:[%s4818_s22 + $0x8] sm:$0xff]  ;;  %v4836_v5 = vld [vmem:[%s4818_s22 + $0x20] sm:$0xff] }
  0x16   : > { %251 = vst.msk [vmem:[#allocation2 + $0xa8] sm:$0x1] %vm243_vm2, %v4715_v1  ;;  %252 = vst.msk [vmem:[#allocation2 + $0xc0] sm:$0x1] %vm243_vm2, %v4715_v1  ;;  %v4839_v6 = vld [vmem:[%s4818_s22 + $0x18] sm:$0xff]  ;;  %v4842_v7 = vld [vmem:[%s4818_s22 + $0x30] sm:$0xff] }
  0x17   : > { %253 = vst.msk [vmem:[#allocation2 + $0xd8] sm:$0x1] %vm243_vm2, %v4715_v1  ;;  %254 = vst.msk [vmem:[#allocation2 + $0xf0] sm:$0x1] %vm243_vm2, %v4715_v1  ;;  %v345_v8 = vld [vmem:[#allocation2 + $0x1] sm:$0xff]  ;;  %v4860_v12 = vld [vmem:[%s4818_s22 + $0x38] sm:$0xff] }
  0x18   : > { %255 = vst.msk [vmem:[#allocation2 + $0x108] sm:$0x1] %vm243_vm2, %v4715_v1  ;;  %256 = vst.msk [vmem:[#allocation2 + $0x120] sm:$0x1] %vm243_vm2, %v4715_v1  ;;  %v4851_v10 = vld [vmem:[%s4818_s22 + $0x28] sm:$0xff]  ;;  %634 = vrot.lane.b32.xlu0 %v345_v8, %s4716_s23  ;;  %v4857_v11 = vld [vmem:[%s4818_s22 + $0x40] sm:$0xff] }
  0x19   : > { %257 = vst.msk [vmem:[#allocation2 + $0x138] sm:$0x1] %vm243_vm2, %v4715_v1  ;;  %258 = vst.msk [vmem:[#allocation2 + $0x150] sm:$0x1] %vm243_vm2, %v4715_v1  ;;  %v346_v9 = vld [vmem:[#allocation2 + $0x9] sm:$0xff]  ;;  %v4875_v15 = vld [vmem:[%s4818_s22 + $0x60] sm:$0xff] }
  0x1a   : > { %259 = vst.msk [vmem:[#allocation2 + $0x168] sm:$0x1] %vm243_vm2, %v4715_v1  ;;  %260 = vst.msk [vmem:[#allocation2 + $0x180] sm:$0x1] %vm243_vm2, %v4715_v1  ;;  %v4863_v13 = vld [vmem:[%s4818_s22 + $0x50] sm:$0xff]  ;;  %v4872_v14 = vld [vmem:[%s4818_s22 + $0x48] sm:$0xff] }
  0x1b   : > { %263 = vst.msk [vmem:[#allocation2 + $0x29] sm:$0x1] %vm243_vm2, %v4715_v1  ;;  %264 = vst.msk [vmem:[#allocation2 + $0x41] sm:$0x1] %vm243_vm2, %v4715_v1  ;;  %v4878_v16 = vld [vmem:[%s4818_s22 + $0x58] sm:$0xff]  ;;  %v4887_v17 = vld [vmem:[%s4818_s22 + $0x70] sm:$0xff] }
  0x1c   : > { %265 = vst.msk [vmem:[#allocation2 + $0x59] sm:$0x1] %vm243_vm2, %v4715_v1  ;;  %266 = vst.msk [vmem:[#allocation2 + $0x71] sm:$0x1] %vm243_vm2, %v4715_v1  ;;  %v4890_v18 = vld [vmem:[%s4818_s22 + $0x68] sm:$0xff]  ;;  %v4893_v19 = vld [vmem:[%s4818_s22 + $0x80] sm:$0xff]  ;;  %636 = vrot.lane.b32.xlu0 %v346_v9, %s4716_s23 }
  0x1d   : > { %267 = vst.msk [vmem:[#allocation2 + $0x89] sm:$0x1] %vm243_vm2, %v4715_v1  ;;  %268 = vst.msk [vmem:[#allocation2 + $0xa1] sm:$0x1] %vm243_vm2, %v4715_v1  ;;  %v4902_v20 = vld [vmem:[%s4818_s22 + $0x78] sm:$0xff]  ;;  %v4905_v21 = vld [vmem:[%s4818_s22 + $0x90] sm:$0xff] }
  0x1e   : > { %269 = vst.msk [vmem:[#allocation2 + $0xb9] sm:$0x1] %vm243_vm2, %v4715_v1  ;;  %270 = vst.msk [vmem:[#allocation2 + $0xd1] sm:$0x1] %vm243_vm2, %v4715_v1  ;;  %v4908_v22 = vld [vmem:[%s4818_s22 + $0x88] sm:$0xff]  ;;  %v4918_v23 = vld [vmem:[%s4818_s22 + $0xa0] sm:$0xff] }
  0x1f   : > { %271 = vst.msk [vmem:[#allocation2 + $0xe9] sm:$0x1] %vm243_vm2, %v4715_v1  ;;  %272 = vst.msk [vmem:[#allocation2 + $0x101] sm:$0x1] %vm243_vm2, %v4715_v1  ;;  %v4921_v24 = vld [vmem:[%s4818_s22 + $0x98] sm:$0xff]  ;;  %v4924_v25 = vld [vmem:[%s4818_s22 + $0xb0] sm:$0xff] }
  0x20   : > { %273 = vst.msk [vmem:[#allocation2 + $0x119] sm:$0x1] %vm243_vm2, %v4715_v1  ;;  %274 = vst.msk [vmem:[#allocation2 + $0x131] sm:$0x1] %vm243_vm2, %v4715_v1  ;;  %v4941_v29 = vld [vmem:[%s4818_s22 + $0xa8] sm:$0xff]  ;;  %v4944_v30 = vld [vmem:[%s4818_s22 + $0xc0] sm:$0xff] }
  0x21   : > { %275 = vst.msk [vmem:[#allocation2 + $0x149] sm:$0x1] %vm243_vm2, %v4715_v1  ;;  %276 = vst.msk [vmem:[#allocation2 + $0x161] sm:$0x1] %vm243_vm2, %v4715_v1  ;;  %v4963_v34 = vld [vmem:[%s4818_s22 + $0xb8] sm:$0xff]  ;;  %v4966_v35 = vld [vmem:[%s4818_s22 + $0xd0] sm:$0xff] }
  0x22   : > { %277 = vst.msk [vmem:[#allocation2 + $0x179] sm:$0x1] %vm243_vm2, %v4715_v1  ;;  %278 = vst.msk [vmem:[#allocation2 + $0x191] sm:$0x1] %vm243_vm2, %v4715_v1  ;;  %v4969_v36 = vld [vmem:[%s4818_s22 + $0xc8] sm:$0xff]  ;;  %v4980_v37 = vld [vmem:[%s4818_s22 + $0xe0] sm:$0xff] }
  0x23   : > { %262 = vst.msk [vmem:[#allocation2 + $0x11] sm:$0x1] %vm243_vm2, %v4715_v1  ;;  %244 = vst.msk [vmem:[#allocation2] sm:$0x1] %vm243_vm2, %v4715_v1  ;;  %v4983_v38 = vld [vmem:[%s4818_s22 + $0xd8] sm:$0xff]  ;;  %v4992_v40 = vld [vmem:[%s4818_s22 + $0xe8] sm:$0xff] }
  0x24   : > { %261 = vst.msk [vmem:[#allocation2 + $0x198] sm:$0x1] %vm243_vm2, %v4715_v1  ;;  %279 = vst.msk [vmem:[#allocation2 + $0x1a9] sm:$0x1] %vm243_vm2, %v4715_v1  ;;  %v5069_v59 = vld [vmem:[%s4818_s22 + $0xf0] sm:$0xff]  ;;  %v5086_v63 = vld [vmem:[%s4818_s22 + $0xf8] sm:$0xff] }
  0x25   : > { %7846 = vst [vmem:[#allocation4_spill] sm:$0xff] %v4821_v2  ;;  %7847 = vst [vmem:[#allocation5_spill] sm:$0xff] %v4824_v3  ;;  %v377_v1 = vld [vmem:[#allocation2 + $0x2] sm:$0xff]  ;;  %s4722_s7 = smov 28   ;;  %s4723_s14 = smov 32   ;;  %vm1790_vm8 = vcmask 195584  }
  0x26   : > { %7848 = vst [vmem:[#allocation6_spill] sm:$0xff] %v4827_v4  ;;  %281 = vst.msk [vmem:[#allocation2 + $0x19] sm:$0xff] %vm234_vm0, %v4821_v2  ;;  %vm1823_vm9 = vcmask 228352   ;;  %vm1856_vm10 = vcmask 261120   ;;  %vm1894_vm11 = vcmask 293888  }
  0x27   : > { %283 = vst.msk [vmem:[#allocation2 + $0x31] sm:$0xff] %vm234_vm0, %v4824_v3  ;;  %282 = vst.msk [vmem:[#allocation2 + $0x21] sm:$0xff] %vm234_vm0, %v4827_v4 }
  0x28   : > { %7849 = vst [vmem:[#allocation7_spill] sm:$0xff] %v4836_v5  ;;  %7850 = vst [vmem:[#allocation8_spill] sm:$0xff] %v4839_v6 }
  0x29   : > { %7851 = vst [vmem:[#allocation9_spill] sm:$0xff] %v4842_v7  ;;  %285 = vst.msk [vmem:[#allocation2 + $0x49] sm:$0xff] %vm234_vm0, %v4836_v5 }
  0x2a   : > { %284 = vst.msk [vmem:[#allocation2 + $0x39] sm:$0xff] %vm234_vm0, %v4839_v6  ;;  %287 = vst.msk [vmem:[#allocation2 + $0x61] sm:$0xff] %vm234_vm0, %v4842_v7 }
  0x2b   : > { %7852 = vst [vmem:[#allocation10_spill] sm:$0xff] %v4851_v10  ;;  %286 = vst.msk [vmem:[#allocation2 + $0x51] sm:$0xff] %vm234_vm0, %v4851_v10 }
  0x2c   : > { %7853 = vst [vmem:[#allocation11_spill] sm:$0xff] %v4857_v11  ;;  %7854 = vst [vmem:[#allocation12_spill] sm:$0xff] %v4860_v12 }
  0x2d   : > { %7855 = vst [vmem:[#allocation13_spill] sm:$0xff] %v4863_v13  ;;  %289 = vst.msk [vmem:[#allocation2 + $0x79] sm:$0xff] %vm234_vm0, %v4857_v11  ;;  %v4926_v26 = vld [vmem:[#allocation2 + $0x19] sm:$0xff] }
  0x2e   : > { %288 = vst.msk [vmem:[#allocation2 + $0x69] sm:$0xff] %vm234_vm0, %v4860_v12  ;;  %291 = vst.msk [vmem:[#allocation2 + $0x91] sm:$0xff] %vm234_vm0, %v4863_v13  ;;  %v4928_v27 = vld [vmem:[#allocation2 + $0x31] sm:$0xff]  ;;  %638 = vrot.lane.b32.xlu1 %v4926_v26, %s4716_s23  ;;  %v4938_v28 = vld [vmem:[#allocation2 + $0x21] sm:$0xff] }
  0x2f   : > { %7856 = vst [vmem:[#allocation14_spill] sm:$0xff] %v4872_v14  ;;  %7857 = vst [vmem:[#allocation15_spill] sm:$0xff] %v4875_v15  ;;  %642 = vrot.lane.b32.xlu0 %v4928_v27, %s4716_s23  ;;  %v5101_v9 = vld [vmem:[#allocation2 + $0x1a] sm:$0xff] }
  0x30   : > { %7858 = vst [vmem:[#allocation16_spill] sm:$0xff] %v4878_v16  ;;  %290 = vst.msk [vmem:[#allocation2 + $0x81] sm:$0xff] %vm234_vm0, %v4872_v14  ;;  %v4952_v31 = vld [vmem:[#allocation2 + $0x49] sm:$0xff] }
  0x31   : > { %293 = vst.msk [vmem:[#allocation2 + $0xa9] sm:$0xff] %vm234_vm0, %v4875_v15  ;;  %292 = vst.msk [vmem:[#allocation2 + $0x99] sm:$0xff] %vm234_vm0, %v4878_v16  ;;  %v4956_v32 = vld [vmem:[#allocation2 + $0x39] sm:$0xff]  ;;  %v4960_v33 = vld [vmem:[#allocation2 + $0x61] sm:$0xff] }
  0x32   : > { %7859 = vst [vmem:[#allocation17_spill] sm:$0xff] %v4887_v17  ;;  %7860 = vst [vmem:[#allocation18_spill] sm:$0xff] %v4890_v18  ;;  %640 = vrot.lane.b32.xlu1 %v4938_v28, %s4716_s23  ;;  %v4985_v39 = vld [vmem:[#allocation2 + $0x51] sm:$0xff] }
  0x33   : > { %7861 = vst [vmem:[#allocation19_spill] sm:$0xff] %v4893_v19  ;;  %295 = vst.msk [vmem:[#allocation2 + $0xc1] sm:$0xff] %vm234_vm0, %v4887_v17  ;;  %646 = vrot.lane.b32.xlu0 %v4952_v31, %s4716_s23 }
  0x34   : > { %294 = vst.msk [vmem:[#allocation2 + $0xb1] sm:$0xff] %vm234_vm0, %v4890_v18  ;;  %297 = vst.msk [vmem:[#allocation2 + $0xd9] sm:$0xff] %vm234_vm0, %v4893_v19  ;;  %v4998_v41 = vld [vmem:[#allocation2 + $0x79] sm:$0xff] }
  0x35   : > { %7862 = vst [vmem:[#allocation20_spill] sm:$0xff] %v4902_v20  ;;  %7863 = vst [vmem:[#allocation21_spill] sm:$0xff] %v4905_v21  ;;  %v5002_v42 = vld [vmem:[#allocation2 + $0x69] sm:$0xff]  ;;  %v5006_v43 = vld [vmem:[#allocation2 + $0x91] sm:$0xff] }
  0x36   : > { %7864 = vst [vmem:[#allocation22_spill] sm:$0xff] %v4908_v22  ;;  %296 = vst.msk [vmem:[#allocation2 + $0xc9] sm:$0xff] %vm234_vm0, %v4902_v20  ;;  %644 = vrot.lane.b32.xlu1 %v4956_v32, %s4716_s23 }
  0x37   : > { %299 = vst.msk [vmem:[#allocation2 + $0xf1] sm:$0xff] %vm234_vm0, %v4905_v21  ;;  %298 = vst.msk [vmem:[#allocation2 + $0xe1] sm:$0xff] %vm234_vm0, %v4908_v22  ;;  %650 = vrot.lane.b32.xlu0 %v4960_v33, %s4716_s23  ;;  %v5010_v44 = vld [vmem:[#allocation2 + $0x81] sm:$0xff] }
  0x38   : > { %7865 = vst [vmem:[#allocation23_spill] sm:$0xff] %v4918_v23  ;;  %7866 = vst [vmem:[#allocation24_spill] sm:$0xff] %v4921_v24  ;;  %v5014_v45 = vld [vmem:[#allocation2 + $0xa9] sm:$0xff]  ;;  %v5018_v46 = vld [vmem:[#allocation2 + $0x99] sm:$0xff] }
  0x39   : > { %7867 = vst [vmem:[#allocation25_spill] sm:$0xff] %v4924_v25  ;;  %301 = vst.msk [vmem:[#allocation2 + $0x109] sm:$0xff] %vm234_vm0, %v4918_v23  ;;  %v5150_v23 = vld [vmem:[#allocation2 + $0x9a] sm:$0xff] }
  0x3a   : > { %300 = vst.msk [vmem:[#allocation2 + $0xf9] sm:$0xff] %vm234_vm0, %v4921_v24  ;;  %303 = vst.msk [vmem:[#allocation2 + $0x121] sm:$0xff] %vm234_vm0, %v4924_v25  ;;  %648 = vrot.lane.b32.xlu1 %v4985_v39, %s4716_s23  ;;  %v5022_v47 = vld [vmem:[#allocation2 + $0xc1] sm:$0xff] }
  0x3b   : > { %7868 = vst [vmem:[#allocation26_spill] sm:$0xff] %v4941_v29  ;;  %7869 = vst [vmem:[#allocation27_spill] sm:$0xff] %v4944_v30  ;;  %654 = vrot.lane.b32.xlu0 %v4998_v41, %s4716_s23  ;;  %v5026_v48 = vld [vmem:[#allocation2 + $0xb1] sm:$0xff]  ;;  %v5030_v49 = vld [vmem:[#allocation2 + $0xd9] sm:$0xff] }
  0x3c   : > { %302 = vst.msk [vmem:[#allocation2 + $0x111] sm:$0xff] %vm234_vm0, %v4941_v29  ;;  %305 = vst.msk [vmem:[#allocation2 + $0x139] sm:$0xff] %vm234_vm0, %v4944_v30  ;;  %v5134_v30 = vld [vmem:[#allocation2 + $0x6a] sm:$0xff]  ;;  %v5142_v25 = vld [vmem:[#allocation2 + $0x82] sm:$0xff] }
  0x3d   : > { %7870 = vst [vmem:[#allocation28_spill] sm:$0xff] %v4963_v34  ;;  %7871 = vst [vmem:[#allocation29_spill] sm:$0xff] %v4966_v35  ;;  %v5034_v50 = vld [vmem:[#allocation2 + $0xc9] sm:$0xff]  ;;  %v5158_v21 = vld [vmem:[#allocation2 + $0xb2] sm:$0xff] }
  0x3e   : > { %7872 = vst [vmem:[#allocation30_spill] sm:$0xff] %v4969_v36  ;;  %304 = vst.msk [vmem:[#allocation2 + $0x129] sm:$0xff] %vm234_vm0, %v4963_v34  ;;  %652 = vrot.lane.b32.xlu1 %v5002_v42, %s4716_s23  ;;  %v5038_v51 = vld [vmem:[#allocation2 + $0xf1] sm:$0xff]  ;;  %v5042_v52 = vld [vmem:[#allocation2 + $0xe1] sm:$0xff] }
  0x3f   : > { %307 = vst.msk [vmem:[#allocation2 + $0x151] sm:$0xff] %vm234_vm0, %v4966_v35  ;;  %306 = vst.msk [vmem:[#allocation2 + $0x141] sm:$0xff] %vm234_vm0, %v4969_v36  ;;  %658 = vrot.lane.b32.xlu0 %v5006_v43, %s4716_s23  ;;  %v5122_v35 = vld [vmem:[#allocation2 + $0x62] sm:$0xff]  ;;  %v5138_v36 = vld [vmem:[#allocation2 + $0x92] sm:$0xff] }
  0x40   : > { %7873 = vst [vmem:[#allocation31_spill] sm:$0xff] %v4980_v37  ;;  %7874 = vst [vmem:[#allocation32_spill] sm:$0xff] %v4983_v38  ;;  %v5046_v53 = vld [vmem:[#allocation2 + $0x109] sm:$0xff]  ;;  %v5162_v24 = vld [vmem:[#allocation2 + $0xda] sm:$0xff] }
  0x41   : > { %309 = vst.msk [vmem:[#allocation2 + $0x169] sm:$0xff] %vm234_vm0, %v4980_v37  ;;  %308 = vst.msk [vmem:[#allocation2 + $0x159] sm:$0xff] %vm234_vm0, %v4983_v38  ;;  %v5050_v54 = vld [vmem:[#allocation2 + $0xf9] sm:$0xff]  ;;  %v5054_v55 = vld [vmem:[#allocation2 + $0x121] sm:$0xff] }
  0x42   : > { %7875 = vst [vmem:[#allocation33_spill] sm:$0xff] %v4992_v40  ;;  %310 = vst.msk [vmem:[#allocation2 + $0x171] sm:$0xff] %vm234_vm0, %v4992_v40  ;;  %656 = vrot.lane.b32.xlu1 %v5010_v44, %s4716_s23  ;;  %v5110_v37 = vld [vmem:[#allocation2 + $0x22] sm:$0xff]  ;;  %v5114_v40 = vld [vmem:[#allocation2 + $0x4a] sm:$0xff] }
  0x43   : > { %662 = vrot.lane.b32.xlu0 %v5014_v45, %s4716_s23  ;;  %v5058_v56 = vld [vmem:[#allocation2 + $0x111] sm:$0xff]  ;;  %v5062_v57 = vld [vmem:[#allocation2 + $0x139] sm:$0xff]  ;;  %7876 = vst [vmem:[#allocation34_spill] sm:$0xff] %v5069_v59  ;;  %311 = vst.msk [vmem:[#allocation2 + $0x181] sm:$0xff] %vm234_vm0, %v5069_v59 }
  0x44   : > { %7877 = vst [vmem:[#allocation35_spill] sm:$0xff] %v5086_v63  ;;  %312 = vst.msk [vmem:[#allocation2 + $0x189] sm:$0xff] %vm234_vm0, %v5086_v63  ;;  %v378_v59 = vld [vmem:[#allocation2 + $0xa] sm:$0xff]  ;;  %v5107_v63 = vld [vmem:[#allocation2 + $0x32] sm:$0xff] }
  0x45   : > { %v5066_v58 = vld [vmem:[#allocation2 + $0x129] sm:$0xff]  ;;  %v5130_v38 = vld [vmem:[#allocation2 + $0x7a] sm:$0xff]  ;;  %v5170_v22 = vld [vmem:[#allocation2 + $0xf2] sm:$0xff] }
  0x46   : > { %660 = vrot.lane.b32.xlu1 %v5018_v46, %s4716_s23  ;;  %v5075_v60 = vld [vmem:[#allocation2 + $0x151] sm:$0xff]  ;;  %v5079_v61 = vld [vmem:[#allocation2 + $0x141] sm:$0xff] }
  0x47   : > { %666 = vrot.lane.b32.xlu0 %v5022_v47, %s4716_s23  ;;  %v5146_v34 = vld [vmem:[#allocation2 + $0xaa] sm:$0xff]  ;;  %v5154_v29 = vld [vmem:[#allocation2 + $0xc2] sm:$0xff]  ;;  %v5182_v15 = vld [vmem:[#allocation2 + $0xfa] sm:$0xff] }
  0x48   : > { %v5083_v62 = vld [vmem:[#allocation2 + $0x169] sm:$0xff]  ;;  %v5092_v0 = vld [vmem:[#allocation2 + $0x159] sm:$0xff] }
  0x49   : > { %v5098_v8 = vld [vmem:[#allocation2 + $0x171] sm:$0xff]  ;;  %v5174_v17 = vld [vmem:[#allocation2 + $0xe2] sm:$0xff]  ;;  %v5194_v16 = vld [vmem:[#allocation2 + $0x13a] sm:$0xff] }
  0x4a   : > { %664 = vrot.lane.b32.xlu1 %v5026_v48, %s4716_s23  ;;  %v5166_v19 = vld [vmem:[#allocation2 + $0xca] sm:$0xff]  ;;  %v5186_v18 = vld [vmem:[#allocation2 + $0x122] sm:$0xff]  ;;  %v5190_v13 = vld [vmem:[#allocation2 + $0x112] sm:$0xff] }
  0x4b   : > { %670 = vrot.lane.b32.xlu0 %v5030_v49, %s4716_s23  ;;  %v5178_v20 = vld [vmem:[#allocation2 + $0x10a] sm:$0xff]  ;;  %v5204_v7 = vld [vmem:[#allocation2 + $0x152] sm:$0xff]  ;;  %v5210_v5 = vld [vmem:[#allocation2 + $0x142] sm:$0xff] }
  0x4c   : > { %v5200_v14 = vld [vmem:[#allocation2 + $0x12a] sm:$0xff]  ;;  %7880 = vst [vmem:[#allocation38_spill] sm:$0xff] %v5210_v5  ;;  %v5222_v2 = vld [vmem:[#allocation2 + $0x15a] sm:$0xff] }
  0x4d   : > { %v5216_v3 = vld [vmem:[#allocation2 + $0x16a] sm:$0xff]  ;;  %7884 = vst [vmem:[#allocation42_spill] sm:$0xff] %v5222_v2 }
  0x4e   : > { %668 = vrot.lane.b32.xlu1 %v5034_v50, %s4716_s23  ;;  %7882 = vst [vmem:[#allocation40_spill] sm:$0xff] %v5216_v3 }
  0x4f   : > { %674 = vrot.lane.b32.xlu0 %v5038_v51, %s4716_s23 }
  0x52   : > { %672 = vrot.lane.b32.xlu1 %v5042_v52, %s4716_s23 }
  0x53   : > { %678 = vrot.lane.b32.xlu0 %v5046_v53, %s4716_s23 }
  0x56   : > { %676 = vrot.lane.b32.xlu1 %v5050_v54, %s4716_s23 }
  0x57   : > { %682 = vrot.lane.b32.xlu0 %v5054_v55, %s4716_s23 }
  0x5a   : > { %680 = vrot.lane.b32.xlu1 %v5058_v56, %s4716_s23 }
  0x5b   : > { %686 = vrot.lane.b32.xlu0 %v5062_v57, %s4716_s23 }
  0x5e   : > { %684 = vrot.lane.b32.xlu1 %v5066_v58, %s4716_s23 }
  0x5f   : > { %690 = vrot.lane.b32.xlu0 %v5075_v60, %s4716_s23 }
  0x62   : > { %688 = vrot.lane.b32.xlu1 %v5079_v61, %s4716_s23 }
  0x63   : > { %694 = vrot.lane.b32.xlu0 %v5083_v62, %s4716_s23 }
  0x66   : > { %692 = vrot.lane.b32.xlu1 %v5092_v0, %s4716_s23 }
  0x67   : > { %762 = vrot.lane.b32.xlu0 %v377_v1, %s4717_s24  ;;  %v5118_v1 = vld [vmem:[#allocation2 + $0x3a] sm:$0xff] }
  0x6a   : > { %696 = vrot.lane.b32.xlu1 %v5098_v8, %s4716_s23 }
  0x6b   : > { %766 = vrot.lane.b32.xlu0 %v5101_v9, %s4717_s24 }
  0x6e   : > { %764 = vrot.lane.b32.xlu1 %v378_v59, %s4717_s24  ;;  %v5126_v59 = vld [vmem:[#allocation2 + $0x52] sm:$0xff] }
  0x6f   : > { %770 = vrot.lane.b32.xlu0 %v5107_v63, %s4717_s24 }
  0x72   : > { %768 = vrot.lane.b32.xlu1 %v5110_v37, %s4717_s24 }
  0x73   : > { %774 = vrot.lane.b32.xlu0 %v5114_v40, %s4717_s24 }
  0x76   : > { %772 = vrot.lane.b32.xlu1 %v5118_v1, %s4717_s24 }
  0x77   : > { %778 = vrot.lane.b32.xlu0 %v5122_v35, %s4717_s24 }
  0x7a   : > { %776 = vrot.lane.b32.xlu1 %v5126_v59, %s4717_s24 }
  0x7b   : > { %782 = vrot.lane.b32.xlu0 %v5130_v38, %s4717_s24 }
  0x7e   : > { %780 = vrot.lane.b32.xlu1 %v5134_v30, %s4717_s24 }
  0x7f   : > { %786 = vrot.lane.b32.xlu0 %v5138_v36, %s4717_s24 }
  0x82   : > { %784 = vrot.lane.b32.xlu1 %v5142_v25, %s4717_s24 }
  0x83   : > { %790 = vrot.lane.b32.xlu0 %v5146_v34, %s4717_s24 }
  0x86   : > { %788 = vrot.lane.b32.xlu1 %v5150_v23, %s4717_s24 }
  0x87   : > { %794 = vrot.lane.b32.xlu0 %v5154_v29, %s4717_s24 }
  0x8a   : > { %792 = vrot.lane.b32.xlu1 %v5158_v21, %s4717_s24  ;;  %v5196_v11 = vpop.permute.xlu0 %634 }
  0x8b   : > { %798 = vrot.lane.b32.xlu0 %v5162_v24, %s4717_s24  ;;  %7878 = vst [vmem:[#allocation36_spill] sm:$0xff] %v5196_v11  ;;  %v5232_v11 = vld [vmem:[#allocation2 + $0x172] sm:$0xff] }
  0x8c   : > { %7887 = vst [vmem:[#allocation45_spill] sm:$0xff] %v5232_v11 }
  0x8e   : > { %796 = vrot.lane.b32.xlu1 %v5166_v19, %s4717_s24  ;;  %v5206_v12 = vpop.permute.xlu0 %636 }
  0x8f   : > { %802 = vrot.lane.b32.xlu0 %v5170_v22, %s4717_s24  ;;  %7879 = vst [vmem:[#allocation37_spill] sm:$0xff] %v5206_v12 }
  0x92   : > { %800 = vrot.lane.b32.xlu1 %v5174_v17, %s4717_s24 }
  0x93   : > { %806 = vrot.lane.b32.xlu0 %v5178_v20, %s4717_s24 }
  0x96   : > { %804 = vrot.lane.b32.xlu1 %v5182_v15, %s4717_s24 }
  0x97   : > { %810 = vrot.lane.b32.xlu0 %v5186_v18, %s4717_s24 }
  0x9a   : > { %808 = vrot.lane.b32.xlu1 %v5190_v13, %s4717_s24 }
  0x9b   : > { %814 = vrot.lane.b32.xlu0 %v5194_v16, %s4717_s24 }
  0x9e   : > { %812 = vrot.lane.b32.xlu1 %v5200_v14, %s4717_s24 }
  0x9f   : > { %818 = vrot.lane.b32.xlu0 %v5204_v7, %s4717_s24 }
  0xa0   : > { %v5214_v10 = vpop.permute.xlu1 %638 }
  0xa1   : > { %7881 = vst [vmem:[#allocation39_spill] sm:$0xff] %v5214_v10  ;;  %v5218_v6 = vpop.permute.xlu0 %642  ;;  %v315_v10 = vld [vmem:[#allocation2 + $0x18] sm:$0xff] }
  0xa2   : > { %7883 = vst [vmem:[#allocation41_spill] sm:$0xff] %v5218_v6  ;;  %816 = vrot.lane.b32.xlu1 %v5210_v5, %s4717_s24 }
  0xa3   : > { %822 = vrot.lane.b32.xlu0 %v5216_v3, %s4717_s24  ;;  %v5241_v3 = vld [vmem:[#allocation2 + $0x30] sm:$0xff] }
  0xa4   : > { %v5226_v4 = vpop.permute.xlu1 %640  ;;  %7890 = vst [vmem:[#allocation48_spill] sm:$0xff] %v5241_v3 }
  0xa5   : > { %7885 = vst [vmem:[#allocation43_spill] sm:$0xff] %v5226_v4  ;;  %v5228_v12 = vpop.permute.xlu0 %646  ;;  %v316_v4 = vld [vmem:[#allocation2 + $0x20] sm:$0xff] }
  0xa6   : > { %7886 = vst [vmem:[#allocation44_spill] sm:$0xff] %v5228_v12  ;;  %820 = vrot.lane.b32.xlu1 %v5222_v2, %s4717_s24 }
  0xa7   : > { %890 = vrot.lane.b32.xlu0 %v315_v10, %s4718_s25  ;;  %v5250_v10 = vld [vmem:[#allocation2 + $0x48] sm:$0xff] }
  0xa8   : > { %v5235_v6 = vpop.permute.xlu1 %644  ;;  %7893 = vst [vmem:[#allocation51_spill] sm:$0xff] %v5250_v10 }
  0xa9   : > { %7888 = vst [vmem:[#allocation46_spill] sm:$0xff] %v5235_v6  ;;  %v5237_v5 = vpop.permute.xlu0 %650  ;;  %v5256_v6 = vld [vmem:[#allocation2 + $0x38] sm:$0xff] }
  0xaa   : > { %7889 = vst [vmem:[#allocation47_spill] sm:$0xff] %v5237_v5  ;;  %824 = vrot.lane.b32.xlu1 %v5232_v11, %s4717_s24  ;;  %7895 = vst [vmem:[#allocation53_spill] sm:$0xff] %v5256_v6 }
  0xab   : > { %894 = vrot.lane.b32.xlu0 %v5241_v3, %s4718_s25 }
  0xac   : > { %v5245_v12 = vpop.permute.xlu1 %648 }
  0xad   : > { %7891 = vst [vmem:[#allocation49_spill] sm:$0xff] %v5245_v12  ;;  %v5247_v2 = vpop.permute.xlu0 %654  ;;  %v5262_v12 = vld [vmem:[#allocation2 + $0x60] sm:$0xff] }
  0xae   : > { %7892 = vst [vmem:[#allocation50_spill] sm:$0xff] %v5247_v2  ;;  %892 = vrot.lane.b32.xlu1 %v316_v4, %s4718_s25  ;;  %7897 = vst [vmem:[#allocation55_spill] sm:$0xff] %v5262_v12  ;;  %v5268_v2 = vld [vmem:[#allocation2 + $0x50] sm:$0xff] }
  0xaf   : > { %898 = vrot.lane.b32.xlu0 %v5250_v10, %s4718_s25  ;;  %7899 = vst [vmem:[#allocation57_spill] sm:$0xff] %v5268_v2 }
  0xb0   : > { %v5254_v5 = vpop.permute.xlu1 %652 }
  0xb1   : > { %7894 = vst [vmem:[#allocation52_spill] sm:$0xff] %v5254_v5  ;;  %v5258_v11 = vpop.permute.xlu0 %658  ;;  %v5274_v5 = vld [vmem:[#allocation2 + $0x78] sm:$0xff] }
  0xb2   : > { %7896 = vst [vmem:[#allocation54_spill] sm:$0xff] %v5258_v11  ;;  %896 = vrot.lane.b32.xlu1 %v5256_v6, %s4718_s25  ;;  %7901 = vst [vmem:[#allocation59_spill] sm:$0xff] %v5274_v5  ;;  %v5280_v6 = vld [vmem:[#allocation2 + $0x68] sm:$0xff] }
  0xb3   : > { %902 = vrot.lane.b32.xlu0 %v5262_v12, %s4718_s25  ;;  %7903 = vst [vmem:[#allocation61_spill] sm:$0xff] %v5280_v6 }
  0xb4   : > { %v5266_v4 = vpop.permute.xlu1 %656 }
  0xb5   : > { %7898 = vst [vmem:[#allocation56_spill] sm:$0xff] %v5266_v4  ;;  %v5270_v3 = vpop.permute.xlu0 %662  ;;  %v5286_v4 = vld [vmem:[#allocation2 + $0x90] sm:$0xff] }
  0xb6   : > { %7900 = vst [vmem:[#allocation58_spill] sm:$0xff] %v5270_v3  ;;  %900 = vrot.lane.b32.xlu1 %v5268_v2, %s4718_s25  ;;  %7905 = vst [vmem:[#allocation63_spill] sm:$0xff] %v5286_v4  ;;  %v5292_v2 = vld [vmem:[#allocation2 + $0x80] sm:$0xff] }
  0xb7   : > { %906 = vrot.lane.b32.xlu0 %v5274_v5, %s4718_s25  ;;  %7907 = vst [vmem:[#allocation65_spill] sm:$0xff] %v5292_v2 }
  0xb8   : > { %v5278_v11 = vpop.permute.xlu1 %660 }
  0xb9   : > { %7902 = vst [vmem:[#allocation60_spill] sm:$0xff] %v5278_v11  ;;  %v5282_v10 = vpop.permute.xlu0 %666  ;;  %v5298_v11 = vld [vmem:[#allocation2 + $0xa8] sm:$0xff] }
  0xba   : > { %7904 = vst [vmem:[#allocation62_spill] sm:$0xff] %v5282_v10  ;;  %904 = vrot.lane.b32.xlu1 %v5280_v6, %s4718_s25  ;;  %7909 = vst [vmem:[#allocation67_spill] sm:$0xff] %v5298_v11  ;;  %v5304_v6 = vld [vmem:[#allocation2 + $0x98] sm:$0xff] }
  0xbb   : > { %910 = vrot.lane.b32.xlu0 %v5286_v4, %s4718_s25  ;;  %7911 = vst [vmem:[#allocation69_spill] sm:$0xff] %v5304_v6 }
  0xbc   : > { %v5290_v3 = vpop.permute.xlu1 %664 }
  0xbd   : > { %7906 = vst [vmem:[#allocation64_spill] sm:$0xff] %v5290_v3  ;;  %v5294_v12 = vpop.permute.xlu0 %670  ;;  %v5310_v3 = vld [vmem:[#allocation2 + $0xc0] sm:$0xff] }
  0xbe   : > { %7908 = vst [vmem:[#allocation66_spill] sm:$0xff] %v5294_v12  ;;  %908 = vrot.lane.b32.xlu1 %v5292_v2, %s4718_s25  ;;  %7913 = vst [vmem:[#allocation71_spill] sm:$0xff] %v5310_v3  ;;  %v5316_v2 = vld [vmem:[#allocation2 + $0xb0] sm:$0xff] }
  0xbf   : > { %914 = vrot.lane.b32.xlu0 %v5298_v11, %s4718_s25  ;;  %7915 = vst [vmem:[#allocation73_spill] sm:$0xff] %v5316_v2 }
  0xc0   : > { %v5302_v10 = vpop.permute.xlu1 %668 }
  0xc1   : > { %7910 = vst [vmem:[#allocation68_spill] sm:$0xff] %v5302_v10  ;;  %v5306_v5 = vpop.permute.xlu0 %674  ;;  %v5322_v10 = vld [vmem:[#allocation2 + $0xd8] sm:$0xff] }
  0xc2   : > { %7912 = vst [vmem:[#allocation70_spill] sm:$0xff] %v5306_v5  ;;  %912 = vrot.lane.b32.xlu1 %v5304_v6, %s4718_s25  ;;  %7917 = vst [vmem:[#allocation75_spill] sm:$0xff] %v5322_v10  ;;  %v5328_v6 = vld [vmem:[#allocation2 + $0xc8] sm:$0xff] }
  0xc3   : > { %918 = vrot.lane.b32.xlu0 %v5310_v3, %s4718_s25  ;;  %7919 = vst [vmem:[#allocation77_spill] sm:$0xff] %v5328_v6 }
  0xc4   : > { %v5314_v12 = vpop.permute.xlu1 %672 }
  0xc5   : > { %7914 = vst [vmem:[#allocation72_spill] sm:$0xff] %v5314_v12  ;;  %v5318_v4 = vpop.permute.xlu0 %678  ;;  %v5334_v12 = vld [vmem:[#allocation2 + $0xf0] sm:$0xff] }
  0xc6   : > { %7916 = vst [vmem:[#allocation74_spill] sm:$0xff] %v5318_v4  ;;  %916 = vrot.lane.b32.xlu1 %v5316_v2, %s4718_s25  ;;  %7921 = vst [vmem:[#allocation79_spill] sm:$0xff] %v5334_v12  ;;  %v5340_v2 = vld [vmem:[#allocation2 + $0xe0] sm:$0xff] }
  0xc7   : > { %922 = vrot.lane.b32.xlu0 %v5322_v10, %s4718_s25  ;;  %7923 = vst [vmem:[#allocation81_spill] sm:$0xff] %v5340_v2 }
  0xc8   : > { %v5326_v5 = vpop.permute.xlu1 %676 }
  0xc9   : > { %7918 = vst [vmem:[#allocation76_spill] sm:$0xff] %v5326_v5  ;;  %v5330_v11 = vpop.permute.xlu0 %682  ;;  %v5346_v5 = vld [vmem:[#allocation2 + $0x108] sm:$0xff] }
  0xca   : > { %7920 = vst [vmem:[#allocation78_spill] sm:$0xff] %v5330_v11  ;;  %920 = vrot.lane.b32.xlu1 %v5328_v6, %s4718_s25  ;;  %7925 = vst [vmem:[#allocation83_spill] sm:$0xff] %v5346_v5  ;;  %v5352_v6 = vld [vmem:[#allocation2 + $0xf8] sm:$0xff] }
  0xcb   : > { %926 = vrot.lane.b32.xlu0 %v5334_v12, %s4718_s25  ;;  %7927 = vst [vmem:[#allocation85_spill] sm:$0xff] %v5352_v6 }
  0xcc   : > { %v5338_v4 = vpop.permute.xlu1 %680 }
  0xcd   : > { %7922 = vst [vmem:[#allocation80_spill] sm:$0xff] %v5338_v4  ;;  %v5342_v3 = vpop.permute.xlu0 %686  ;;  %v5358_v4 = vld [vmem:[#allocation2 + $0x120] sm:$0xff] }
  0xce   : > { %7924 = vst [vmem:[#allocation82_spill] sm:$0xff] %v5342_v3  ;;  %924 = vrot.lane.b32.xlu1 %v5340_v2, %s4718_s25  ;;  %7929 = vst [vmem:[#allocation87_spill] sm:$0xff] %v5358_v4  ;;  %v5364_v2 = vld [vmem:[#allocation2 + $0x110] sm:$0xff] }
  0xcf   : > { %930 = vrot.lane.b32.xlu0 %v5346_v5, %s4718_s25  ;;  %7931 = vst [vmem:[#allocation89_spill] sm:$0xff] %v5364_v2 }
  0xd0   : > { %v5350_v11 = vpop.permute.xlu1 %684 }
  0xd1   : > { %7926 = vst [vmem:[#allocation84_spill] sm:$0xff] %v5350_v11  ;;  %v5354_v10 = vpop.permute.xlu0 %690  ;;  %v5370_v11 = vld [vmem:[#allocation2 + $0x138] sm:$0xff] }
  0xd2   : > { %7928 = vst [vmem:[#allocation86_spill] sm:$0xff] %v5354_v10  ;;  %928 = vrot.lane.b32.xlu1 %v5352_v6, %s4718_s25  ;;  %7933 = vst [vmem:[#allocation91_spill] sm:$0xff] %v5370_v11  ;;  %v5376_v6 = vld [vmem:[#allocation2 + $0x128] sm:$0xff] }
  0xd3   : > { %934 = vrot.lane.b32.xlu0 %v5358_v4, %s4718_s25  ;;  %7935 = vst [vmem:[#allocation93_spill] sm:$0xff] %v5376_v6 }
  0xd4   : > { %v5362_v3 = vpop.permute.xlu1 %688 }
  0xd5   : > { %7930 = vst [vmem:[#allocation88_spill] sm:$0xff] %v5362_v3  ;;  %v5366_v12 = vpop.permute.xlu0 %694  ;;  %v5382_v3 = vld [vmem:[#allocation2 + $0x150] sm:$0xff] }
  0xd6   : > { %7932 = vst [vmem:[#allocation90_spill] sm:$0xff] %v5366_v12  ;;  %932 = vrot.lane.b32.xlu1 %v5364_v2, %s4718_s25  ;;  %7937 = vst [vmem:[#allocation95_spill] sm:$0xff] %v5382_v3  ;;  %v5388_v2 = vld [vmem:[#allocation2 + $0x140] sm:$0xff] }
  0xd7   : > { %938 = vrot.lane.b32.xlu0 %v5370_v11, %s4718_s25  ;;  %7939 = vst [vmem:[#allocation97_spill] sm:$0xff] %v5388_v2  ;;  %v5402_v11 = vld [vmem:[#allocation2 + $0x180] sm:$0xff] }
  0xd8   : > { %v5374_v10 = vpop.permute.xlu1 %692 }
  0xd9   : > { %7934 = vst [vmem:[#allocation92_spill] sm:$0xff] %v5374_v10  ;;  %v5378_v5 = vpop.permute.xlu0 %762  ;;  %v5394_v10 = vld [vmem:[#allocation2 + $0x168] sm:$0xff] }
  0xda   : > { %7936 = vst [vmem:[#allocation94_spill] sm:$0xff] %v5378_v5  ;;  %936 = vrot.lane.b32.xlu1 %v5376_v6, %s4718_s25  ;;  %v5400_v6 = vld [vmem:[#allocation2 + $0x158] sm:$0xff] }
  0xdb   : > { %942 = vrot.lane.b32.xlu0 %v5382_v3, %s4718_s25  ;;  %7942 = vst [vmem:[#allocation100_spill] sm:$0xff] %v5400_v6 }
  0xdc   : > { %v5386_v12 = vpop.permute.xlu1 %696 }
  0xdd   : > { %7938 = vst [vmem:[#allocation96_spill] sm:$0xff] %v5386_v12  ;;  %v5390_v4 = vpop.permute.xlu0 %766 }
  0xde   : > { %7940 = vst [vmem:[#allocation98_spill] sm:$0xff] %v5390_v4  ;;  %940 = vrot.lane.b32.xlu1 %v5388_v2, %s4718_s25  ;;  %v5412_v4 = vld [vmem:[#allocation2 + $0x170] sm:$0xff] }
  0xdf   : > { %946 = vrot.lane.b32.xlu0 %v5394_v10, %s4718_s25 }
  0xe0   : > { %v5398_v5 = vpop.permute.xlu1 %764 }
  0xe1   : > { %7941 = vst [vmem:[#allocation99_spill] sm:$0xff] %v5398_v5  ;;  %v5404_v3 = vpop.permute.xlu0 %770  ;;  %v5418_v5 = vld [vmem:[#allocation2 + $0x188] sm:$0xff] }
  0xe2   : > { %7943 = vst [vmem:[#allocation101_spill] sm:$0xff] %v5404_v3  ;;  %944 = vrot.lane.b32.xlu1 %v5400_v6, %s4718_s25 }
  0xe3   : > { %950 = vrot.lane.b32.xlu0 %v5402_v11, %s4718_s25 }
  0xe4   : > { %v5410_v12 = vpop.permute.xlu1 %768 }
  0xe5   : > { %7944 = vst [vmem:[#allocation102_spill] sm:$0xff] %v5410_v12  ;;  %v5414_v2 = vpop.permute.xlu0 %774 }
  0xe6   : > { %7945 = vst [vmem:[#allocation103_spill] sm:$0xff] %v5414_v2  ;;  %948 = vrot.lane.b32.xlu1 %v5412_v4, %s4718_s25 }
  0xe7   : > { %1018 = vrot.lane.b32.xlu0 %v4926_v26, %s4719_s26 }
  0xe8   : > { %v5422_v3 = vpop.permute.xlu1 %772 }
  0xe9   : > { %7946 = vst [vmem:[#allocation104_spill] sm:$0xff] %v5422_v3  ;;  %v5424_v6 = vpop.permute.xlu0 %778 }
  0xea   : > { %7947 = vst [vmem:[#allocation105_spill] sm:$0xff] %v5424_v6  ;;  %952 = vrot.lane.b32.xlu1 %v5418_v5, %s4718_s25 }
  0xeb   : > { %1022 = vrot.lane.b32.xlu0 %v4928_v27, %s4719_s26 }
  0xec   : > { %v5430_v2 = vpop.permute.xlu1 %776 }
  0xed   : > { %v5432_v12 = vpop.permute.xlu0 %782 }
  0xee   : > { %1020 = vrot.lane.b32.xlu1 %v4938_v28, %s4719_s26 }
  0xef   : > { %1026 = vrot.lane.b32.xlu0 %v4952_v31, %s4719_s26 }
  0xf0   : > { %v5438_v26 = vpop.permute.xlu1 %780 }
  0xf1   : > { %v5440_v3 = vpop.permute.xlu0 %786 }
  0xf2   : > { %7948 = vst [vmem:[#allocation106_spill] sm:$0xff] %v5440_v3  ;;  %1024 = vrot.lane.b32.xlu1 %v4956_v32, %s4719_s26 }
  0xf3   : > { %1030 = vrot.lane.b32.xlu0 %v4960_v33, %s4719_s26 }
  0xf4   : > { %v5446_v27 = vpop.permute.xlu1 %784 }
  0xf5   : > { %7949 = vst [vmem:[#allocation107_spill] sm:$0xff] %v5446_v27  ;;  %v5448_v6 = vpop.permute.xlu0 %790 }
  0xf6   : > { %7950 = vst [vmem:[#allocation108_spill] sm:$0xff] %v5448_v6  ;;  %1028 = vrot.lane.b32.xlu1 %v4985_v39, %s4719_s26 }
  0xf7   : > { %1034 = vrot.lane.b32.xlu0 %v4998_v41, %s4719_s26 }
  0xf8   : > { %v5454_v28 = vpop.permute.xlu1 %788 }
  0xf9   : > { %7951 = vst [vmem:[#allocation109_spill] sm:$0xff] %v5454_v28  ;;  %v5456_v31 = vpop.permute.xlu0 %794 }
  0xfa   : > { %7952 = vst [vmem:[#allocation110_spill] sm:$0xff] %v5456_v31  ;;  %1032 = vrot.lane.b32.xlu1 %v5002_v42, %s4719_s26 }
  0xfb   : > { %1038 = vrot.lane.b32.xlu0 %v5006_v43, %s4719_s26 }
  0xfc   : > { %v5462_v32 = vpop.permute.xlu1 %792 }
  0xfd   : > { %7953 = vst [vmem:[#allocation111_spill] sm:$0xff] %v5462_v32  ;;  %v5464_v33 = vpop.permute.xlu0 %798  ;;  %v574_v32 = vld [vmem:[#allocation2 + $0x62] sm:$0xff] }
  0xfe   : > { %7954 = vst [vmem:[#allocation112_spill] sm:$0xff] %v5464_v33  ;;  %1036 = vrot.lane.b32.xlu1 %v5010_v44, %s4719_s26  ;;  %v1891_v33 = vld [vmem:[%s7770_s1 + $0x10] sm:$0xff] }
  0xff   : > { %1042 = vrot.lane.b32.xlu0 %v5014_v45, %s4719_s26 }
 0x100   : > { %v5470_v39 = vpop.permute.xlu1 %796 }
 0x101   : > { %7955 = vst [vmem:[#allocation113_spill] sm:$0xff] %v5470_v39  ;;  %v5472_v41 = vpop.permute.xlu0 %802 }
 0x102   : > { %7956 = vst [vmem:[#allocation114_spill] sm:$0xff] %v5472_v41  ;;  %1040 = vrot.lane.b32.xlu1 %v5018_v46, %s4719_s26 }
 0x103   : > { %1046 = vrot.lane.b32.xlu0 %v5022_v47, %s4719_s26 }
 0x104   : > { %v5478_v42 = vpop.permute.xlu1 %800 }
 0x105   : > { %7957 = vst [vmem:[#allocation115_spill] sm:$0xff] %v5478_v42  ;;  %v5480_v43 = vpop.permute.xlu0 %806 }
 0x106   : > { %7958 = vst [vmem:[#allocation116_spill] sm:$0xff] %v5480_v43  ;;  %1044 = vrot.lane.b32.xlu1 %v5026_v48, %s4719_s26 }
 0x107   : > { %1050 = vrot.lane.b32.xlu0 %v5030_v49, %s4719_s26 }
 0x108   : > { %v5486_v44 = vpop.permute.xlu1 %804 }
 0x109   : > { %7959 = vst [vmem:[#allocation117_spill] sm:$0xff] %v5486_v44  ;;  %v5488_v45 = vpop.permute.xlu0 %810 }
 0x10a   : > { %7960 = vst [vmem:[#allocation118_spill] sm:$0xff] %v5488_v45  ;;  %1048 = vrot.lane.b32.xlu1 %v5034_v50, %s4719_s26  ;;  %v7999_v45 = vld [vmem:[#allocation57_spill] sm:$0xff] }
 0x10b   : > { %1054 = vrot.lane.b32.xlu0 %v5038_v51, %s4719_s26 }
 0x10c   : > { %v5494_v46 = vpop.permute.xlu1 %808 }
 0x10d   : > { %7961 = vst [vmem:[#allocation119_spill] sm:$0xff] %v5494_v46  ;;  %v5496_v47 = vpop.permute.xlu0 %814 }
 0x10e   : > { %7962 = vst [vmem:[#allocation120_spill] sm:$0xff] %v5496_v47  ;;  %1052 = vrot.lane.b32.xlu1 %v5042_v52, %s4719_s26 }
 0x10f   : > { %1058 = vrot.lane.b32.xlu0 %v5046_v53, %s4719_s26 }
 0x110   : > { %v5502_v48 = vpop.permute.xlu1 %812 }
 0x111   : > { %7963 = vst [vmem:[#allocation121_spill] sm:$0xff] %v5502_v48  ;;  %v5504_v49 = vpop.permute.xlu0 %818  ;;  %v7997_v48 = vld [vmem:[#allocation55_spill] sm:$0xff] }
 0x112   : > { %7964 = vst [vmem:[#allocation122_spill] sm:$0xff] %v5504_v49  ;;  %1056 = vrot.lane.b32.xlu1 %v5050_v54, %s4719_s26 }
 0x113   : > { %1062 = vrot.lane.b32.xlu0 %v5054_v55, %s4719_s26 }
 0x114   : > { %v5510_v50 = vpop.permute.xlu1 %816 }
 0x115   : > { %7965 = vst [vmem:[#allocation123_spill] sm:$0xff] %v5510_v50  ;;  %v5512_v51 = vpop.permute.xlu0 %822 }
 0x116   : > { %7966 = vst [vmem:[#allocation124_spill] sm:$0xff] %v5512_v51  ;;  %1060 = vrot.lane.b32.xlu1 %v5058_v56, %s4719_s26 }
 0x117   : > { %1066 = vrot.lane.b32.xlu0 %v5062_v57, %s4719_s26  ;;  %v5536_v57 = vld [vmem:[#allocation2 + $0x181] sm:$0xff] }
 0x118   : > { %v5518_v52 = vpop.permute.xlu1 %820 }
 0x119   : > { %7967 = vst [vmem:[#allocation125_spill] sm:$0xff] %v5518_v52  ;;  %v5520_v53 = vpop.permute.xlu0 %890 }
 0x11a   : > { %1064 = vrot.lane.b32.xlu1 %v5066_v58, %s4719_s26 }
 0x11b   : > { %1070 = vrot.lane.b32.xlu0 %v5075_v60, %s4719_s26 }
 0x11c   : > { %v5526_v54 = vpop.permute.xlu1 %824 }
 0x11d   : > { %7968 = vst [vmem:[#allocation126_spill] sm:$0xff] %v5526_v54  ;;  %v5528_v55 = vpop.permute.xlu0 %894 }
 0x11e   : > { %1068 = vrot.lane.b32.xlu1 %v5079_v61, %s4719_s26  ;;  %v5550_v61 = vld [vmem:[#allocation2 + $0x189] sm:$0xff] }
 0x11f   : > { %1074 = vrot.lane.b32.xlu0 %v5083_v62, %s4719_s26 }
 0x120   : > { %v5534_v56 = vpop.permute.xlu1 %892 }
 0x121   : > { %v5538_v51 = vpop.permute.xlu0 %898 }
 0x122   : > { %1072 = vrot.lane.b32.xlu1 %v5092_v0, %s4719_s26 }
 0x123   : > { %1078 = vrot.lane.b32.xlu0 %v5536_v57, %s4719_s26 }
 0x124   : > { %v5544_v58 = vpop.permute.xlu1 %896 }
 0x125   : > { %v5546_v60 = vpop.permute.xlu0 %902 }
 0x126   : > { %1076 = vrot.lane.b32.xlu1 %v5098_v8, %s4719_s26 }
 0x127   : > { %1146 = vrot.lane.b32.xlu0 %v5101_v9, %s4720_s27 }
 0x128   : > { %v5554_v62 = vpop.permute.xlu1 %900 }
 0x129   : > { %v5556_v54 = vpop.permute.xlu0 %906 }
 0x12a   : > { %1080 = vrot.lane.b32.xlu1 %v5550_v61, %s4719_s26 }
 0x12b   : > { %1150 = vrot.lane.b32.xlu0 %v5107_v63, %s4720_s27 }
 0x12c   : > { %v5562_v0 = vpop.permute.xlu1 %904 }
 0x12d   : > { %v5564_v52 = vpop.permute.xlu0 %910 }
 0x12e   : > { %1148 = vrot.lane.b32.xlu1 %v5110_v37, %s4720_s27 }
 0x12f   : > { %1154 = vrot.lane.b32.xlu0 %v5114_v40, %s4720_s27 }
 0x130   : > { %v5570_v8 = vpop.permute.xlu1 %908 }
 0x131   : > { %v5572_v9 = vpop.permute.xlu0 %914 }
 0x132   : > { %7969 = vst [vmem:[#allocation127_spill] sm:$0xff] %v5572_v9  ;;  %1152 = vrot.lane.b32.xlu1 %v5118_v1, %s4720_s27 }
 0x133   : > { %1158 = vrot.lane.b32.xlu0 %v5122_v35, %s4720_s27 }
 0x134   : > { %v5578_v63 = vpop.permute.xlu1 %912 }
 0x135   : > { %7970 = vst [vmem:[#allocation128_spill] sm:$0xff] %v5578_v63  ;;  %v5580_v49 = vpop.permute.xlu0 %918 }
 0x136   : > { %7971 = vst [vmem:[#allocation129_spill] sm:$0xff] %v5580_v49  ;;  %1156 = vrot.lane.b32.xlu1 %v5126_v59, %s4720_s27 }
 0x137   : > { %1162 = vrot.lane.b32.xlu0 %v5130_v38, %s4720_s27 }
 0x138   : > { %v5586_v37 = vpop.permute.xlu1 %916 }
 0x139   : > { %7972 = vst [vmem:[#allocation130_spill] sm:$0xff] %v5586_v37  ;;  %v5588_v40 = vpop.permute.xlu0 %922  ;;  %v556_v37 = vld [vmem:[#allocation2 + $0x109] sm:$0xff] }
 0x13a   : > { %7973 = vst [vmem:[#allocation131_spill] sm:$0xff] %v5588_v40  ;;  %1160 = vrot.lane.b32.xlu1 %v5134_v30, %s4720_s27  ;;  %v1893_v40 = vld [vmem:[%s7770_s1 + $0x20] sm:$0xf] }
 0x13b   : > { %1166 = vrot.lane.b32.xlu0 %v5138_v36, %s4720_s27 }
 0x13c   : > { %v5594_v35 = vpop.permute.xlu1 %920 }
 0x13d   : > { %7974 = vst [vmem:[#allocation132_spill] sm:$0xff] %v5594_v35  ;;  %v5596_v1 = vpop.permute.xlu0 %926 }
 0x13e   : > { %7975 = vst [vmem:[#allocation133_spill] sm:$0xff] %v5596_v1  ;;  %1164 = vrot.lane.b32.xlu1 %v5142_v25, %s4720_s27 }
 0x13f   : > { %1170 = vrot.lane.b32.xlu0 %v5146_v34, %s4720_s27 }
 0x140   : > { %v5602_v38 = vpop.permute.xlu1 %924 }
 0x141   : > { %7976 = vst [vmem:[#allocation134_spill] sm:$0xff] %v5602_v38  ;;  %v5604_v59 = vpop.permute.xlu0 %930  ;;  %v1892_v38 = vld [vmem:[%s7770_s1 + $0x18] sm:$0xff] }
 0x142   : > { %7977 = vst [vmem:[#allocation135_spill] sm:$0xff] %v5604_v59  ;;  %1168 = vrot.lane.b32.xlu1 %v5150_v23, %s4720_s27  ;;  %v8011_v59 = vld [vmem:[#allocation69_spill] sm:$0xff] }
 0x143   : > { %1174 = vrot.lane.b32.xlu0 %v5154_v29, %s4720_s27 }
 0x144   : > { %v5610_v30 = vpop.permute.xlu1 %928 }
 0x145   : > { %7978 = vst [vmem:[#allocation136_spill] sm:$0xff] %v5610_v30  ;;  %v5612_v36 = vpop.permute.xlu0 %934  ;;  %v8015_v30 = vld [vmem:[#allocation73_spill] sm:$0xff] }
 0x146   : > { %7979 = vst [vmem:[#allocation137_spill] sm:$0xff] %v5612_v36  ;;  %1172 = vrot.lane.b32.xlu1 %v5158_v21, %s4720_s27  ;;  %v8003_v36 = vld [vmem:[#allocation61_spill] sm:$0xff] }
 0x147   : > { %1178 = vrot.lane.b32.xlu0 %v5162_v24, %s4720_s27 }
 0x148   : > { %v5618_v25 = vpop.permute.xlu1 %932 }
 0x149   : > { %7980 = vst [vmem:[#allocation138_spill] sm:$0xff] %v5618_v25  ;;  %v5620_v34 = vpop.permute.xlu0 %938  ;;  %v8007_v25 = vld [vmem:[#allocation65_spill] sm:$0xff] }
 0x14a   : > { %7981 = vst [vmem:[#allocation139_spill] sm:$0xff] %v5620_v34  ;;  %1176 = vrot.lane.b32.xlu1 %v5166_v19, %s4720_s27 }
 0x14b   : > { %1182 = vrot.lane.b32.xlu0 %v5170_v22, %s4720_s27 }
 0x14c   : > { %v5626_v23 = vpop.permute.xlu1 %936 }
 0x14d   : > { %7982 = vst [vmem:[#allocation140_spill] sm:$0xff] %v5626_v23  ;;  %v5628_v29 = vpop.permute.xlu0 %942  ;;  %v8000_v23 = vld [vmem:[#allocation59_spill] sm:$0xff] }
 0x14e   : > { %7983 = vst [vmem:[#allocation141_spill] sm:$0xff] %v5628_v29  ;;  %1180 = vrot.lane.b32.xlu1 %v5174_v17, %s4720_s27 }
 0x14f   : > { %1186 = vrot.lane.b32.xlu0 %v5178_v20, %s4720_s27 }
 0x150   : > { %v5634_v21 = vpop.permute.xlu1 %940 }
 0x151   : > { %7984 = vst [vmem:[#allocation142_spill] sm:$0xff] %v5634_v21  ;;  %v5636_v24 = vpop.permute.xlu0 %946 }
 0x152   : > { %7985 = vst [vmem:[#allocation143_spill] sm:$0xff] %v5636_v24  ;;  %1184 = vrot.lane.b32.xlu1 %v5182_v15, %s4720_s27 }
 0x153   : > { %1190 = vrot.lane.b32.xlu0 %v5186_v18, %s4720_s27 }
 0x154   : > { %v5642_v19 = vpop.permute.xlu1 %944 }
 0x155   : > { %7986 = vst [vmem:[#allocation144_spill] sm:$0xff] %v5642_v19  ;;  %v5644_v22 = vpop.permute.xlu0 %950  ;;  %v7994_v19 = vld [vmem:[#allocation48_spill] sm:$0xff] }
 0x156   : > { %7987 = vst [vmem:[#allocation145_spill] sm:$0xff] %v5644_v22  ;;  %1188 = vrot.lane.b32.xlu1 %v5190_v13, %s4720_s27  ;;  %v7990_v22 = vld [vmem:[#allocation38_spill] sm:$0xff]  ;;  %v7991_v13 = vld [vmem:[#allocation40_spill] sm:$0xff] }
 0x157   : > { %1194 = vrot.lane.b32.xlu0 %v5194_v16, %s4720_s27 }
 0x158   : > { %v5650_v17 = vpop.permute.xlu1 %948 }
 0x159   : > { %7988 = vst [vmem:[#allocation146_spill] sm:$0xff] %v5650_v17  ;;  %v5652_v20 = vpop.permute.xlu0 %1018  ;;  %v5668_v17 = vld [vmem:[#allocation2 + $0x182] sm:$0xff] }
 0x15a   : > { %1192 = vrot.lane.b32.xlu1 %v5200_v14, %s4720_s27  ;;  %v7992_v14 = vld [vmem:[#allocation42_spill] sm:$0xff] }
 0x15b   : > { %1198 = vrot.lane.b32.xlu0 %v5204_v7, %s4720_s27 }
 0x15c   : > { %v5658_v15 = vpop.permute.xlu1 %952 }
 0x15d   : > { %7989 = vst [vmem:[#allocation147_spill] sm:$0xff] %v5658_v15  ;;  %v5660_v18 = vpop.permute.xlu0 %1022 }
 0x15e   : > { %1196 = vrot.lane.b32.xlu1 %v7990_v22, %s4720_s27  ;;  %v7993_v22 = vld [vmem:[#allocation45_spill] sm:$0xff] }
 0x15f   : > { %1202 = vrot.lane.b32.xlu0 %v7991_v13, %s4720_s27  ;;  %v5682_v13 = vld [vmem:[#allocation2 + $0x18a] sm:$0xff] }
 0x160   : > { %v5666_v16 = vpop.permute.xlu1 %1020 }
 0x161   : > { %v5670_v24 = vpop.permute.xlu0 %1026 }
 0x162   : > { %1200 = vrot.lane.b32.xlu1 %v7992_v14, %s4720_s27  ;;  %v7995_v14 = vld [vmem:[#allocation51_spill] sm:$0xff] }
 0x163   : > { %1206 = vrot.lane.b32.xlu0 %v5668_v17, %s4720_s27 }
 0x164   : > { %v5676_v7 = vpop.permute.xlu1 %1024 }
 0x165   : > { %v5678_v15 = vpop.permute.xlu0 %1030 }
 0x166   : > { %1204 = vrot.lane.b32.xlu1 %v7993_v22, %s4720_s27  ;;  %v7996_v22 = vld [vmem:[#allocation53_spill] sm:$0xff] }
 0x167   : > { %1274 = vrot.lane.b32.xlu0 %v7994_v19, %s4721_s28 }
 0x168   : > { %v5686_v50 = vpop.permute.xlu1 %1028 }
 0x169   : > { %v5688_v29 = vpop.permute.xlu0 %1034 }
 0x16a   : > { %1208 = vrot.lane.b32.xlu1 %v5682_v13, %s4720_s27 }
 0x16b   : > { %1278 = vrot.lane.b32.xlu0 %v7995_v14, %s4721_s28 }
 0x16c   : > { %v5694_v47 = vpop.permute.xlu1 %1032 }
 0x16d   : > { %v5696_v21 = vpop.permute.xlu0 %1038 }
 0x16e   : > { %1276 = vrot.lane.b32.xlu1 %v7996_v22, %s4721_s28  ;;  %v8004_v22 = vld [vmem:[#allocation63_spill] sm:$0xff] }
 0x16f   : > { %1282 = vrot.lane.b32.xlu0 %v7997_v48, %s4721_s28 }
 0x170   : > { %v5702_v19 = vpop.permute.xlu1 %1036 }
 0x171   : > { %v5704_v34 = vpop.permute.xlu0 %1042 }
 0x172   : > { %7998 = vst [vmem:[#allocation38_spill] sm:$0xff] %v5704_v34  ;;  %1280 = vrot.lane.b32.xlu1 %v7999_v45, %s4721_s28  ;;  %v8008_v45 = vld [vmem:[#allocation67_spill] sm:$0xff] }
 0x173   : > { %1286 = vrot.lane.b32.xlu0 %v8000_v23, %s4721_s28 }
 0x174   : > { %v5710_v14 = vpop.permute.xlu1 %1040 }
 0x175   : > { %8001 = vst [vmem:[#allocation40_spill] sm:$0xff] %v5710_v14  ;;  %v5712_v46 = vpop.permute.xlu0 %1046  ;;  %v590_v14 = vld [vmem:[#allocation2 + $0x122] sm:$0xff] }
 0x176   : > { %8002 = vst [vmem:[#allocation42_spill] sm:$0xff] %v5712_v46  ;;  %1284 = vrot.lane.b32.xlu1 %v8003_v36, %s4721_s28  ;;  %v8012_v36 = vld [vmem:[#allocation71_spill] sm:$0xff]  ;;  %v576_v46 = vld [vmem:[#allocation2 + $0x7a] sm:$0xff] }
 0x177   : > { %1290 = vrot.lane.b32.xlu0 %v8004_v22, %s4721_s28 }
 0x178   : > { %v5718_v48 = vpop.permute.xlu1 %1044 }
 0x179   : > { %8005 = vst [vmem:[#allocation45_spill] sm:$0xff] %v5718_v48  ;;  %v5720_v43 = vpop.permute.xlu0 %1050  ;;  %v586_v48 = vld [vmem:[#allocation2 + $0xf2] sm:$0xff] }
 0x17a   : > { %8006 = vst [vmem:[#allocation48_spill] sm:$0xff] %v5720_v43  ;;  %1288 = vrot.lane.b32.xlu1 %v8007_v25, %s4721_s28  ;;  %v8016_v25 = vld [vmem:[#allocation75_spill] sm:$0xff]  ;;  %v541_v43 = vld [vmem:[#allocation2 + $0x51] sm:$0xff] }
 0x17b   : > { %1294 = vrot.lane.b32.xlu0 %v8008_v45, %s4721_s28 }
 0x17c   : > { %v5726_v23 = vpop.permute.xlu1 %1048 }
 0x17d   : > { %8009 = vst [vmem:[#allocation51_spill] sm:$0xff] %v5726_v23  ;;  %v5728_v44 = vpop.permute.xlu0 %1054 }
 0x17e   : > { %8010 = vst [vmem:[#allocation53_spill] sm:$0xff] %v5728_v44  ;;  %1292 = vrot.lane.b32.xlu1 %v8011_v59, %s4721_s28  ;;  %v8019_v44 = vld [vmem:[#allocation77_spill] sm:$0xff]  ;;  %v8020_v59 = vld [vmem:[#allocation79_spill] sm:$0xff] }
 0x17f   : > { %1298 = vrot.lane.b32.xlu0 %v8012_v36, %s4721_s28 }
 0x180   : > { %v5734_v22 = vpop.permute.xlu1 %1052 }
 0x181   : > { %8013 = vst [vmem:[#allocation55_spill] sm:$0xff] %v5734_v22  ;;  %v5736_v41 = vpop.permute.xlu0 %1058  ;;  %v540_v22 = vld [vmem:[#allocation2 + $0x49] sm:$0xff] }
 0x182   : > { %8014 = vst [vmem:[#allocation57_spill] sm:$0xff] %v5736_v41  ;;  %1296 = vrot.lane.b32.xlu1 %v8015_v30, %s4721_s28  ;;  %v8023_v41 = vld [vmem:[#allocation81_spill] sm:$0xff]  ;;  %v8024_v30 = vld [vmem:[#allocation83_spill] sm:$0xff] }
 0x183   : > { %1302 = vrot.lane.b32.xlu0 %v8016_v25, %s4721_s28 }
 0x184   : > { %v5742_v45 = vpop.permute.xlu1 %1056 }
 0x185   : > { %8017 = vst [vmem:[#allocation59_spill] sm:$0xff] %v5742_v45  ;;  %v5744_v42 = vpop.permute.xlu0 %1062 }
 0x186   : > { %8018 = vst [vmem:[#allocation61_spill] sm:$0xff] %v5744_v42  ;;  %1300 = vrot.lane.b32.xlu1 %v8019_v44, %s4721_s28  ;;  %v8027_v42 = vld [vmem:[#allocation85_spill] sm:$0xff]  ;;  %v8028_v44 = vld [vmem:[#allocation87_spill] sm:$0xff] }
 0x187   : > { %1306 = vrot.lane.b32.xlu0 %v8020_v59, %s4721_s28 }
 0x188   : > { %v5750_v36 = vpop.permute.xlu1 %1060 }
 0x189   : > { %8021 = vst [vmem:[#allocation63_spill] sm:$0xff] %v5750_v36  ;;  %v5752_v1 = vpop.permute.xlu0 %1066 }
 0x18a   : > { %8022 = vst [vmem:[#allocation65_spill] sm:$0xff] %v5752_v1  ;;  %1304 = vrot.lane.b32.xlu1 %v8023_v41, %s4721_s28  ;;  %v8031_v1 = vld [vmem:[#allocation89_spill] sm:$0xff]  ;;  %v8032_v41 = vld [vmem:[#allocation91_spill] sm:$0xff] }
 0x18b   : > { %1310 = vrot.lane.b32.xlu0 %v8024_v30, %s4721_s28 }
 0x18c   : > { %v5758_v25 = vpop.permute.xlu1 %1064 }
 0x18d   : > { %8025 = vst [vmem:[#allocation67_spill] sm:$0xff] %v5758_v25  ;;  %v5760_v45 = vpop.permute.xlu0 %1070 }
 0x18e   : > { %8026 = vst [vmem:[#allocation69_spill] sm:$0xff] %v5760_v45  ;;  %1308 = vrot.lane.b32.xlu1 %v8027_v42, %s4721_s28  ;;  %v8035_v45 = vld [vmem:[#allocation93_spill] sm:$0xff]  ;;  %v8036_v42 = vld [vmem:[#allocation95_spill] sm:$0xff] }
 0x18f   : > { %1314 = vrot.lane.b32.xlu0 %v8028_v44, %s4721_s28 }
 0x190   : > { %v5766_v59 = vpop.permute.xlu1 %1068 }
 0x191   : > { %8029 = vst [vmem:[#allocation71_spill] sm:$0xff] %v5766_v59  ;;  %v5768_v36 = vpop.permute.xlu0 %1074 }
 0x192   : > { %8030 = vst [vmem:[#allocation73_spill] sm:$0xff] %v5768_v36  ;;  %1312 = vrot.lane.b32.xlu1 %v8031_v1, %s4721_s28  ;;  %v8038_v36 = vld [vmem:[#allocation97_spill] sm:$0xff] }
 0x193   : > { %1318 = vrot.lane.b32.xlu0 %v8032_v41, %s4721_s28 }
 0x194   : > { %v5774_v30 = vpop.permute.xlu1 %1072 }
 0x195   : > { %8033 = vst [vmem:[#allocation75_spill] sm:$0xff] %v5774_v30  ;;  %v5776_v25 = vpop.permute.xlu0 %1078 }
 0x196   : > { %8034 = vst [vmem:[#allocation77_spill] sm:$0xff] %v5776_v25  ;;  %1316 = vrot.lane.b32.xlu1 %v8035_v45, %s4721_s28  ;;  %v8040_v25 = vld [vmem:[#allocation100_spill] sm:$0xff] }
 0x197   : > { %1322 = vrot.lane.b32.xlu0 %v8036_v42, %s4721_s28  ;;  %v536_v42 = vld [vmem:[#allocation2 + $0x198] sm:$0xff] }
 0x198   : > { %v5782_v44 = vpop.permute.xlu1 %1076 }
 0x199   : > { %8037 = vst [vmem:[#allocation79_spill] sm:$0xff] %v5782_v44  ;;  %v5784_v59 = vpop.permute.xlu0 %1146 }
 0x19a   : > { %1320 = vrot.lane.b32.xlu1 %v8038_v36, %s4721_s28  ;;  %v538_v36 = vld [vmem:[#allocation2 + $0x31] sm:$0xff] }
 0x19b   : > { %1326 = vrot.lane.b32.xlu0 %v5394_v10, %s4721_s28 }
 0x19c   : > { %v5790_v1 = vpop.permute.xlu1 %1080 }
 0x19d   : > { %8039 = vst [vmem:[#allocation81_spill] sm:$0xff] %v5790_v1  ;;  %v5792_v41 = vpop.permute.xlu0 %1150 }
 0x19e   : > { %1324 = vrot.lane.b32.xlu1 %v8040_v25, %s4721_s28  ;;  %v1889_v25 = vld [vmem:[%s7770_s1] sm:$0xff] }
 0x19f   : > { %1330 = vrot.lane.b32.xlu0 %v5402_v11, %s4721_s28  ;;  %v1890_v11 = vld [vmem:[%s7770_s1 + $0x8] sm:$0xff] }
 0x1a0   : > { %v5798_v45 = vpop.permute.xlu1 %1148  ;;  %v4634_v30 = vpack.c.bf16 %v1890_v11, %v1889_v25  ;;  %v539_v25 = vld [vmem:[#allocation2 + $0x39] sm:$0xff] }
 0x1a1   : > { %v5800_v44 = vpop.permute.xlu0 %1154 }
 0x1a2   : > { %1328 = vrot.lane.b32.xlu1 %v5412_v4, %s4721_s28  ;;  %v537_v4 = vld [vmem:[#allocation2 + $0x1a0] sm:$0xff]  ;;  %4635 = vmatprep.subr.bf16.mxu0 %v4634_v30 }
 0x1a3   : > { %1334 = vrot.lane.b32.xlu0 %v536_v42, %s4721_s28  ;;  %4637 = vmatpush3.bf16.msra.mxu0 %v4634_v30  ;;  %v542_v30 = vld [vmem:[#allocation2 + $0x61] sm:$0xff] }
 0x1a4   : > { %v5805_v10 = vpop.permute.xlu1 %1152 }
 0x1a5   : > { %v5813_v1 = vpop.permute.xlu0 %1158 }
 0x1a6   : > { %1332 = vrot.lane.b32.xlu1 %v5418_v5, %s4721_s28  ;;  %v4638_v5 = vpack.c.bf16 %v1892_v38, %v1891_v33  ;;  %v544_v38 = vld [vmem:[#allocation2 + $0x79] sm:$0xff] }
 0x1a7   : > { %1402 = vrot.lane.b32.xlu0 %v538_v36, %s4722_s7 }
 0x1a8   : > { %v5818_v42 = vpop.permute.xlu1 %1156  ;;  %4639 = vmatprep.subr.bf16.mxu0 %v4638_v5 }
 0x1a9   : > { %v5826_v39 = vpop.permute.xlu0 %1162  ;;  %4641 = vmatpush3.bf16.msra.mxu0 %v4638_v5 }
 0x1aa   : > { %1336 = vrot.lane.b32.xlu1 %v537_v4, %s4721_s28  ;;  %4526 = vmatprep.subr.msk.mxu0 %vm1991_vm3, %v1893_v40  ;;  %v543_v4 = vld [vmem:[#allocation2 + $0x69] sm:$0xff] }
 0x1ab   : > { %1406 = vrot.lane.b32.xlu0 %v540_v22, %s4722_s7 }
 0x1ac   : > { %v5830_v36 = vpop.permute.xlu1 %1160 }
 0x1ad   : > { %v5832_v11 = vpop.permute.xlu0 %1166  ;;  %4527 = vmatpush3.msk.msra.mxu0 %vm1991_vm3, %v1893_v40  ;;  %v572_v40 = vld [vmem:[#allocation2 + $0x4a] sm:$0xff] }
 0x1ae   : > { %8041 = vst [vmem:[#allocation83_spill] sm:$0xff] %v5832_v11  ;;  %1404 = vrot.lane.b32.xlu1 %v539_v25, %s4722_s7  ;;  %v570_v25 = vld [vmem:[#allocation2 + $0x32] sm:$0xff]  ;;  %v8090_v11 = vld [vmem:[#allocation98_spill] sm:$0xff] }
 0x1af   : > { %1410 = vrot.lane.b32.xlu0 %v542_v30, %s4722_s7  ;;  %v545_v30 = vld [vmem:[#allocation2 + $0x81] sm:$0xff] }
 0x1b0   : > { %v5839_v33 = vpop.permute.xlu1 %1164 }
 0x1b1   : > { %v5843_v22 = vpop.permute.xlu0 %1170 }
 0x1b2   : > { %8042 = vst [vmem:[#allocation85_spill] sm:$0xff] %v5843_v22  ;;  %1408 = vrot.lane.b32.xlu1 %v541_v43, %s4722_s7  ;;  %v571_v43 = vld [vmem:[#allocation2 + $0x3a] sm:$0xff]  ;;  %v588_v22 = vld [vmem:[#allocation2 + $0x10a] sm:$0xff] }
 0x1b3   : > { %1414 = vrot.lane.b32.xlu0 %v544_v38, %s4722_s7 }
 0x1b4   : > { %v5847_v5 = vpop.permute.xlu1 %1168 }
 0x1b5   : > { %8043 = vst [vmem:[#allocation87_spill] sm:$0xff] %v5847_v5  ;;  %v5849_v23 = vpop.permute.xlu0 %1174  ;;  %v558_v5 = vld [vmem:[#allocation2 + $0x121] sm:$0xff] }
 0x1b6   : > { %8044 = vst [vmem:[#allocation89_spill] sm:$0xff] %v5849_v23  ;;  %1412 = vrot.lane.b32.xlu1 %v543_v4, %s4722_s7  ;;  %v573_v4 = vld [vmem:[#allocation2 + $0x52] sm:$0xff] }
 0x1b7   : > { %1530 = vrot.lane.b32.xlu0 %v570_v25, %s4723_s14 }
 0x1b8   : > { %v5853_v31 = vpop.permute.xlu1 %1172 }
 0x1b9   : > { %8045 = vst [vmem:[#allocation91_spill] sm:$0xff] %v5853_v31  ;;  %v5855_v35 = vpop.permute.xlu0 %1178 }
 0x1ba   : > { %8046 = vst [vmem:[#allocation93_spill] sm:$0xff] %v5855_v35  ;;  %1416 = vrot.lane.b32.xlu1 %v545_v30, %s4722_s7  ;;  %v575_v30 = vld [vmem:[#allocation2 + $0x6a] sm:$0xff] }
 0x1bb   : > { %1534 = vrot.lane.b32.xlu0 %v572_v40, %s4723_s14  ;;  %v546_v35 = vld [vmem:[#allocation2 + $0x91] sm:$0xff] }
 0x1bc   : > { %v5859_v38 = vpop.permute.xlu1 %1176 }
 0x1bd   : > { %8047 = vst [vmem:[#allocation95_spill] sm:$0xff] %v5859_v38  ;;  %v5861_v23 = vpop.permute.xlu0 %1182 }
 0x1be   : > { %8048 = vst [vmem:[#allocation97_spill] sm:$0xff] %v5861_v23  ;;  %1532 = vrot.lane.b32.xlu1 %v571_v43, %s4723_s14  ;;  %v577_v43 = vld [vmem:[#allocation2 + $0x82] sm:$0xff]  ;;  %v578_v23 = vld [vmem:[#allocation2 + $0x92] sm:$0xff] }
 0x1bf   : > { %1538 = vrot.lane.b32.xlu0 %v574_v32, %s4723_s14 }
 0x1c0   : > { %v5865_v25 = vpop.permute.xlu1 %1180 }
 0x1c1   : > { %8049 = vst [vmem:[#allocation100_spill] sm:$0xff] %v5865_v25  ;;  %v5867_v31 = vpop.permute.xlu0 %1186 }
 0x1c2   : > { %8050 = vst [vmem:[#allocation148_spill] sm:$0xff] %v5867_v31  ;;  %1536 = vrot.lane.b32.xlu1 %v573_v4, %s4723_s14  ;;  %v547_v4 = vld [vmem:[#allocation2 + $0x99] sm:$0xff]  ;;  %v548_v31 = vld [vmem:[#allocation2 + $0xa9] sm:$0xff] }
 0x1c3   : > { %1542 = vrot.lane.b32.xlu0 %v576_v46, %s4723_s14 }
 0x1c4   : > { %v5871_v40 = vpop.permute.xlu1 %1184 }
 0x1c5   : > { %8051 = vst [vmem:[#allocation149_spill] sm:$0xff] %v5871_v40  ;;  %v5873_v38 = vpop.permute.xlu0 %1190 }
 0x1c6   : > { %8052 = vst [vmem:[#allocation150_spill] sm:$0xff] %v5873_v38  ;;  %1540 = vrot.lane.b32.xlu1 %v575_v30, %s4723_s14  ;;  %v579_v30 = vld [vmem:[#allocation2 + $0x9a] sm:$0xff]  ;;  %v580_v38 = vld [vmem:[#allocation2 + $0xaa] sm:$0xff] }
 0x1c7   : > { %1418 = vrot.lane.b32.xlu0 %v546_v35, %s4722_s7 }
 0x1c8   : > { %v5877_v32 = vpop.permute.xlu1 %1188 }
 0x1c9   : > { %8053 = vst [vmem:[#allocation151_spill] sm:$0xff] %v5877_v32  ;;  %v5879_v25 = vpop.permute.xlu0 %1194 }
 0x1ca   : > { %8054 = vst [vmem:[#allocation152_spill] sm:$0xff] %v5879_v25  ;;  %1544 = vrot.lane.b32.xlu1 %v577_v43, %s4723_s14  ;;  %v549_v43 = vld [vmem:[#allocation2 + $0xb1] sm:$0xff]  ;;  %v550_v25 = vld [vmem:[#allocation2 + $0xc1] sm:$0xff] }
 0x1cb   : > { %1546 = vrot.lane.b32.xlu0 %v578_v23, %s4723_s14 }
 0x1cc   : > { %v5883_v46 = vpop.permute.xlu1 %1192 }
 0x1cd   : > { %8055 = vst [vmem:[#allocation153_spill] sm:$0xff] %v5883_v46  ;;  %v5885_v40 = vpop.permute.xlu0 %1198 }
 0x1ce   : > { %8056 = vst [vmem:[#allocation154_spill] sm:$0xff] %v5885_v40  ;;  %1420 = vrot.lane.b32.xlu1 %v547_v4, %s4722_s7  ;;  %v581_v4 = vld [vmem:[#allocation2 + $0xb2] sm:$0xff]  ;;  %v582_v40 = vld [vmem:[#allocation2 + $0xc2] sm:$0xff] }
 0x1cf   : > { %1422 = vrot.lane.b32.xlu0 %v548_v31, %s4722_s7 }
 0x1d0   : > { %v5889_v35 = vpop.permute.xlu1 %1196 }
 0x1d1   : > { %8057 = vst [vmem:[#allocation155_spill] sm:$0xff] %v5889_v35  ;;  %v5891_v32 = vpop.permute.xlu0 %1202 }
 0x1d2   : > { %8058 = vst [vmem:[#allocation156_spill] sm:$0xff] %v5891_v32  ;;  %1548 = vrot.lane.b32.xlu1 %v579_v30, %s4723_s14  ;;  %v551_v30 = vld [vmem:[#allocation2 + $0xc9] sm:$0xff]  ;;  %v552_v32 = vld [vmem:[#allocation2 + $0xd9] sm:$0xff] }
 0x1d3   : > { %1550 = vrot.lane.b32.xlu0 %v580_v38, %s4723_s14 }
 0x1d4   : > { %v5895_v23 = vpop.permute.xlu1 %1200 }
 0x1d5   : > { %8059 = vst [vmem:[#allocation157_spill] sm:$0xff] %v5895_v23  ;;  %v5897_v46 = vpop.permute.xlu0 %1206 }
 0x1d6   : > { %8060 = vst [vmem:[#allocation158_spill] sm:$0xff] %v5897_v46  ;;  %1424 = vrot.lane.b32.xlu1 %v549_v43, %s4722_s7  ;;  %v583_v43 = vld [vmem:[#allocation2 + $0xca] sm:$0xff]  ;;  %v584_v46 = vld [vmem:[#allocation2 + $0xda] sm:$0xff] }
 0x1d7   : > { %1426 = vrot.lane.b32.xlu0 %v550_v25, %s4722_s7 }
 0x1d8   : > { %v5901_v31 = vpop.permute.xlu1 %1204 }
 0x1d9   : > { %8061 = vst [vmem:[#allocation159_spill] sm:$0xff] %v5901_v31  ;;  %v5903_v35 = vpop.permute.xlu0 %1274 }
 0x1da   : > { %1552 = vrot.lane.b32.xlu1 %v581_v4, %s4723_s14  ;;  %v553_v4 = vld [vmem:[#allocation2 + $0xe1] sm:$0xff] }
 0x1db   : > { %1554 = vrot.lane.b32.xlu0 %v582_v40, %s4723_s14 }
 0x1dc   : > { %v5907_v38 = vpop.permute.xlu1 %1208 }
 0x1dd   : > { %8062 = vst [vmem:[#allocation160_spill] sm:$0xff] %v5907_v38  ;;  %v5909_v23 = vpop.permute.xlu0 %1278  ;;  %v554_v38 = vld [vmem:[#allocation2 + $0xf1] sm:$0xff] }
 0x1de   : > { %1428 = vrot.lane.b32.xlu1 %v551_v30, %s4722_s7  ;;  %v585_v30 = vld [vmem:[#allocation2 + $0xe2] sm:$0xff] }
 0x1df   : > { %1430 = vrot.lane.b32.xlu0 %v552_v32, %s4722_s7 }
 0x1e0   : > { %v5913_v25 = vpop.permute.xlu1 %1276 }
 0x1e1   : > { %v5915_v31 = vpop.permute.xlu0 %1282 }
 0x1e2   : > { %1556 = vrot.lane.b32.xlu1 %v583_v43, %s4723_s14  ;;  %v555_v43 = vld [vmem:[#allocation2 + $0xf9] sm:$0xff] }
 0x1e3   : > { %1558 = vrot.lane.b32.xlu0 %v584_v46, %s4723_s14 }
 0x1e4   : > { %v5919_v40 = vpop.permute.xlu1 %1280 }
 0x1e5   : > { %v5921_v49 = vpop.permute.xlu0 %1286 }
 0x1e6   : > { %1432 = vrot.lane.b32.xlu1 %v553_v4, %s4722_s7  ;;  %v587_v4 = vld [vmem:[#allocation2 + $0xfa] sm:$0xff] }
 0x1e7   : > { %1434 = vrot.lane.b32.xlu0 %v554_v38, %s4722_s7 }
 0x1e8   : > { %v5925_v32 = vpop.permute.xlu1 %1284 }
 0x1e9   : > { %v5927_v6 = vpop.permute.xlu0 %1290 }
 0x1ea   : > { %1560 = vrot.lane.b32.xlu1 %v585_v30, %s4723_s14  ;;  %v557_v30 = vld [vmem:[#allocation2 + $0x111] sm:$0xff] }
 0x1eb   : > { %1562 = vrot.lane.b32.xlu0 %v586_v48, %s4723_s14 }
 0x1ec   : > { %v5931_v46 = vpop.permute.xlu1 %1288 }
 0x1ed   : > { %v5933_v28 = vpop.permute.xlu0 %1294 }
 0x1ee   : > { %8063 = vst [vmem:[#allocation161_spill] sm:$0xff] %v5933_v28  ;;  %1436 = vrot.lane.b32.xlu1 %v555_v43, %s4722_s7  ;;  %v589_v43 = vld [vmem:[#allocation2 + $0x112] sm:$0xff] }
 0x1ef   : > { %1438 = vrot.lane.b32.xlu0 %v556_v37, %s4722_s7 }
 0x1f0   : > { %v5937_v38 = vpop.permute.xlu1 %1292 }
 0x1f1   : > { %v5939_v34 = vpop.permute.xlu0 %1298 }
 0x1f2   : > { %8064 = vst [vmem:[#allocation162_spill] sm:$0xff] %v5939_v34  ;;  %1564 = vrot.lane.b32.xlu1 %v587_v4, %s4723_s14  ;;  %v559_v4 = vld [vmem:[#allocation2 + $0x129] sm:$0xff]  ;;  %v560_v34 = vld [vmem:[#allocation2 + $0x139] sm:$0xff] }
 0x1f3   : > { %1566 = vrot.lane.b32.xlu0 %v588_v22, %s4723_s14 }
 0x1f4   : > { %v5943_v48 = vpop.permute.xlu1 %1296 }
 0x1f5   : > { %8065 = vst [vmem:[#allocation163_spill] sm:$0xff] %v5943_v48  ;;  %v5945_v9 = vpop.permute.xlu0 %1302 }
 0x1f6   : > { %8066 = vst [vmem:[#allocation164_spill] sm:$0xff] %v5945_v9  ;;  %1440 = vrot.lane.b32.xlu1 %v557_v30, %s4722_s7  ;;  %v591_v30 = vld [vmem:[#allocation2 + $0x12a] sm:$0xff]  ;;  %v592_v9 = vld [vmem:[#allocation2 + $0x13a] sm:$0xff] }
 0x1f7   : > { %1442 = vrot.lane.b32.xlu0 %v558_v5, %s4722_s7 }
 0x1f8   : > { %v5949_v37 = vpop.permute.xlu1 %1300 }
 0x1f9   : > { %8067 = vst [vmem:[#allocation165_spill] sm:$0xff] %v5949_v37  ;;  %v5951_v3 = vpop.permute.xlu0 %1306 }
 0x1fa   : > { %8068 = vst [vmem:[#allocation166_spill] sm:$0xff] %v5951_v3  ;;  %1568 = vrot.lane.b32.xlu1 %v589_v43, %s4723_s14  ;;  %v561_v43 = vld [vmem:[#allocation2 + $0x141] sm:$0xff]  ;;  %v562_v3 = vld [vmem:[#allocation2 + $0x151] sm:$0xff] }
 0x1fb   : > { %1570 = vrot.lane.b32.xlu0 %v590_v14, %s4723_s14 }
 0x1fc   : > { %v5955_v22 = vpop.permute.xlu1 %1304 }
 0x1fd   : > { %8069 = vst [vmem:[#allocation167_spill] sm:$0xff] %v5955_v22  ;;  %v5957_v48 = vpop.permute.xlu0 %1310 }
 0x1fe   : > { %8070 = vst [vmem:[#allocation168_spill] sm:$0xff] %v5957_v48  ;;  %1444 = vrot.lane.b32.xlu1 %v559_v4, %s4722_s7  ;;  %v593_v4 = vld [vmem:[#allocation2 + $0x142] sm:$0xff]  ;;  %v594_v48 = vld [vmem:[#allocation2 + $0x152] sm:$0xff] }
 0x1ff   : > { %1446 = vrot.lane.b32.xlu0 %v560_v34, %s4722_s7 }
 0x200   : > { %v5961_v5 = vpop.permute.xlu1 %1308 }
 0x201   : > { %8071 = vst [vmem:[#allocation169_spill] sm:$0xff] %v5961_v5  ;;  %v5963_v37 = vpop.permute.xlu0 %1314 }
 0x202   : > { %8072 = vst [vmem:[#allocation170_spill] sm:$0xff] %v5963_v37  ;;  %1572 = vrot.lane.b32.xlu1 %v591_v30, %s4723_s14  ;;  %v563_v30 = vld [vmem:[#allocation2 + $0x159] sm:$0xff]  ;;  %v564_v37 = vld [vmem:[#allocation2 + $0x169] sm:$0xff] }
 0x203   : > { %1574 = vrot.lane.b32.xlu0 %v592_v9, %s4723_s14 }
 0x204   : > { %v5967_v14 = vpop.permute.xlu1 %1312 }
 0x205   : > { %8073 = vst [vmem:[#allocation171_spill] sm:$0xff] %v5967_v14  ;;  %v5969_v22 = vpop.permute.xlu0 %1318 }
 0x206   : > { %8074 = vst [vmem:[#allocation172_spill] sm:$0xff] %v5969_v22  ;;  %1448 = vrot.lane.b32.xlu1 %v561_v43, %s4722_s7  ;;  %v595_v43 = vld [vmem:[#allocation2 + $0x15a] sm:$0xff]  ;;  %v596_v22 = vld [vmem:[#allocation2 + $0x16a] sm:$0xff] }
 0x207   : > { %1450 = vrot.lane.b32.xlu0 %v562_v3, %s4722_s7 }
 0x208   : > { %v5973_v34 = vpop.permute.xlu1 %1316 }
 0x209   : > { %8075 = vst [vmem:[#allocation173_spill] sm:$0xff] %v5973_v34  ;;  %v5975_v5 = vpop.permute.xlu0 %1322 }
 0x20a   : > { %8076 = vst [vmem:[#allocation174_spill] sm:$0xff] %v5975_v5  ;;  %1576 = vrot.lane.b32.xlu1 %v593_v4, %s4723_s14  ;;  %v565_v4 = vld [vmem:[#allocation2 + $0x171] sm:$0xff] }
 0x20b   : > { %1578 = vrot.lane.b32.xlu0 %v594_v48, %s4723_s14 }
 0x20c   : > { %v5979_v9 = vpop.permute.xlu1 %1320 }
 0x20d   : > { %8077 = vst [vmem:[#allocation175_spill] sm:$0xff] %v5979_v9  ;;  %v5981_v14 = vpop.permute.xlu0 %1326 }
 0x20e   : > { %8078 = vst [vmem:[#allocation176_spill] sm:$0xff] %v5981_v14  ;;  %1452 = vrot.lane.b32.xlu1 %v563_v30, %s4722_s7  ;;  %v597_v30 = vld [vmem:[#allocation2 + $0x172] sm:$0xff] }
 0x20f   : > { %1454 = vrot.lane.b32.xlu0 %v564_v37, %s4722_s7 }
 0x210   : > { %v5985_v3 = vpop.permute.xlu1 %1324 }
 0x211   : > { %8079 = vst [vmem:[#allocation177_spill] sm:$0xff] %v5985_v3  ;;  %v5987_v34 = vpop.permute.xlu0 %1330 }
 0x212   : > { %8080 = vst [vmem:[#allocation178_spill] sm:$0xff] %v5987_v34  ;;  %1580 = vrot.lane.b32.xlu1 %v595_v43, %s4723_s14 }
 0x213   : > { %1582 = vrot.lane.b32.xlu0 %v596_v22, %s4723_s14  ;;  %v568_v22 = vld [vmem:[#allocation2 + $0x199] sm:$0xff] }
 0x214   : > { %v5991_v48 = vpop.permute.xlu1 %1328 }
 0x215   : > { %8081 = vst [vmem:[#allocation179_spill] sm:$0xff] %v5991_v48  ;;  %v5993_v5 = vpop.permute.xlu0 %1334 }
 0x216   : > { %8082 = vst [vmem:[#allocation180_spill] sm:$0xff] %v5993_v5  ;;  %1456 = vrot.lane.b32.xlu1 %v565_v4, %s4722_s7  ;;  %v232_v4 = vld [vmem:[#allocation3] sm:$0x1]  ;;  %v313_v5 = vld [vmem:[#allocation2] sm:$0xff] }
 0x217   : > { %1458 = vrot.lane.b32.xlu0 %v5536_v57, %s4722_s7  ;;  %4650 = vpush %v232_v4 }
 0x218   : > { %v5998_v37 = vpop.permute.xlu1 %1332 }
 0x219   : > { %8083 = vst [vmem:[#allocation181_spill] sm:$0xff] %v5998_v37  ;;  %v1403_v14 = vpop.permute.xlu0 %1402  ;;  %v600_v37 = vld [vmem:[#allocation2 + $0x19a] sm:$0xff] }
 0x21a   : > { %1584 = vrot.lane.b32.xlu1 %v597_v30, %s4723_s14 }
 0x21b   : > { %1586 = vrot.lane.b32.xlu0 %v5668_v17, %s4723_s14  ;;  %v569_v17 = vld [vmem:[#allocation2 + $0x1a1] sm:$0xff] }
 0x21c   : > { %v6003_v43 = vpop.permute.xlu1 %1336 }
 0x21d   : > { %8084 = vst [vmem:[#allocation182_spill] sm:$0xff] %v6003_v43  ;;  %v6005_v34 = vpop.permute.xlu0 %1406  ;;  %v8085_v43 = vld [vmem:[#allocation36_spill] sm:$0xff] }
 0x21e   : > { %1460 = vrot.lane.b32.xlu1 %v5550_v61, %s4722_s7  ;;  %v1626_v48 = vsel %vm234_vm0, %v313_v5, %v8085_v43 }
 0x21f   : > { %1462 = vrot.lane.b32.xlu0 %v568_v22, %s4722_s7  ;;  %v8086_v22 = vld [vmem:[#allocation94_spill] sm:$0xff] }
 0x220   : > { %v1405_v57 = vpop.permute.xlu1 %1404  ;;  %v1659_v4 = vsel %vm1658_vm4, %v1626_v48, %v8086_v22  ;;  %v8087_v48 = vld [vmem:[#allocation37_spill] sm:$0xff] }
 0x221   : > { %v6010_v30 = vpop.permute.xlu0 %1410  ;;  %v1692_v3 = vsel %vm1691_vm5, %v1659_v4, %v5520_v53 }
 0x222   : > { %1588 = vrot.lane.b32.xlu1 %v5682_v13, %s4723_s14  ;;  %v314_v13 = vld [vmem:[#allocation2 + $0x8] sm:$0xff]  ;;  %v1725_v5 = vsel %vm1724_vm6, %v1692_v3, %v5652_v20  ;;  %v4669_v20 = vld [vmem:[#allocation2 + $0x18] sm:$0xff] }
 0x223   : > { %1590 = vrot.lane.b32.xlu0 %v600_v37, %s4723_s14  ;;  %v601_v37 = vld [vmem:[#allocation2 + $0x1a2] sm:$0xff]  ;;  %v1758_v43 = vsel %vm1757_vm7, %v1725_v5, %v5784_v59  ;;  %v1627_v22 = vsel %vm234_vm0, %v314_v13, %v8087_v48 }
 0x224   : > { %v6017_v61 = vpop.permute.xlu1 %1408  ;;  %v1791_v53 = vsel %vm1790_vm8, %v1758_v43, %v5903_v35  ;;  %v8088_v3 = vld [vmem:[#allocation39_spill] sm:$0xff] }
 0x225   : > { %v6023_v9 = vpop.permute.xlu0 %1414  ;;  %v1628_v27 = vsel %vm234_vm0, %v4669_v20, %v8088_v3  ;;  %v8089_v59 = vld [vmem:[#allocation99_spill] sm:$0xff]  ;;  %v8093_v20 = vld [vmem:[#allocation102_spill] sm:$0xff] }
 0x226   : > { %1464 = vrot.lane.b32.xlu1 %v569_v17, %s4722_s7  ;;  %v1824_v17 = vsel %vm1823_vm9, %v1791_v53, %v1403_v14  ;;  %v1660_v5 = vsel %vm1658_vm4, %v1627_v22, %v8089_v59  ;;  %v1661_v35 = vsel %vm1658_vm4, %v1628_v27, %v8090_v11  ;;  %v4670_v53 = vld [vmem:[#allocation2 + $0x20] sm:$0xff]  ;;  %v8091_v48 = vld [vmem:[#allocation43_spill] sm:$0xff] }
 0x227   : > { %v1693_v13 = vsel %vm1691_vm5, %v1660_v5, %v5534_v56  ;;  %v1629_v22 = vsel %vm234_vm0, %v4670_v53, %v8091_v48  ;;  %v8094_v59 = vld [vmem:[#allocation101_spill] sm:$0xff]  ;;  %v8095_v48 = vld [vmem:[#allocation46_spill] sm:$0xff] }
 0x228   : > { %v6030_v63 = vpop.permute.xlu1 %1412  ;;  %v1726_v43 = vsel %vm1724_vm6, %v1693_v13, %v5666_v16  ;;  %v4672_v53 = vld [vmem:[#allocation2 + $0x38] sm:$0xff] }
 0x229   : > { %v1531_v4 = vpop.permute.xlu0 %1530  ;;  %v1759_v56 = vsel %vm1757_vm7, %v1726_v43, %v5798_v45 }
 0x22a   : > { %1592 = vrot.lane.b32.xlu1 %v601_v37, %s4723_s14  ;;  %v1857_v28 = vsel %vm1856_vm10, %v1824_v17, %v1531_v4  ;;  %v1694_v37 = vsel %vm1691_vm5, %v1661_v35, %v5528_v55  ;;  %v8092_v17 = vld [vmem:[#allocation41_spill] sm:$0xff]  ;;  %v1662_v55 = vsel %vm1658_vm4, %v1629_v22, %v8093_v20  ;;  %v1792_v3 = vsel %vm1790_vm8, %v1759_v56, %v5913_v25  ;;  %v8097_v56 = vld [vmem:[#allocation104_spill] sm:$0xff] }
 0x22b   : > { %4528 = vmatprep.mubr.msk.f32.mxu0 %vm1894_vm11, %v1857_v28  ;;  %v1727_v27 = vsel %vm1724_vm6, %v1694_v37, %v5660_v18  ;;  %v4671_v28 = vld [vmem:[#allocation2 + $0x30] sm:$0xff]  ;;  %v1695_v45 = vsel %vm1691_vm5, %v1662_v55, %v5544_v58  ;;  %v1825_v35 = vsel %vm1823_vm9, %v1792_v3, %v1405_v57  ;;  %v1631_v58 = vsel %vm234_vm0, %v4672_v53, %v8095_v48 }
 0x22c   : > { %v6048_v14 = vpop.permute.xlu1 %1416  ;;  %v1630_v4 = vsel %vm234_vm0, %v4671_v28, %v8092_v17  ;;  %v1760_v16 = vsel %vm1757_vm7, %v1727_v27, %v5792_v41  ;;  %v1728_v41 = vsel %vm1724_vm6, %v1695_v45, %v5676_v7  ;;  %v4673_v7 = vld [vmem:[#allocation2 + $0x48] sm:$0xff]  ;;  %v8096_v27 = vld [vmem:[#allocation44_spill] sm:$0xff]  ;;  %v1664_v28 = vsel %vm1658_vm4, %v1631_v58, %v8097_v56 }
 0x22d   : > { %v1535_v11 = vpop.permute.xlu0 %1534  ;;  %v1663_v18 = vsel %vm1658_vm4, %v1630_v4, %v8094_v59  ;;  %v1793_v5 = vsel %vm1790_vm8, %v1760_v16, %v5909_v23  ;;  %v1761_v57 = vsel %vm1757_vm7, %v1728_v41, %v5805_v10  ;;  %v8098_v10 = vld [vmem:[#allocation103_spill] sm:$0xff]  ;;  %v1697_v4 = vsel %vm1691_vm5, %v1664_v28, %v5554_v62  ;;  %v8099_v62 = vld [vmem:[#allocation49_spill] sm:$0xff]  ;;  %v8103_v56 = vld [vmem:[#allocation50_spill] sm:$0xff] }
 0x22e   : > { %v1696_v37 = vsel %vm1691_vm5, %v1663_v18, %v5538_v51  ;;  %v1826_v25 = vsel %vm1823_vm9, %v1793_v5, %v6005_v34  ;;  %v1632_v34 = vsel %vm234_vm0, %v4673_v7, %v8096_v27  ;;  %v4674_v18 = vld [vmem:[#allocation2 + $0x50] sm:$0xff] }
 0x22f   : > { %v1729_v23 = vsel %vm1724_vm6, %v1696_v37, %v5670_v24  ;;  %v1859_v51 = vsel %vm1856_vm10, %v1826_v25, %v1535_v11  ;;  %v1794_v24 = vsel %vm1790_vm8, %v1761_v57, %v5919_v40  ;;  %v1665_v11 = vsel %vm1658_vm4, %v1632_v34, %v8098_v10  ;;  %v8102_v7 = vld [vmem:[#allocation52_spill] sm:$0xff] }
 0x230   : > { %v1533_v13 = vpop.permute.xlu1 %1532  ;;  %v1762_v17 = vsel %vm1757_vm7, %v1729_v23, %v5800_v44  ;;  %v1827_v55 = vsel %vm1823_vm9, %v1794_v24, %v6017_v61  ;;  %v1698_v44 = vsel %vm1691_vm5, %v1665_v11, %v5546_v60  ;;  %v1730_v40 = vsel %vm1724_vm6, %v1697_v4, %v5686_v50  ;;  %v4677_v34 = vld [vmem:[#allocation2 + $0x78] sm:$0xff] }
 0x231   : > { %v1858_v43 = vsel %vm1856_vm10, %v1825_v35, %v1533_v13  ;;  %v1539_v22 = vpop.permute.xlu0 %1538  ;;  %v1795_v20 = vsel %vm1790_vm8, %v1762_v17, %v5915_v31  ;;  %v1633_v45 = vsel %vm234_vm0, %v4674_v18, %v8099_v62  ;;  %v1731_v31 = vsel %vm1724_vm6, %v1698_v44, %v5678_v15  ;;  %v4675_v15 = vld [vmem:[#allocation2 + $0x60] sm:$0xff]  ;;  %v8100_v13 = vld [vmem:[#allocation47_spill] sm:$0xff] }
 0x232   : > { %4529 = vmatmul.mubr.msk.f32.vlgmr.msra.gmra.mrb[0].mxu0 %vm1894_vm11, %v1858_v43  ;;  %v1828_v3 = vsel %vm1823_vm9, %v1795_v20, %v6010_v30  ;;  %v1763_v61 = vsel %vm1757_vm7, %v1730_v40, %v5818_v42  ;;  %v1666_v50 = vsel %vm1658_vm4, %v1633_v45, %v5430_v2  ;;  %v1764_v30 = vsel %vm1757_vm7, %v1731_v31, %v5813_v1  ;;  %v8101_v1 = vld [vmem:[#allocation105_spill] sm:$0xff]  ;;  %v4679_v31 = vld [vmem:[#allocation2 + $0x90] sm:$0xff] }
 0x233   : > { %4531 = vmatprep.mubr.msk.f32.mxu0 %vm1894_vm11, %v1859_v51  ;;  %v1861_v60 = vsel %vm1856_vm10, %v1828_v3, %v1539_v22  ;;  %v1796_v35 = vsel %vm1790_vm8, %v1763_v61, %v5925_v32  ;;  %v1634_v42 = vsel %vm234_vm0, %v4675_v15, %v8100_v13  ;;  %v1699_v37 = vsel %vm1691_vm5, %v1666_v50, %v5562_v0  ;;  %v4676_v22 = vld [vmem:[#allocation2 + $0x68] sm:$0xff]  ;;  %v4678_v3 = vld [vmem:[#allocation2 + $0x80] sm:$0xff]  ;;  %v8111_v13 = vld [vmem:[#allocation40_spill] sm:$0xff] }
 0x234   : > { %v1537_v16 = vpop.permute.xlu1 %1536  ;;  %v1797_v41 = vsel %vm1790_vm8, %v1764_v30, %v5921_v49  ;;  %v1829_v2 = vsel %vm1823_vm9, %v1796_v35, %v6030_v63  ;;  %v1667_v43 = vsel %vm1658_vm4, %v1634_v42, %v8101_v1  ;;  %v1732_v32 = vsel %vm1724_vm6, %v1699_v37, %v5694_v47  ;;  %v8108_v61 = vld [vmem:[#allocation54_spill] sm:$0xff]  ;;  %v8112_v37 = vld [vmem:[#allocation127_spill] sm:$0xff] }
 0x235   : > { %v1860_v59 = vsel %vm1856_vm10, %v1827_v55, %v1537_v16  ;;  %v1543_v5 = vpop.permute.xlu0 %1542  ;;  %v1830_v53 = vsel %vm1823_vm9, %v1797_v41, %v6023_v9  ;;  %v1700_v0 = vsel %vm1691_vm5, %v1667_v43, %v5556_v54  ;;  %v1765_v49 = vsel %vm1757_vm7, %v1732_v32, %v5830_v36  ;;  %v8104_v55 = vld [vmem:[#allocation83_spill] sm:$0xff]  ;;  %v8110_v35 = vld [vmem:[#allocation106_spill] sm:$0xff] }
 0x236   : > { %4532 = vmatmul.mubr.msk.f32.gmra.mrb[2].mxu0 %vm1894_vm11, %v1860_v59  ;;  %v1863_v63 = vsel %vm1856_vm10, %v1830_v53, %v1543_v5  ;;  %v1733_v23 = vsel %vm1724_vm6, %v1700_v0, %v5688_v29  ;;  %v1798_v47 = vsel %vm1790_vm8, %v1765_v49, %v5931_v46  ;;  %v1635_v29 = vsel %vm234_vm0, %v4676_v22, %v8102_v7  ;;  %v8109_v5 = vld [vmem:[#allocation128_spill] sm:$0xff]  ;;  %v8114_v43 = vld [vmem:[#allocation38_spill] sm:$0xff]  ;;  %v8115_v53 = vld [vmem:[#allocation163_spill] sm:$0xff] }
 0x237   : > { %4534 = vmatprep.mubr.msk.f32.mxu0 %vm1894_vm11, %v1861_v60  ;;  %v1766_v9 = vsel %vm1757_vm7, %v1733_v23, %v5826_v39  ;;  %v1831_v54 = vsel %vm1823_vm9, %v1798_v47, %v6048_v14  ;;  %v1668_v39 = vsel %vm1658_vm4, %v1635_v29, %v5438_v26  ;;  %v1638_v60 = vsel %vm234_vm0, %v4679_v31, %v8108_v61  ;;  %v8116_v0 = vld [vmem:[#allocation85_spill] sm:$0xff]  ;;  %v8117_v23 = vld [vmem:[#allocation162_spill] sm:$0xff]  ;;  %v8131_v61 = vld [vmem:[#allocation111_spill] sm:$0xff] }
 0x238   : > { %v1541_v25 = vpop.permute.xlu1 %1540  ;;  %v1799_v57 = vsel %vm1790_vm8, %v1766_v9, %v5927_v6  ;;  %v1636_v6 = vsel %vm234_vm0, %v4677_v34, %v8103_v56  ;;  %v1701_v28 = vsel %vm1691_vm5, %v1668_v39, %v5570_v8  ;;  %v1671_v15 = vsel %vm1658_vm4, %v1638_v60, %v8110_v35  ;;  %v8119_v7 = vld [vmem:[#allocation109_spill] sm:$0xff]  ;;  %v8120_v39 = vld [vmem:[#allocation58_spill] sm:$0xff] }
 0x239   : > { %v1862_v48 = vsel %vm1856_vm10, %v1829_v2, %v1541_v25  ;;  %v1419_v58 = vpop.permute.xlu0 %1418  ;;  %v1669_v24 = vsel %vm1658_vm4, %v1636_v6, %v5432_v12  ;;  %v1734_v10 = vsel %vm1724_vm6, %v1701_v28, %v5702_v19  ;;  %v8105_v19 = vld [vmem:[#allocation161_spill] sm:$0xff]  ;;  %v1704_v41 = vsel %vm1691_vm5, %v1671_v15, %v8112_v37  ;;  %v8113_v2 = vld [vmem:[#allocation87_spill] sm:$0xff]  ;;  %v8121_v34 = vld [vmem:[#allocation130_spill] sm:$0xff] }
 0x23a   : > { %4535 = vmatmul.mubr.msk.f32.gmra.mrb[4].mxu0 %vm1894_vm11, %v1862_v48  ;;  %v1832_v46 = vsel %vm1823_vm9, %v1799_v57, %v1419_v58  ;;  %v1702_v26 = vsel %vm1691_vm5, %v1669_v24, %v5564_v52  ;;  %v1767_v11 = vsel %vm1757_vm7, %v1734_v10, %v5839_v33  ;;  %v8106_v33 = vld [vmem:[#allocation56_spill] sm:$0xff]  ;;  %v1737_v32 = vsel %vm1724_vm6, %v1704_v41, %v8114_v43  ;;  %v8123_v24 = vld [vmem:[#allocation45_spill] sm:$0xff]  ;;  %v8134_v37 = vld [vmem:[#allocation110_spill] sm:$0xff] }
 0x23b   : > { %4537 = vmatprep.mubr.msk.f32.mxu0 %vm1894_vm11, %v1863_v63  ;;  %v1735_v20 = vsel %vm1724_vm6, %v1702_v26, %v5696_v21  ;;  %v1800_v8 = vsel %vm1790_vm8, %v1767_v11, %v5937_v38  ;;  %v1637_v59 = vsel %vm234_vm0, %v4678_v3, %v8106_v33  ;;  %v8107_v38 = vld [vmem:[#allocation107_spill] sm:$0xff]  ;;  %v1770_v49 = vsel %vm1757_vm7, %v1737_v32, %v8116_v0  ;;  %v8122_v28 = vld [vmem:[#allocation108_spill] sm:$0xff]  ;;  %v8124_v26 = vld [vmem:[#allocation129_spill] sm:$0xff] }
 0x23c   : > { %v1545_v36 = vpop.permute.xlu1 %1544  ;;  %v1768_v16 = vsel %vm1757_vm7, %v1735_v20, %v8104_v55  ;;  %v1670_v62 = vsel %vm1658_vm4, %v1637_v59, %v8107_v38  ;;  %v1803_v47 = vsel %vm1790_vm8, %v1770_v49, %v8117_v23  ;;  %v8126_v55 = vld [vmem:[#allocation42_spill] sm:$0xff]  ;;  %v8129_v33 = vld [vmem:[#allocation164_spill] sm:$0xff]  ;;  %v8137_v32 = vld [vmem:[#allocation95_spill] sm:$0xff] }
 0x23d   : > { %v1864_v51 = vsel %vm1856_vm10, %v1831_v54, %v1545_v36  ;;  %v1547_v27 = vpop.permute.xlu0 %1546  ;;  %v1801_v40 = vsel %vm1790_vm8, %v1768_v16, %v8105_v19  ;;  %v1703_v50 = vsel %vm1691_vm5, %v1670_v62, %v8109_v5  ;;  %v4680_v54 = vld [vmem:[#allocation2 + $0x98] sm:$0xff] }
 0x23e   : > { %4538 = vmatmul.mubr.msk.f32.gmra.mrb[6].mxu0 %vm1894_vm11, %v1864_v51  ;;  %v1865_v14 = vsel %vm1856_vm10, %v1832_v46, %v1547_v27  ;;  %v1736_v42 = vsel %vm1724_vm6, %v1703_v50, %v8111_v13  ;;  %v8118_v36 = vld [vmem:[#allocation60_spill] sm:$0xff]  ;;  %v4681_v27 = vld [vmem:[#allocation2 + $0xa8] sm:$0xff]  ;;  %v8128_v19 = vld [vmem:[#allocation89_spill] sm:$0xff] }
 0x23f   : > { %4540 = vmatprep.mubr.msk.f32.mxu0 %vm1894_vm11, %v1865_v14  ;;  %v1769_v25 = vsel %vm1757_vm7, %v1736_v42, %v8113_v2  ;;  %v1639_v57 = vsel %vm234_vm0, %v4680_v54, %v8118_v36  ;;  %v1640_v14 = vsel %vm234_vm0, %v4681_v27, %v8120_v39  ;;  %v8130_v38 = vld [vmem:[#allocation64_spill] sm:$0xff]  ;;  %v4683_v50 = vld [vmem:[#allocation2 + $0xc0] sm:$0xff]  ;;  %v8135_v2 = vld [vmem:[#allocation51_spill] sm:$0xff] }
 0x240   : > { %v1421_v17 = vpop.permute.xlu1 %1420  ;;  %v1802_v48 = vsel %vm1790_vm8, %v1769_v25, %v8115_v53  ;;  %v1672_v29 = vsel %vm1658_vm4, %v1639_v57, %v8119_v7  ;;  %v8133_v15 = vld [vmem:[#allocation132_spill] sm:$0xff]  ;;  %v8140_v23 = vld [vmem:[#allocation93_spill] sm:$0xff]  ;;  %v8141_v36 = vld [vmem:[#allocation166_spill] sm:$0xff] }
 0x241   : > { %v1423_v4 = vpop.permute.xlu0 %1422  ;;  %v1833_v12 = vsel %vm1823_vm9, %v1800_v8, %v1421_v17  ;;  %v1705_v56 = vsel %vm1691_vm5, %v1672_v29, %v8121_v34  ;;  %v1673_v17 = vsel %vm1658_vm4, %v1640_v14, %v8122_v28  ;;  %v8138_v0 = vld [vmem:[#allocation48_spill] sm:$0xff]  ;;  %v8143_v39 = vld [vmem:[#allocation113_spill] sm:$0xff] }
 0x242   : > { %v1834_v21 = vsel %vm1823_vm9, %v1801_v40, %v1423_v4  ;;  %v1738_v10 = vsel %vm1724_vm6, %v1705_v56, %v8123_v24  ;;  %v1706_v11 = vsel %vm1691_vm5, %v1673_v17, %v8124_v26  ;;  %v8125_v4 = vld [vmem:[#allocation91_spill] sm:$0xff]  ;;  %v8142_v7 = vld [vmem:[#allocation68_spill] sm:$0xff]  ;;  %v8145_v17 = vld [vmem:[#allocation134_spill] sm:$0xff] }
 0x243   : > { %v1771_v20 = vsel %vm1757_vm7, %v1738_v10, %v8125_v4  ;;  %v1739_v16 = vsel %vm1724_vm6, %v1706_v11, %v8126_v55  ;;  %v4685_v56 = vld [vmem:[#allocation2 + $0xd8] sm:$0xff]  ;;  %v8147_v4 = vld [vmem:[#allocation55_spill] sm:$0xff] }
 0x244   : > { %v1549_v44 = vpop.permute.xlu1 %1548  ;;  %v1772_v40 = vsel %vm1757_vm7, %v1739_v16, %v8128_v19  ;;  %v8146_v26 = vld [vmem:[#allocation112_spill] sm:$0xff]  ;;  %v8150_v19 = vld [vmem:[#allocation53_spill] sm:$0xff] }
 0x245   : > { %v1866_v52 = vsel %vm1856_vm10, %v1833_v12, %v1549_v44  ;;  %v1551_v18 = vpop.permute.xlu0 %1550  ;;  %v8127_v12 = vld [vmem:[#allocation165_spill] sm:$0xff]  ;;  %v1805_v59 = vsel %vm1790_vm8, %v1772_v40, %v8129_v33  ;;  %v8149_v16 = vld [vmem:[#allocation100_spill] sm:$0xff] }
 0x246   : > { %4541 = vmatmul.mubr.msk.f32.gmra.mrb[8].mxu0 %vm1894_vm11, %v1866_v52  ;;  %v1867_v45 = vsel %vm1856_vm10, %v1834_v21, %v1551_v18  ;;  %v1804_v44 = vsel %vm1790_vm8, %v1771_v20, %v8127_v12  ;;  %v4682_v18 = vld [vmem:[#allocation2 + $0xb0] sm:$0xff]  ;;  %v8152_v33 = vld [vmem:[#allocation97_spill] sm:$0xff] }
 0x247   : > { %4543 = vmatprep.mubr.msk.f32.mxu0 %vm1894_vm11, %v1867_v45  ;;  %v1641_v62 = vsel %vm234_vm0, %v4682_v18, %v8130_v38  ;;  %v8153_v38 = vld [vmem:[#allocation168_spill] sm:$0xff] }
 0x248   : > { %v1425_v30 = vpop.permute.xlu1 %1424  ;;  %v1674_v60 = vsel %vm1658_vm4, %v1641_v62, %v8131_v61  ;;  %v8154_v61 = vld [vmem:[#allocation72_spill] sm:$0xff]  ;;  %s4651_s15 = spop %4650 }
 0x249   : > { %v1427_v1 = vpop.permute.xlu0 %1426  ;;  %v1835_v63 = vsel %vm1823_vm9, %v1802_v48, %v1425_v30  ;;  %v8132_v30 = vld [vmem:[#allocation62_spill] sm:$0xff]  ;;  %v1707_v13 = vsel %vm1691_vm5, %v1674_v60, %v8133_v15 }
 0x24a   : > { %v1836_v51 = vsel %vm1823_vm9, %v1803_v47, %v1427_v1  ;;  %v1642_v35 = vsel %vm234_vm0, %v4683_v50, %v8132_v30  ;;  %v1740_v25 = vsel %vm1724_vm6, %v1707_v13, %v8135_v2  ;;  %v8136_v1 = vld [vmem:[#allocation131_spill] sm:$0xff] }
 0x24b   : > { %v1675_v41 = vsel %vm1658_vm4, %v1642_v35, %v8134_v37  ;;  %v1773_v53 = vsel %vm1757_vm7, %v1740_v25, %v8137_v32  ;;  %v8155_v30 = vld [vmem:[#allocation115_spill] sm:$0xff] }
 0x24c   : > { %v1553_v58 = vpop.permute.xlu1 %1552  ;;  %v1708_v43 = vsel %vm1691_vm5, %v1675_v41, %v8136_v1  ;;  %v4687_v13 = vld [vmem:[#allocation2 + $0xf0] sm:$0xff]  ;;  %v8158_v1 = vld [vmem:[#allocation114_spill] sm:$0xff] }
 0x24d   : > { %v1868_v9 = vsel %vm1856_vm10, %v1835_v63, %v1553_v58  ;;  %v1555_v22 = vpop.permute.xlu0 %1554  ;;  %v1741_v49 = vsel %vm1724_vm6, %v1708_v43, %v8138_v0  ;;  %v8139_v63 = vld [vmem:[#allocation167_spill] sm:$0xff]  ;;  %v8157_v41 = vld [vmem:[#allocation136_spill] sm:$0xff] }
 0x24e   : > { %4544 = vmatmul.mubr.msk.f32.gmra.mrb[10].mxu0 %vm1894_vm11, %v1868_v9  ;;  %v1869_v46 = vsel %vm1856_vm10, %v1836_v51, %v1555_v22  ;;  %v1806_v58 = vsel %vm1790_vm8, %v1773_v53, %v8139_v63  ;;  %v1774_v47 = vsel %vm1757_vm7, %v1741_v49, %v8140_v23  ;;  %v4684_v22 = vld [vmem:[#allocation2 + $0xc8] sm:$0xff]  ;;  %v8161_v49 = vld [vmem:[#allocation149_spill] sm:$0xff] }
 0x24f   : > { %4546 = vmatprep.mubr.msk.f32.mxu0 %vm1894_vm11, %v1869_v46  ;;  %v1807_v57 = vsel %vm1790_vm8, %v1774_v47, %v8141_v36  ;;  %v1643_v29 = vsel %vm234_vm0, %v4684_v22, %v8142_v7  ;;  %v8159_v32 = vld [vmem:[#allocation59_spill] sm:$0xff]  ;;  %v8162_v23 = vld [vmem:[#allocation57_spill] sm:$0xff]  ;;  %v8164_v36 = vld [vmem:[#allocation148_spill] sm:$0xff] }
 0x250   : > { %v1429_v6 = vpop.permute.xlu1 %1428  ;;  %v1676_v14 = vsel %vm1658_vm4, %v1643_v29, %v8143_v39  ;;  %v8165_v7 = vld [vmem:[#allocation170_spill] sm:$0xff]  ;;  %v8166_v39 = vld [vmem:[#allocation76_spill] sm:$0xff] }
 0x251   : > { %v1431_v8 = vpop.permute.xlu0 %1430  ;;  %v1837_v52 = vsel %vm1823_vm9, %v1804_v44, %v1429_v6  ;;  %v8144_v6 = vld [vmem:[#allocation66_spill] sm:$0xff]  ;;  %v1709_v24 = vsel %vm1691_vm5, %v1676_v14, %v8145_v17 }
 0x252   : > { %v1838_v45 = vsel %vm1823_vm9, %v1805_v59, %v1431_v8  ;;  %v1644_v28 = vsel %vm234_vm0, %v4685_v56, %v8144_v6  ;;  %v1742_v20 = vsel %vm1724_vm6, %v1709_v24, %v8147_v4  ;;  %v8148_v8 = vld [vmem:[#allocation133_spill] sm:$0xff]  ;;  %v4689_v24 = vld [vmem:[#allocation2 + $0x108] sm:$0xff] }
 0x253   : > { %v1677_v11 = vsel %vm1658_vm4, %v1644_v28, %v8146_v26  ;;  %v1775_v12 = vsel %vm1757_vm7, %v1742_v20, %v8149_v16  ;;  %v8167_v6 = vld [vmem:[#allocation117_spill] sm:$0xff]  ;;  %v8171_v16 = vld [vmem:[#allocation63_spill] sm:$0xff] }
 0x254   : > { %v1557_v3 = vpop.permute.xlu1 %1556  ;;  %v1710_v55 = vsel %vm1691_vm5, %v1677_v11, %v8148_v8  ;;  %v8169_v11 = vld [vmem:[#allocation138_spill] sm:$0xff]  ;;  %v8170_v8 = vld [vmem:[#allocation116_spill] sm:$0xff] }
 0x255   : > { %v1870_v21 = vsel %vm1856_vm10, %v1837_v52, %v1557_v3  ;;  %v1559_v31 = vpop.permute.xlu0 %1558  ;;  %v1743_v40 = vsel %vm1724_vm6, %v1710_v55, %v8150_v19  ;;  %v8151_v52 = vld [vmem:[#allocation169_spill] sm:$0xff] }
 0x256   : > { %4547 = vmatmul.mubr.msk.f32.gmra.mrb[12].mxu0 %vm1894_vm11, %v1870_v21  ;;  %v1871_v5 = vsel %vm1856_vm10, %v1838_v45, %v1559_v31  ;;  %v1808_v3 = vsel %vm1790_vm8, %v1775_v12, %v8151_v52  ;;  %v1776_v59 = vsel %vm1757_vm7, %v1743_v40, %v8152_v33  ;;  %v4686_v31 = vld [vmem:[#allocation2 + $0xe0] sm:$0xff]  ;;  %v8173_v40 = vld [vmem:[#allocation151_spill] sm:$0xff] }
 0x257   : > { %4549 = vmatprep.mubr.msk.f32.mxu0 %vm1894_vm11, %v1871_v5  ;;  %v1809_v62 = vsel %vm1790_vm8, %v1776_v59, %v8153_v38  ;;  %v1645_v60 = vsel %vm234_vm0, %v4686_v31, %v8154_v61  ;;  %v8174_v33 = vld [vmem:[#allocation61_spill] sm:$0xff]  ;;  %v8176_v38 = vld [vmem:[#allocation150_spill] sm:$0xff]  ;;  %v8177_v61 = vld [vmem:[#allocation172_spill] sm:$0xff] }
 0x258   : > { %v1433_v42 = vpop.permute.xlu1 %1432  ;;  %v1678_v35 = vsel %vm1658_vm4, %v1645_v60, %v8155_v30  ;;  %v8178_v30 = vld [vmem:[#allocation80_spill] sm:$0xff] }
 0x259   : > { %v1435_v48 = vpop.permute.xlu0 %1434  ;;  %v1839_v9 = vsel %vm1823_vm9, %v1806_v58, %v1433_v42  ;;  %v8156_v42 = vld [vmem:[#allocation70_spill] sm:$0xff]  ;;  %v1711_v2 = vsel %vm1691_vm5, %v1678_v35, %v8157_v41 }
 0x25a   : > { %v1840_v46 = vsel %vm1823_vm9, %v1807_v57, %v1435_v48  ;;  %v1646_v37 = vsel %vm234_vm0, %v4687_v13, %v8156_v42  ;;  %v1744_v53 = vsel %vm1724_vm6, %v1711_v2, %v8159_v32  ;;  %v8160_v48 = vld [vmem:[#allocation135_spill] sm:$0xff]  ;;  %v4691_v2 = vld [vmem:[#allocation2 + $0x120] sm:$0xff] }
 0x25b   : > { %v1679_v43 = vsel %vm1658_vm4, %v1646_v37, %v8158_v1  ;;  %v1777_v63 = vsel %vm1757_vm7, %v1744_v53, %v8161_v49  ;;  %v8179_v42 = vld [vmem:[#allocation119_spill] sm:$0xff] }
 0x25c   : > { %v1561_v54 = vpop.permute.xlu1 %1560  ;;  %v1712_v0 = vsel %vm1691_vm5, %v1679_v43, %v8160_v48  ;;  %v8181_v43 = vld [vmem:[#allocation140_spill] sm:$0xff]  ;;  %v8182_v48 = vld [vmem:[#allocation118_spill] sm:$0xff]  ;;  %v8183_v49 = vld [vmem:[#allocation67_spill] sm:$0xff] }
 0x25d   : > { %v1872_v51 = vsel %vm1856_vm10, %v1839_v9, %v1561_v54  ;;  %v1563_v27 = vpop.permute.xlu0 %1562  ;;  %v1745_v47 = vsel %vm1724_vm6, %v1712_v0, %v8162_v23  ;;  %v8163_v9 = vld [vmem:[#allocation171_spill] sm:$0xff] }
 0x25e   : > { %4550 = vmatmul.mubr.msk.f32.gmra.mrb[14].mxu0 %vm1894_vm11, %v1872_v51  ;;  %v1873_v34 = vsel %vm1856_vm10, %v1840_v46, %v1563_v27  ;;  %v1810_v54 = vsel %vm1790_vm8, %v1777_v63, %v8163_v9  ;;  %v1778_v57 = vsel %vm1757_vm7, %v1745_v47, %v8164_v36  ;;  %v4688_v27 = vld [vmem:[#allocation2 + $0xf8] sm:$0xff] }
 0x25f   : > { %4552 = vmatprep.mubr.msk.f32.mxu0 %vm1894_vm11, %v1873_v34  ;;  %v1811_v29 = vsel %vm1790_vm8, %v1778_v57, %v8165_v7  ;;  %v1647_v14 = vsel %vm234_vm0, %v4688_v27, %v8166_v39  ;;  %v8185_v47 = vld [vmem:[#allocation153_spill] sm:$0xff]  ;;  %v8188_v7 = vld [vmem:[#allocation152_spill] sm:$0xff]  ;;  %v8189_v39 = vld [vmem:[#allocation174_spill] sm:$0xff] }
 0x260   : > { %v1437_v10 = vpop.permute.xlu1 %1436  ;;  %v1680_v28 = vsel %vm1658_vm4, %v1647_v14, %v8167_v6  ;;  %v8186_v36 = vld [vmem:[#allocation65_spill] sm:$0xff]  ;;  %v8190_v6 = vld [vmem:[#allocation84_spill] sm:$0xff] }
 0x261   : > { %v1439_v44 = vpop.permute.xlu0 %1438  ;;  %v1841_v21 = vsel %vm1823_vm9, %v1808_v3, %v1437_v10  ;;  %v8168_v10 = vld [vmem:[#allocation74_spill] sm:$0xff]  ;;  %v1713_v4 = vsel %vm1691_vm5, %v1680_v28, %v8169_v11 }
 0x262   : > { %v1842_v5 = vsel %vm1823_vm9, %v1809_v62, %v1439_v44  ;;  %v1648_v26 = vsel %vm234_vm0, %v4689_v24, %v8168_v10  ;;  %v1746_v12 = vsel %vm1724_vm6, %v1713_v4, %v8171_v16  ;;  %v8172_v44 = vld [vmem:[#allocation137_spill] sm:$0xff] }
 0x263   : > { %v1681_v55 = vsel %vm1658_vm4, %v1648_v26, %v8170_v8  ;;  %v1779_v52 = vsel %vm1757_vm7, %v1746_v12, %v8173_v40  ;;  %v8191_v10 = vld [vmem:[#allocation121_spill] sm:$0xff]  ;;  %v8195_v40 = vld [vmem:[#allocation71_spill] sm:$0xff] }
 0x264   : > { %v1565_v18 = vpop.permute.xlu1 %1564  ;;  %v1714_v19 = vsel %vm1691_vm5, %v1681_v55, %v8172_v44  ;;  %v4693_v4 = vld [vmem:[#allocation2 + $0x138] sm:$0xff]  ;;  %v8193_v55 = vld [vmem:[#allocation142_spill] sm:$0xff] }
 0x265   : > { %v1874_v45 = vsel %vm1856_vm10, %v1841_v21, %v1565_v18  ;;  %v1567_v50 = vpop.permute.xlu0 %1566  ;;  %v1747_v59 = vsel %vm1724_vm6, %v1714_v19, %v8174_v33  ;;  %v8175_v21 = vld [vmem:[#allocation173_spill] sm:$0xff]  ;;  %v8194_v44 = vld [vmem:[#allocation120_spill] sm:$0xff] }
 0x266   : > { %4553 = vmatmul.mubr.msk.f32.gmra.mrb[16].mxu0 %vm1894_vm11, %v1874_v45  ;;  %v1875_v15 = vsel %vm1856_vm10, %v1842_v5, %v1567_v50  ;;  %v1812_v18 = vsel %vm1790_vm8, %v1779_v52, %v8175_v21  ;;  %v1780_v62 = vsel %vm1757_vm7, %v1747_v59, %v8176_v38  ;;  %v4690_v50 = vld [vmem:[#allocation2 + $0x110] sm:$0xff]  ;;  %v8198_v38 = vld [vmem:[#allocation69_spill] sm:$0xff] }
 0x267   : > { %4555 = vmatprep.mubr.msk.f32.mxu0 %vm1894_vm11, %v1875_v15  ;;  %v1813_v60 = vsel %vm1790_vm8, %v1780_v62, %v8177_v61  ;;  %v1649_v35 = vsel %vm234_vm0, %v4690_v50, %v8178_v30  ;;  %v8197_v59 = vld [vmem:[#allocation155_spill] sm:$0xff]  ;;  %v8200_v61 = vld [vmem:[#allocation154_spill] sm:$0xff]  ;;  %v8201_v30 = vld [vmem:[#allocation176_spill] sm:$0xff] }
 0x268   : > { %v1441_v25 = vpop.permute.xlu1 %1440  ;;  %v1682_v37 = vsel %vm1658_vm4, %v1649_v35, %v8179_v42  ;;  %v8202_v42 = vld [vmem:[#allocation88_spill] sm:$0xff] }
 0x269   : > { %v1443_v58 = vpop.permute.xlu0 %1442  ;;  %v1843_v51 = vsel %vm1823_vm9, %v1810_v54, %v1441_v25  ;;  %v8180_v25 = vld [vmem:[#allocation78_spill] sm:$0xff]  ;;  %v1715_v32 = vsel %vm1691_vm5, %v1682_v37, %v8181_v43 }
 0x26a   : > { %v1844_v34 = vsel %vm1823_vm9, %v1811_v29, %v1443_v58  ;;  %v1650_v1 = vsel %vm234_vm0, %v4691_v2, %v8180_v25  ;;  %v1748_v63 = vsel %vm1724_vm6, %v1715_v32, %v8183_v49  ;;  %v8184_v58 = vld [vmem:[#allocation139_spill] sm:$0xff] }
 0x26b   : > { %v1683_v0 = vsel %vm1658_vm4, %v1650_v1, %v8182_v48  ;;  %v1781_v9 = vsel %vm1757_vm7, %v1748_v63, %v8185_v47  ;;  %v8203_v25 = vld [vmem:[#allocation123_spill] sm:$0xff] }
 0x26c   : > { %v1569_v22 = vpop.permute.xlu1 %1568  ;;  %v1716_v23 = vsel %vm1691_vm5, %v1683_v0, %v8184_v58  ;;  %v4695_v32 = vld [vmem:[#allocation2 + $0x150] sm:$0xff]  ;;  %v8206_v58 = vld [vmem:[#allocation122_spill] sm:$0xff] }
 0x26d   : > { %v1876_v46 = vsel %vm1856_vm10, %v1843_v51, %v1569_v22  ;;  %v1571_v56 = vpop.permute.xlu0 %1570  ;;  %v1749_v57 = vsel %vm1724_vm6, %v1716_v23, %v8186_v36  ;;  %v8187_v51 = vld [vmem:[#allocation175_spill] sm:$0xff]  ;;  %v8205_v0 = vld [vmem:[#allocation144_spill] sm:$0xff] }
 0x26e   : > { %4556 = vmatmul.mubr.msk.f32.gmra.mrb[18].mxu0 %vm1894_vm11, %v1876_v46  ;;  %v1877_v17 = vsel %vm1856_vm10, %v1844_v34, %v1571_v56  ;;  %v1814_v22 = vsel %vm1790_vm8, %v1781_v9, %v8187_v51  ;;  %v1782_v29 = vsel %vm1757_vm7, %v1749_v57, %v8188_v7  ;;  %v4692_v56 = vld [vmem:[#allocation2 + $0x128] sm:$0xff]  ;;  %v8209_v57 = vld [vmem:[#allocation157_spill] sm:$0xff] }
 0x26f   : > { %4558 = vmatprep.mubr.msk.f32.mxu0 %vm1894_vm11, %v1877_v17  ;;  %v1815_v14 = vsel %vm1790_vm8, %v1782_v29, %v8189_v39  ;;  %v1651_v28 = vsel %vm234_vm0, %v4692_v56, %v8190_v6  ;;  %v8207_v47 = vld [vmem:[#allocation75_spill] sm:$0xff]  ;;  %v8210_v7 = vld [vmem:[#allocation73_spill] sm:$0xff]  ;;  %v8212_v39 = vld [vmem:[#allocation156_spill] sm:$0xff] }
 0x270   : > { %v1445_v20 = vpop.permute.xlu1 %1444  ;;  %v1684_v26 = vsel %vm1658_vm4, %v1651_v28, %v8191_v10  ;;  %v2382_v6 = vld [vmem:[#allocation2 + $0x9] sm:$0xff]  ;;  %v8213_v28 = vld [vmem:[#allocation178_spill] sm:$0xff] }
 0x271   : > { %v1447_v3 = vpop.permute.xlu0 %1446  ;;  %v1845_v45 = vsel %vm1823_vm9, %v1812_v18, %v1445_v20  ;;  %v8192_v20 = vld [vmem:[#allocation82_spill] sm:$0xff]  ;;  %v1717_v16 = vsel %vm1691_vm5, %v1684_v26, %v8193_v55  ;;  %2671 = vrot.lane.b32.xlu1 %v2382_v6, %s4716_s23  ;;  %v4696_v26 = vld [vmem:[#allocation2 + $0x158] sm:$0xff] }
 0x272   : > { %v1846_v15 = vsel %vm1823_vm9, %v1813_v60, %v1447_v3  ;;  %v1652_v8 = vsel %vm234_vm0, %v4693_v4, %v8192_v20  ;;  %v1750_v52 = vsel %vm1724_vm6, %v1717_v16, %v8195_v40  ;;  %v8196_v3 = vld [vmem:[#allocation141_spill] sm:$0xff]  ;;  %v2381_v10 = vld [vmem:[#allocation2 + $0x1] sm:$0xff] }
 0x273   : > { %v1685_v19 = vsel %vm1658_vm4, %v1652_v8, %v8194_v44  ;;  %v1783_v21 = vsel %vm1757_vm7, %v1750_v52, %v8197_v59  ;;  %2669 = vrot.lane.b32.xlu0 %v2381_v10, %s4716_s23  ;;  %v8215_v55 = vld [vmem:[#allocation125_spill] sm:$0xff]  ;;  %v4697_v44 = vld [vmem:[#allocation2 + $0x168] sm:$0xff]  ;;  %v8218_v59 = vld [vmem:[#allocation124_spill] sm:$0xff] }
 0x274   : > { %v1573_v31 = vpop.permute.xlu1 %1572  ;;  %v1718_v33 = vsel %vm1691_vm5, %v1685_v19, %v8196_v3  ;;  %v8216_v19 = vld [vmem:[#allocation90_spill] sm:$0xff] }
 0x275   : > { %v1878_v5 = vsel %vm1856_vm10, %v1845_v45, %v1573_v31  ;;  %v1575_v13 = vpop.permute.xlu0 %1574  ;;  %v1751_v62 = vsel %vm1724_vm6, %v1718_v33, %v8198_v38  ;;  %v8199_v45 = vld [vmem:[#allocation177_spill] sm:$0xff]  ;;  %v1656_v40 = vsel %vm234_vm0, %v4697_v44, %v8216_v19  ;;  %v8217_v52 = vld [vmem:[#allocation146_spill] sm:$0xff] }
 0x276   : > { %4559 = vmatmul.mubr.msk.f32.gmra.mrb[20].mxu0 %vm1894_vm11, %v1878_v5  ;;  %v1879_v41 = vsel %vm1856_vm10, %v1846_v15, %v1575_v13  ;;  %v1816_v31 = vsel %vm1790_vm8, %v1783_v21, %v8199_v45  ;;  %v1784_v60 = vsel %vm1757_vm7, %v1751_v62, %v8200_v61  ;;  %v4694_v13 = vld [vmem:[#allocation2 + $0x140] sm:$0xff]  ;;  %v1689_v21 = vsel %vm1658_vm4, %v1656_v40, %v8218_v59 }
 0x277   : > { %4561 = vmatprep.mubr.msk.f32.mxu0 %vm1894_vm11, %v1879_v41  ;;  %v1817_v35 = vsel %vm1790_vm8, %v1784_v60, %v8201_v30  ;;  %v1653_v37 = vsel %vm234_vm0, %v4694_v13, %v8202_v42  ;;  %v8220_v62 = vld [vmem:[#allocation145_spill] sm:$0xff] }
 0x278   : > { %v1449_v53 = vpop.permute.xlu1 %1448  ;;  %v1686_v1 = vsel %vm1658_vm4, %v1653_v37, %v8203_v25  ;;  %v1722_v45 = vsel %vm1691_vm5, %v1689_v21, %v8220_v62  ;;  %v8223_v30 = vld [vmem:[#allocation181_spill] sm:$0xff] }
 0x279   : > { %v1451_v54 = vpop.permute.xlu0 %1450  ;;  %v1847_v46 = vsel %vm1823_vm9, %v1814_v22, %v1449_v53  ;;  %v8204_v53 = vld [vmem:[#allocation86_spill] sm:$0xff]  ;;  %v1719_v49 = vsel %vm1691_vm5, %v1686_v1, %v8205_v0  ;;  %v4698_v1 = vld [vmem:[#allocation2 + $0x170] sm:$0xff] }
 0x27a   : > { %v1848_v17 = vsel %vm1823_vm9, %v1815_v14, %v1451_v54  ;;  %v1654_v48 = vsel %vm234_vm0, %v4695_v32, %v8204_v53  ;;  %v1752_v9 = vsel %vm1724_vm6, %v1719_v49, %v8207_v47  ;;  %v8208_v54 = vld [vmem:[#allocation143_spill] sm:$0xff]  ;;  %v8227_v0 = vld [vmem:[#allocation126_spill] sm:$0xff] }
 0x27b   : > { %v1687_v23 = vsel %vm1658_vm4, %v1654_v48, %v8206_v58  ;;  %v1785_v51 = vsel %vm1757_vm7, %v1752_v9, %v8209_v57  ;;  %v8228_v58 = vld [vmem:[#allocation147_spill] sm:$0xff]  ;;  %v8229_v9 = vld [vmem:[#allocation81_spill] sm:$0xff] }
 0x27c   : > { %v1577_v27 = vpop.permute.xlu1 %1576  ;;  %v1720_v36 = vsel %vm1691_vm5, %v1687_v23, %v8208_v54 }
 0x27d   : > { %v1880_v34 = vsel %vm1856_vm10, %v1847_v46, %v1577_v27  ;;  %v1579_v24 = vpop.permute.xlu0 %1578  ;;  %v1753_v29 = vsel %vm1724_vm6, %v1720_v36, %v8210_v7  ;;  %v8211_v46 = vld [vmem:[#allocation179_spill] sm:$0xff]  ;;  %v8230_v36 = vld [vmem:[#allocation160_spill] sm:$0xff] }
 0x27e   : > { %4562 = vmatmul.mubr.msk.f32.gmra.mrb[22].mxu0 %vm1894_vm11, %v1880_v34  ;;  %v1881_v11 = vsel %vm1856_vm10, %v1848_v17, %v1579_v24  ;;  %v1818_v27 = vsel %vm1790_vm8, %v1785_v51, %v8211_v46  ;;  %v1786_v14 = vsel %vm1757_vm7, %v1753_v29, %v8212_v39  ;;  %v8231_v51 = vld [vmem:[#allocation182_spill] sm:$0xff] }
 0x27f   : > { %4564 = vmatprep.mubr.msk.f32.mxu0 %vm1894_vm11, %v1881_v11  ;;  %v1819_v17 = vsel %vm1790_vm8, %v1786_v14, %v8213_v28  ;;  %v8214_v11 = vld [vmem:[#allocation92_spill] sm:$0xff] }
 0x280   : > { %v1453_v12 = vpop.permute.xlu1 %1452  ;;  %v1655_v4 = vsel %vm234_vm0, %v4696_v26, %v8214_v11 }
 0x281   : > { %v1455_v18 = vpop.permute.xlu0 %1454  ;;  %v1849_v5 = vsel %vm1823_vm9, %v1816_v31, %v1453_v12  ;;  %v1688_v16 = vsel %vm1658_vm4, %v1655_v4, %v8215_v55  ;;  %v8221_v31 = vld [vmem:[#allocation159_spill] sm:$0xff] }
 0x282   : > { %v1850_v41 = vsel %vm1823_vm9, %v1817_v35, %v1455_v18  ;;  %v1721_v3 = vsel %vm1691_vm5, %v1688_v16, %v8217_v52  ;;  %v8219_v18 = vld [vmem:[#allocation79_spill] sm:$0xff] }
 0x283   : > { %v1754_v38 = vsel %vm1724_vm6, %v1721_v3, %v8219_v18 }
 0x284   : > { %v1581_v50 = vpop.permute.xlu1 %1580  ;;  %v1787_v61 = vsel %vm1757_vm7, %v1754_v38, %v8221_v31 }
 0x285   : > { %v1882_v15 = vsel %vm1856_vm10, %v1849_v5, %v1581_v50  ;;  %v1583_v2 = vpop.permute.xlu0 %1582  ;;  %v8222_v5 = vld [vmem:[#allocation77_spill] sm:$0xff]  ;;  %v1820_v35 = vsel %vm1790_vm8, %v1787_v61, %v8223_v30 }
 0x286   : > { %4565 = vmatmul.mubr.msk.f32.gmra.mrb[24].mxu0 %vm1894_vm11, %v1882_v15  ;;  %v1883_v43 = vsel %vm1856_vm10, %v1850_v41, %v1583_v2  ;;  %v1755_v50 = vsel %vm1724_vm6, %v1722_v45, %v8222_v5  ;;  %v8224_v15 = vld [vmem:[#allocation158_spill] sm:$0xff]  ;;  %v8225_v41 = vld [vmem:[#allocation180_spill] sm:$0xff] }
 0x287   : > { %4567 = vmatprep.mubr.msk.f32.mxu0 %vm1894_vm11, %v1883_v43  ;;  %v1788_v13 = vsel %vm1757_vm7, %v1755_v50, %v8224_v15  ;;  %v8226_v43 = vld [vmem:[#allocation96_spill] sm:$0xff] }
 0x288   : > { %v1457_v63 = vpop.permute.xlu1 %1456  ;;  %v1821_v2 = vsel %vm1790_vm8, %v1788_v13, %v8225_v41  ;;  %v1657_v32 = vsel %vm234_vm0, %v4698_v1, %v8226_v43 }
 0x289   : > { %v1459_v22 = vpop.permute.xlu0 %1458  ;;  %v1851_v34 = vsel %vm1823_vm9, %v1818_v27, %v1457_v63  ;;  %v1690_v49 = vsel %vm1658_vm4, %v1657_v32, %v8227_v0  ;;  %v6513_v27 = vstv %s4651_s15 }
 0x28a   : > { %v1852_v20 = vsel %vm1823_vm9, %v1819_v17, %v1459_v22  ;;  %v1723_v23 = vsel %vm1691_vm5, %v1690_v49, %v8228_v58 }
 0x28b   : > { %v1756_v54 = vsel %vm1724_vm6, %v1723_v23, %v8229_v9 }
 0x28c   : > { %v1585_v56 = vpop.permute.xlu1 %1584  ;;  %v1789_v57 = vsel %vm1757_vm7, %v1756_v54, %v8230_v36 }
 0x28d   : > { %v1884_v24 = vsel %vm1856_vm10, %v1851_v34, %v1585_v56  ;;  %v1587_v8 = vpop.permute.xlu0 %1586  ;;  %v1822_v22 = vsel %vm1790_vm8, %v1789_v57, %v8231_v51 }
 0x28e   : > { %4568 = vmatmul.mubr.msk.f32.gmra.mrb[26].mxu0 %vm1894_vm11, %v1884_v24  ;;  %v1885_v12 = vsel %vm1856_vm10, %v1852_v20, %v1587_v8 }
 0x28f   : > { %4570 = vmatprep.mubr.msk.f32.mxu0 %vm1894_vm11, %v1885_v12 }
 0x290   : > { %v1461_v33 = vpop.permute.xlu1 %1460 }
 0x291   : > { %v1463_v60 = vpop.permute.xlu0 %1462  ;;  %v1853_v42 = vsel %vm1823_vm9, %v1820_v35, %v1461_v33 }
 0x292   : > { %v1854_v53 = vsel %vm1823_vm9, %v1821_v2, %v1463_v60 }
 0x294   : > { %v1589_v37 = vpop.permute.xlu1 %1588 }
 0x295   : > { %v1886_v25 = vsel %vm1856_vm10, %v1853_v42, %v1589_v37  ;;  %v1591_v48 = vpop.permute.xlu0 %1590 }
 0x296   : > { %4571 = vmatmul.mubr.msk.f32.gmra.mrb[28].mxu0 %vm1894_vm11, %v1886_v25  ;;  %v1887_v63 = vsel %vm1856_vm10, %v1854_v53, %v1591_v48 }
 0x297   : > { %4573 = vmatprep.mubr.msk.f32.mxu0 %vm1894_vm11, %v1887_v63 }
 0x298   : > { %v1465_v47 = vpop.permute.xlu1 %1464 }
 0x299   : > { %v1855_v7 = vsel %vm1823_vm9, %v1822_v22, %v1465_v47 }
 0x29c   : > { %v1593_v29 = vpop.permute.xlu1 %1592 }
 0x29d   : > { %v1888_v46 = vsel %vm1856_vm10, %v1855_v7, %v1593_v29 }
 0x29e   : > { %4574 = vmatmul.mubr.msk.f32.gmra.mrb[30].mxu0 %vm1894_vm11, %v1888_v46 }
 0x305   : > { %v4530_v39 = vpop.f32.mrb[0].mxu0 }
 0x306   : > { %vm2221_vm12 = vcmp.gt.f32.partialorder %v4530_v39, 0.0  ;;  %v2254_v14 = vmul.f32 %v4530_v39, %v6513_v27  ;;  %v2061_v34 = vpop.f32.mrb[1].mxu0 }
 0x307   : > { %vm2220_vm13 = vcmp.gt.f32.partialorder %v2061_v34, 0.0  ;;  %v2253_v56 = vmul.f32 %v6513_v27, %v2061_v34 }
 0x308   : > { %v2286_v6 = vsel %vm2221_vm12, %v4530_v39, %v2254_v14 }
 0x309   : > { %2318 = vst.msk [vmem:[#allocation2 + $0x21] sm:$0xff] %vm234_vm0, %v2286_v6  ;;  %v2285_v28 = vsel %vm2220_vm13, %v2061_v34, %v2253_v56  ;;  %v4533_v17 = vpop.f32.mrb[2].mxu0 }
 0x30a   : > { %2317 = vst.msk [vmem:[#allocation2 + $0x19] sm:$0xff] %vm234_vm0, %v2285_v28  ;;  %vm2223_vm14 = vcmp.gt.f32.partialorder %v4533_v17, 0.0  ;;  %v2256_v24 = vmul.f32 %v4533_v17, %v6513_v27  ;;  %v2071_v10 = vpop.f32.mrb[3].mxu0 }
 0x30b   : > { %vm2222_vm15 = vcmp.gt.f32.partialorder %v2071_v10, 0.0  ;;  %v2255_v26 = vmul.f32 %v6513_v27, %v2071_v10 }
 0x30c   : > { %v2288_v11 = vsel %vm2223_vm14, %v4533_v17, %v2256_v24 }
 0x30d   : > { %2320 = vst.msk [vmem:[#allocation2 + $0x39] sm:$0xff] %vm234_vm0, %v2288_v11  ;;  %v2287_v4 = vsel %vm2222_vm15, %v2071_v10, %v2255_v26  ;;  %v4536_v20 = vpop.f32.mrb[4].mxu0 }
 0x30e   : > { %2319 = vst.msk [vmem:[#allocation2 + $0x31] sm:$0xff] %vm234_vm0, %v2287_v4  ;;  %vm2225_vm1 = vcmp.gt.f32.partialorder %v4536_v20, 0.0  ;;  %v2258_v8 = vmul.f32 %v4536_v20, %v6513_v27  ;;  %v2081_v55 = vpop.f32.mrb[5].mxu0 }
 0x30f   : > { %vm2224_vm2 = vcmp.gt.f32.partialorder %v2081_v55, 0.0  ;;  %v2257_v16 = vmul.f32 %v6513_v27, %v2081_v55 }
 0x310   : > { %v2290_v12 = vsel %vm2225_vm1, %v4536_v20, %v2258_v8  ;;  %v6525_v44 = vld [vmem:[#allocation2 + $0x21] sm:$0xff] }
 0x311   : > { %2322 = vst.msk [vmem:[#allocation2 + $0x51] sm:$0xff] %vm234_vm0, %v2290_v12  ;;  %v2289_v19 = vsel %vm2224_vm2, %v2081_v55, %v2257_v16  ;;  %2675 = vrot.lane.b32.xlu1 %v6525_v44, %s4716_s23  ;;  %v4539_v40 = vpop.f32.mrb[6].mxu0  ;;  %v6530_v52 = vld [vmem:[#allocation2 + $0x19] sm:$0xff] }
 0x312   : > { %2321 = vst.msk [vmem:[#allocation2 + $0x49] sm:$0xff] %vm234_vm0, %v2289_v19  ;;  %vm2227_vm12 = vcmp.gt.f32.partialorder %v4539_v40, 0.0  ;;  %v2260_v3 = vmul.f32 %v4539_v40, %v6513_v27  ;;  %2673 = vrot.lane.b32.xlu0 %v6530_v52, %s4716_s23  ;;  %v2091_v33 = vpop.f32.mrb[7].mxu0 }
 0x313   : > { %vm2226_vm13 = vcmp.gt.f32.partialorder %v2091_v33, 0.0  ;;  %v2259_v59 = vmul.f32 %v6513_v27, %v2091_v33 }
 0x314   : > { %v2292_v21 = vsel %vm2227_vm12, %v4539_v40, %v2260_v3  ;;  %v6537_v18 = vld [vmem:[#allocation2 + $0x39] sm:$0xff] }
 0x315   : > { %2324 = vst.msk [vmem:[#allocation2 + $0x69] sm:$0xff] %vm234_vm0, %v2292_v21  ;;  %v2291_v38 = vsel %vm2226_vm13, %v2091_v33, %v2259_v59  ;;  %2679 = vrot.lane.b32.xlu1 %v6537_v18, %s4716_s23  ;;  %v6542_v62 = vld [vmem:[#allocation2 + $0x31] sm:$0xff] }
 0x316   : > { %2323 = vst.msk [vmem:[#allocation2 + $0x61] sm:$0xff] %vm234_vm0, %v2291_v38  ;;  %2677 = vrot.lane.b32.xlu0 %v6542_v62, %s4716_s23 }
 0x318   : > { %v6547_v45 = vld [vmem:[#allocation2 + $0x51] sm:$0xff] }
 0x319   : > { %2683 = vrot.lane.b32.xlu1 %v6547_v45, %s4716_s23  ;;  %v4542_v31 = vpop.f32.mrb[8].mxu0  ;;  %v6551_v61 = vld [vmem:[#allocation2 + $0x49] sm:$0xff] }
 0x31a   : > { %vm2229_vm14 = vcmp.gt.f32.partialorder %v4542_v31, 0.0  ;;  %v2262_v60 = vmul.f32 %v4542_v31, %v6513_v27  ;;  %2681 = vrot.lane.b32.xlu0 %v6551_v61, %s4716_s23  ;;  %v2101_v5 = vpop.f32.mrb[9].mxu0 }
 0x31b   : > { %vm2228_vm15 = vcmp.gt.f32.partialorder %v2101_v5, 0.0  ;;  %v2261_v50 = vmul.f32 %v6513_v27, %v2101_v5 }
 0x31c   : > { %v2294_v30 = vsel %vm2229_vm14, %v4542_v31, %v2262_v60  ;;  %v6557_v35 = vld [vmem:[#allocation2 + $0x69] sm:$0xff] }
 0x31d   : > { %2326 = vst.msk [vmem:[#allocation2 + $0x81] sm:$0xff] %vm234_vm0, %v2294_v30  ;;  %v2293_v15 = vsel %vm2228_vm15, %v2101_v5, %v2261_v50  ;;  %2687 = vrot.lane.b32.xlu1 %v6557_v35, %s4716_s23  ;;  %v6562_v13 = vld [vmem:[#allocation2 + $0x61] sm:$0xff] }
 0x31e   : > { %2325 = vst.msk [vmem:[#allocation2 + $0x79] sm:$0xff] %vm234_vm0, %v2293_v15  ;;  %2685 = vrot.lane.b32.xlu0 %v6562_v13, %s4716_s23 }
 0x321   : > { %v4545_v42 = vpop.f32.mrb[10].mxu0 }
 0x322   : > { %vm2231_vm1 = vcmp.gt.f32.partialorder %v4545_v42, 0.0  ;;  %v2264_v37 = vmul.f32 %v4545_v42, %v6513_v27  ;;  %v2111_v41 = vpop.f32.mrb[11].mxu0 }
 0x323   : > { %vm2230_vm2 = vcmp.gt.f32.partialorder %v2111_v41, 0.0  ;;  %v2263_v2 = vmul.f32 %v6513_v27, %v2111_v41 }
 0x324   : > { %v2296_v25 = vsel %vm2231_vm1, %v4545_v42, %v2264_v37  ;;  %v6569_v1 = vld [vmem:[#allocation2 + $0x81] sm:$0xff] }
 0x325   : > { %2328 = vst.msk [vmem:[#allocation2 + $0x99] sm:$0xff] %vm234_vm0, %v2296_v25  ;;  %v2295_v43 = vsel %vm2230_vm2, %v2111_v41, %v2263_v2  ;;  %2691 = vrot.lane.b32.xlu1 %v6569_v1, %s4716_s23  ;;  %v6574_v32 = vld [vmem:[#allocation2 + $0x79] sm:$0xff] }
 0x326   : > { %2327 = vst.msk [vmem:[#allocation2 + $0x91] sm:$0xff] %vm234_vm0, %v2295_v43  ;;  %2689 = vrot.lane.b32.xlu0 %v6574_v32, %s4716_s23 }
 0x329   : > { %v4548_v53 = vpop.f32.mrb[12].mxu0 }
 0x32a   : > { %vm2233_vm12 = vcmp.gt.f32.partialorder %v4548_v53, 0.0  ;;  %v2266_v48 = vmul.f32 %v4548_v53, %v6513_v27  ;;  %v2121_v0 = vpop.f32.mrb[13].mxu0 }
 0x32b   : > { %vm2232_vm13 = vcmp.gt.f32.partialorder %v2121_v0, 0.0  ;;  %v2265_v49 = vmul.f32 %v6513_v27, %v2121_v0 }
 0x32c   : > { %v2298_v63 = vsel %vm2233_vm12, %v4548_v53, %v2266_v48  ;;  %v2394_v58 = vld [vmem:[#allocation2 + $0x99] sm:$0xff] }
 0x32d   : > { %2330 = vst.msk [vmem:[#allocation2 + $0xb1] sm:$0xff] %vm234_vm0, %v2298_v63  ;;  %v2297_v23 = vsel %vm2232_vm13, %v2121_v0, %v2265_v49  ;;  %2695 = vrot.lane.b32.xlu1 %v2394_v58, %s4716_s23  ;;  %v6583_v47 = vld [vmem:[#allocation2 + $0x91] sm:$0xff] }
 0x32e   : > { %2329 = vst.msk [vmem:[#allocation2 + $0xa9] sm:$0xff] %vm234_vm0, %v2297_v23  ;;  %2693 = vrot.lane.b32.xlu0 %v6583_v47, %s4716_s23 }
 0x331   : > { %v4551_v9 = vpop.f32.mrb[14].mxu0 }
 0x332   : > { %vm2235_vm14 = vcmp.gt.f32.partialorder %v4551_v9, 0.0  ;;  %v2268_v54 = vmul.f32 %v4551_v9, %v6513_v27  ;;  %v2131_v36 = vpop.f32.mrb[15].mxu0 }
 0x333   : > { %vm2234_vm15 = vcmp.gt.f32.partialorder %v2131_v36, 0.0  ;;  %v2267_v57 = vmul.f32 %v6513_v27, %v2131_v36 }
 0x334   : > { %v2300_v51 = vsel %vm2235_vm14, %v4551_v9, %v2268_v54  ;;  %v2396_v22 = vld [vmem:[#allocation2 + $0xb1] sm:$0xff] }
 0x335   : > { %2332 = vst.msk [vmem:[#allocation2 + $0xc9] sm:$0xff] %vm234_vm0, %v2300_v51  ;;  %v2299_v7 = vsel %vm2234_vm15, %v2131_v36, %v2267_v57  ;;  %2699 = vrot.lane.b32.xlu1 %v2396_v22, %s4716_s23  ;;  %v2395_v29 = vld [vmem:[#allocation2 + $0xa9] sm:$0xff] }
 0x336   : > { %2331 = vst.msk [vmem:[#allocation2 + $0xc1] sm:$0xff] %vm234_vm0, %v2299_v7  ;;  %2697 = vrot.lane.b32.xlu0 %v2395_v29, %s4716_s23 }
 0x339   : > { %v4554_v46 = vpop.f32.mrb[16].mxu0 }
 0x33a   : > { %vm2237_vm1 = vcmp.gt.f32.partialorder %v4554_v46, 0.0  ;;  %v2270_v39 = vmul.f32 %v4554_v46, %v6513_v27  ;;  %v2141_v14 = vpop.f32.mrb[17].mxu0 }
 0x33b   : > { %vm2236_vm2 = vcmp.gt.f32.partialorder %v2141_v14, 0.0  ;;  %v2269_v34 = vmul.f32 %v6513_v27, %v2141_v14 }
 0x33c   : > { %v2302_v56 = vsel %vm2237_vm1, %v4554_v46, %v2270_v39  ;;  %v2398_v6 = vld [vmem:[#allocation2 + $0xc9] sm:$0xff] }
 0x33d   : > { %2334 = vst.msk [vmem:[#allocation2 + $0xe1] sm:$0xff] %vm234_vm0, %v2302_v56  ;;  %v2301_v28 = vsel %vm2236_vm2, %v2141_v14, %v2269_v34  ;;  %2703 = vrot.lane.b32.xlu1 %v2398_v6, %s4716_s23  ;;  %v2397_v17 = vld [vmem:[#allocation2 + $0xc1] sm:$0xff] }
 0x33e   : > { %2333 = vst.msk [vmem:[#allocation2 + $0xd9] sm:$0xff] %vm234_vm0, %v2301_v28  ;;  %2701 = vrot.lane.b32.xlu0 %v2397_v17, %s4716_s23 }
 0x341   : > { %v4557_v24 = vpop.f32.mrb[18].mxu0 }
 0x342   : > { %vm2239_vm12 = vcmp.gt.f32.partialorder %v4557_v24, 0.0  ;;  %v2272_v10 = vmul.f32 %v4557_v24, %v6513_v27  ;;  %v2151_v26 = vpop.f32.mrb[19].mxu0 }
 0x343   : > { %vm2238_vm13 = vcmp.gt.f32.partialorder %v2151_v26, 0.0  ;;  %v2271_v11 = vmul.f32 %v6513_v27, %v2151_v26 }
 0x344   : > { %v2304_v4 = vsel %vm2239_vm12, %v4557_v24, %v2272_v10  ;;  %v2400_v20 = vld [vmem:[#allocation2 + $0xe1] sm:$0xff] }
 0x345   : > { %2336 = vst.msk [vmem:[#allocation2 + $0xf9] sm:$0xff] %vm234_vm0, %v2304_v4  ;;  %v2303_v8 = vsel %vm2238_vm13, %v2151_v26, %v2271_v11  ;;  %2707 = vrot.lane.b32.xlu1 %v2400_v20, %s4716_s23  ;;  %v2399_v55 = vld [vmem:[#allocation2 + $0xd9] sm:$0xff]  ;;  %v2414_v4 = vld [vmem:[#allocation2 + $0xa] sm:$0xff]  ;;  %v2413_v20 = vld [vmem:[#allocation2 + $0x2] sm:$0xff] }
 0x346   : > { %2335 = vst.msk [vmem:[#allocation2 + $0xf1] sm:$0xff] %vm234_vm0, %v2303_v8  ;;  %2705 = vrot.lane.b32.xlu0 %v2399_v55, %s4716_s23  ;;  %v6644_v8 = vld [vmem:[#allocation2 + $0x22] sm:$0xff]  ;;  %v6652_v55 = vld [vmem:[#allocation2 + $0x3a] sm:$0xff] }
 0x349   : > { %v4560_v16 = vpop.f32.mrb[20].mxu0 }
 0x34a   : > { %vm2241_vm14 = vcmp.gt.f32.partialorder %v4560_v16, 0.0  ;;  %v2274_v12 = vmul.f32 %v4560_v16, %v6513_v27  ;;  %v2161_v19 = vpop.f32.mrb[21].mxu0 }
 0x34b   : > { %vm2240_vm15 = vcmp.gt.f32.partialorder %v2161_v19, 0.0  ;;  %v2273_v40 = vmul.f32 %v6513_v27, %v2161_v19 }
 0x34c   : > { %v2306_v3 = vsel %vm2241_vm14, %v4560_v16, %v2274_v12  ;;  %v2402_v33 = vld [vmem:[#allocation2 + $0xf9] sm:$0xff] }
 0x34d   : > { %2338 = vst.msk [vmem:[#allocation2 + $0x111] sm:$0xff] %vm234_vm0, %v2306_v3  ;;  %v2305_v59 = vsel %vm2240_vm15, %v2161_v19, %v2273_v40  ;;  %2711 = vrot.lane.b32.xlu1 %v2402_v33, %s4716_s23  ;;  %v2401_v21 = vld [vmem:[#allocation2 + $0xf1] sm:$0xff]  ;;  %v6672_v3 = vld [vmem:[#allocation2 + $0x62] sm:$0xff] }
 0x34e   : > { %2337 = vst.msk [vmem:[#allocation2 + $0x109] sm:$0xff] %vm234_vm0, %v2305_v59  ;;  %2709 = vrot.lane.b32.xlu0 %v2401_v21, %s4716_s23  ;;  %v6656_v16 = vld [vmem:[#allocation2 + $0x32] sm:$0xff]  ;;  %v6664_v19 = vld [vmem:[#allocation2 + $0x4a] sm:$0xff]  ;;  %v6676_v33 = vld [vmem:[#allocation2 + $0x82] sm:$0xff] }
 0x34f   : > { %v6660_v12 = vld [vmem:[#allocation2 + $0x52] sm:$0xff]  ;;  %v6668_v40 = vld [vmem:[#allocation2 + $0x6a] sm:$0xff]  ;;  %v6680_v59 = vld [vmem:[#allocation2 + $0x7a] sm:$0xff] }
 0x350   : > { %v6684_v21 = vld [vmem:[#allocation2 + $0x9a] sm:$0xff] }
 0x351   : > { %v4563_v38 = vpop.f32.mrb[22].mxu0 }
 0x352   : > { %vm2243_vm1 = vcmp.gt.f32.partialorder %v4563_v38, 0.0  ;;  %v2276_v31 = vmul.f32 %v4563_v38, %v6513_v27  ;;  %v2171_v60 = vpop.f32.mrb[23].mxu0 }
 0x353   : > { %vm2242_vm2 = vcmp.gt.f32.partialorder %v2171_v60, 0.0  ;;  %v2275_v5 = vmul.f32 %v6513_v27, %v2171_v60 }
 0x354   : > { %v2308_v50 = vsel %vm2243_vm1, %v4563_v38, %v2276_v31  ;;  %v2404_v30 = vld [vmem:[#allocation2 + $0x111] sm:$0xff] }
 0x355   : > { %2340 = vst.msk [vmem:[#allocation2 + $0x129] sm:$0xff] %vm234_vm0, %v2308_v50  ;;  %v2307_v15 = vsel %vm2242_vm2, %v2171_v60, %v2275_v5  ;;  %2715 = vrot.lane.b32.xlu1 %v2404_v30, %s4716_s23  ;;  %v2403_v42 = vld [vmem:[#allocation2 + $0x109] sm:$0xff]  ;;  %v6688_v38 = vld [vmem:[#allocation2 + $0x92] sm:$0xff] }
 0x356   : > { %2339 = vst.msk [vmem:[#allocation2 + $0x121] sm:$0xff] %vm234_vm0, %v2307_v15  ;;  %2713 = vrot.lane.b32.xlu0 %v2403_v42, %s4716_s23  ;;  %v6692_v31 = vld [vmem:[#allocation2 + $0xb2] sm:$0xff]  ;;  %v6696_v60 = vld [vmem:[#allocation2 + $0xaa] sm:$0xff]  ;;  %v6704_v50 = vld [vmem:[#allocation2 + $0xc2] sm:$0xff] }
 0x357   : > { %v6700_v5 = vld [vmem:[#allocation2 + $0xca] sm:$0xff]  ;;  %v6708_v30 = vld [vmem:[#allocation2 + $0xe2] sm:$0xff]  ;;  %v6712_v15 = vld [vmem:[#allocation2 + $0xda] sm:$0xff] }
 0x358   : > { %v6716_v42 = vld [vmem:[#allocation2 + $0xfa] sm:$0xff] }
 0x359   : > { %v4566_v37 = vpop.f32.mrb[24].mxu0 }
 0x35a   : > { %vm2245_vm12 = vcmp.gt.f32.partialorder %v4566_v37, 0.0  ;;  %v2278_v41 = vmul.f32 %v4566_v37, %v6513_v27  ;;  %v2181_v2 = vpop.f32.mrb[25].mxu0 }
 0x35b   : > { %vm2244_vm13 = vcmp.gt.f32.partialorder %v2181_v2, 0.0  ;;  %v2277_v25 = vmul.f32 %v6513_v27, %v2181_v2 }
 0x35c   : > { %v2310_v43 = vsel %vm2245_vm12, %v4566_v37, %v2278_v41  ;;  %v2406_v53 = vld [vmem:[#allocation2 + $0x129] sm:$0xff]  ;;  %v6720_v37 = vld [vmem:[#allocation2 + $0xf2] sm:$0xff]  ;;  %v6724_v41 = vpop.permute.xlu1 %2671 }
 0x35d   : > { %2342 = vst.msk [vmem:[#allocation2 + $0x141] sm:$0xff] %vm234_vm0, %v2310_v43  ;;  %v2309_v48 = vsel %vm2244_vm13, %v2181_v2, %v2277_v25  ;;  %2719 = vrot.lane.b32.xlu1 %v2406_v53, %s4716_s23  ;;  %v2405_v0 = vld [vmem:[#allocation2 + $0x121] sm:$0xff]  ;;  %v6726_v2 = vpop.permute.xlu0 %2669  ;;  %v2436_v25 = vld [vmem:[#allocation2 + $0x112] sm:$0xff]  ;;  %v2435_v43 = vld [vmem:[#allocation2 + $0x10a] sm:$0xff] }
 0x35e   : > { %2341 = vst.msk [vmem:[#allocation2 + $0x139] sm:$0xff] %vm234_vm0, %v2309_v48  ;;  %2717 = vrot.lane.b32.xlu0 %v2405_v0, %s4716_s23  ;;  %v2438_v53 = vld [vmem:[#allocation2 + $0x12a] sm:$0xff]  ;;  %v2437_v0 = vld [vmem:[#allocation2 + $0x122] sm:$0xff] }
 0x361   : > { %v4569_v49 = vpop.f32.mrb[26].mxu0 }
 0x362   : > { %vm2247_vm14 = vcmp.gt.f32.partialorder %v4569_v49, 0.0  ;;  %v2280_v63 = vmul.f32 %v4569_v49, %v6513_v27  ;;  %v2191_v58 = vpop.f32.mrb[27].mxu0 }
 0x363   : > { %vm2246_vm15 = vcmp.gt.f32.partialorder %v2191_v58, 0.0  ;;  %v2279_v23 = vmul.f32 %v6513_v27, %v2191_v58 }
 0x364   : > { %v2312_v9 = vsel %vm2247_vm14, %v4569_v49, %v2280_v63  ;;  %v2408_v54 = vld [vmem:[#allocation2 + $0x141] sm:$0xff] }
 0x365   : > { %2344 = vst.msk [vmem:[#allocation2 + $0x159] sm:$0xff] %vm234_vm0, %v2312_v9  ;;  %v2311_v36 = vsel %vm2246_vm15, %v2191_v58, %v2279_v23  ;;  %2723 = vrot.lane.b32.xlu1 %v2408_v54, %s4716_s23  ;;  %v2407_v57 = vld [vmem:[#allocation2 + $0x139] sm:$0xff]  ;;  %v2440_v63 = vld [vmem:[#allocation2 + $0x142] sm:$0xff] }
 0x366   : > { %2343 = vst.msk [vmem:[#allocation2 + $0x151] sm:$0xff] %vm234_vm0, %v2311_v36  ;;  %2721 = vrot.lane.b32.xlu0 %v2407_v57, %s4716_s23  ;;  %v2439_v58 = vld [vmem:[#allocation2 + $0x13a] sm:$0xff] }
 0x369   : > { %v4572_v51 = vpop.f32.mrb[28].mxu0 }
 0x36a   : > { %vm2249_vm1 = vcmp.gt.f32.partialorder %v4572_v51, 0.0  ;;  %v2282_v22 = vmul.f32 %v4572_v51, %v6513_v27  ;;  %v2201_v7 = vpop.f32.mrb[29].mxu0 }
 0x36b   : > { %vm2248_vm2 = vcmp.gt.f32.partialorder %v2201_v7, 0.0  ;;  %v2281_v29 = vmul.f32 %v6513_v27, %v2201_v7 }
 0x36c   : > { %v2314_v46 = vsel %vm2249_vm1, %v4572_v51, %v2282_v22  ;;  %v2410_v39 = vld [vmem:[#allocation2 + $0x159] sm:$0xff] }
 0x36d   : > { %2346 = vst.msk [vmem:[#allocation2 + $0x171] sm:$0xff] %vm234_vm0, %v2314_v46  ;;  %v2313_v14 = vsel %vm2248_vm2, %v2201_v7, %v2281_v29  ;;  %2727 = vrot.lane.b32.xlu1 %v2410_v39, %s4716_s23  ;;  %v2409_v34 = vld [vmem:[#allocation2 + $0x151] sm:$0xff]  ;;  %v2442_v54 = vld [vmem:[#allocation2 + $0x15a] sm:$0xff] }
 0x36e   : > { %2345 = vst.msk [vmem:[#allocation2 + $0x169] sm:$0xff] %vm234_vm0, %v2313_v14  ;;  %2725 = vrot.lane.b32.xlu0 %v2409_v34, %s4716_s23  ;;  %v2441_v36 = vld [vmem:[#allocation2 + $0x152] sm:$0xff]  ;;  %v6750_v29 = vld [vmem:[#allocation2 + $0x20] sm:$0xff] }
 0x36f   : > { %v6752_v46 = vld [vmem:[#allocation2 + $0x18] sm:$0xff] }
 0x370   : > { %v6760_v14 = vld [vmem:[#allocation2 + $0x38] sm:$0xff] }
 0x371   : > { %v4575_v56 = vpop.f32.mrb[30].mxu0 }
 0x372   : > { %vm2251_vm12 = vcmp.gt.f32.partialorder %v4575_v56, 0.0  ;;  %v2284_v6 = vmul.f32 %v4575_v56, %v6513_v27  ;;  %v2211_v28 = vpop.f32.mrb[31].mxu0 }
 0x373   : > { %vm2250_vm13 = vcmp.gt.f32.partialorder %v2211_v28, 0.0  ;;  %v2283_v17 = vmul.f32 %v6513_v27, %v2211_v28  ;;  %v6648_v27 = vld [vmem:[#allocation2 + $0x1a] sm:$0xff] }
 0x374   : > { %v2316_v24 = vsel %vm2251_vm12, %v4575_v56, %v2284_v6  ;;  %v2412_v10 = vld [vmem:[#allocation2 + $0x171] sm:$0xff] }
 0x375   : > { %2348 = vst.msk [vmem:[#allocation2 + $0x189] sm:$0xff] %vm234_vm0, %v2316_v24  ;;  %v2315_v26 = vsel %vm2250_vm13, %v2211_v28, %v2283_v17  ;;  %2731 = vrot.lane.b32.xlu1 %v2412_v10, %s4716_s23  ;;  %v2411_v11 = vld [vmem:[#allocation2 + $0x169] sm:$0xff]  ;;  %v2444_v57 = vld [vmem:[#allocation2 + $0x172] sm:$0xff] }
 0x376   : > { %2347 = vst.msk [vmem:[#allocation2 + $0x181] sm:$0xff] %vm234_vm0, %v2315_v26  ;;  %2729 = vrot.lane.b32.xlu0 %v2411_v11, %s4716_s23  ;;  %v2443_v22 = vld [vmem:[#allocation2 + $0x16a] sm:$0xff] }
 0x377   : > { %v6764_v56 = vld [vmem:[#allocation2 + $0x30] sm:$0xff]  ;;  %v6776_v24 = vld [vmem:[#allocation2 + $0x48] sm:$0xff] }
 0x378   : > { %v6772_v28 = vld [vmem:[#allocation2 + $0x50] sm:$0xff]  ;;  %v6784_v26 = vld [vmem:[#allocation2 + $0x68] sm:$0xff] }
 0x379   : > { %2799 = vrot.lane.b32.xlu1 %v2414_v4, %s4717_s24  ;;  %v6788_v4 = vld [vmem:[#allocation2 + $0x60] sm:$0xff] }
 0x37a   : > { %2797 = vrot.lane.b32.xlu0 %v2413_v20, %s4717_s24 }
 0x37d   : > { %2803 = vrot.lane.b32.xlu1 %v6644_v8, %s4717_s24 }
 0x37e   : > { %2801 = vrot.lane.b32.xlu0 %v6648_v27, %s4717_s24 }
 0x381   : > { %2807 = vrot.lane.b32.xlu1 %v6652_v55, %s4717_s24 }
 0x382   : > { %2805 = vrot.lane.b32.xlu0 %v6656_v16, %s4717_s24 }
 0x383   : > { %v6730_v48 = vpop.permute.xlu1 %2675 }
 0x384   : > { %v6733_v49 = vpop.permute.xlu0 %2673 }
 0x385   : > { %2811 = vrot.lane.b32.xlu1 %v6660_v12, %s4717_s24 }
 0x386   : > { %2809 = vrot.lane.b32.xlu0 %v6664_v19, %s4717_s24 }
 0x387   : > { %v6738_v23 = vpop.permute.xlu1 %2679 }
 0x388   : > { %v6740_v9 = vpop.permute.xlu0 %2677 }
 0x389   : > { %2815 = vrot.lane.b32.xlu1 %v6668_v40, %s4717_s24 }
 0x38a   : > { %2813 = vrot.lane.b32.xlu0 %v6672_v3, %s4717_s24 }
 0x38b   : > { %v6744_v51 = vpop.permute.xlu1 %2683 }
 0x38c   : > { %8232 = vst [vmem:[#allocation36_spill] sm:$0xff] %v6744_v51  ;;  %v6747_v7 = vpop.permute.xlu0 %2681  ;;  %v6872_v51 = vld [vmem:[#allocation2 + $0x108] sm:$0xff] }
 0x38d   : > { %2819 = vrot.lane.b32.xlu1 %v6676_v33, %s4717_s24  ;;  %8233 = vst [vmem:[#allocation94_spill] sm:$0xff] %v6747_v7  ;;  %8261 = vst [vmem:[#allocation38_spill] sm:$0xff] %v6872_v51  ;;  %v6882_v7 = vld [vmem:[#allocation2 + $0x120] sm:$0xff] }
 0x38e   : > { %2817 = vrot.lane.b32.xlu0 %v6680_v59, %s4717_s24  ;;  %8264 = vst [vmem:[#allocation162_spill] sm:$0xff] %v6882_v7 }
 0x38f   : > { %v6758_v39 = vpop.permute.xlu1 %2687 }
 0x390   : > { %8234 = vst [vmem:[#allocation37_spill] sm:$0xff] %v6758_v39  ;;  %v6762_v34 = vpop.permute.xlu0 %2685  ;;  %v6860_v39 = vld [vmem:[#allocation2 + $0xf0] sm:$0xff] }
 0x391   : > { %2823 = vrot.lane.b32.xlu1 %v6684_v21, %s4717_s24  ;;  %8235 = vst [vmem:[#allocation39_spill] sm:$0xff] %v6762_v34 }
 0x392   : > { %2821 = vrot.lane.b32.xlu0 %v6688_v38, %s4717_s24 }
 0x395   : > { %2827 = vrot.lane.b32.xlu1 %v6692_v31, %s4717_s24 }
 0x396   : > { %2825 = vrot.lane.b32.xlu0 %v6696_v60, %s4717_s24 }
 0x397   : > { %v6770_v6 = vpop.permute.xlu1 %2691 }
 0x398   : > { %8236 = vst [vmem:[#allocation99_spill] sm:$0xff] %v6770_v6  ;;  %v6774_v17 = vpop.permute.xlu0 %2689  ;;  %v6848_v6 = vld [vmem:[#allocation2 + $0xd8] sm:$0xff] }
 0x399   : > { %2831 = vrot.lane.b32.xlu1 %v6700_v5, %s4717_s24  ;;  %8237 = vst [vmem:[#allocation98_spill] sm:$0xff] %v6774_v17 }
 0x39a   : > { %2829 = vrot.lane.b32.xlu0 %v6704_v50, %s4717_s24 }
 0x39d   : > { %2835 = vrot.lane.b32.xlu1 %v6708_v30, %s4717_s24 }
 0x39e   : > { %2833 = vrot.lane.b32.xlu0 %v6712_v15, %s4717_s24 }
 0x39f   : > { %v6782_v10 = vpop.permute.xlu1 %2695 }
 0x3a0   : > { %8238 = vst [vmem:[#allocation43_spill] sm:$0xff] %v6782_v10  ;;  %v6786_v11 = vpop.permute.xlu0 %2693  ;;  %v6836_v10 = vld [vmem:[#allocation2 + $0xc0] sm:$0xff] }
 0x3a1   : > { %2839 = vrot.lane.b32.xlu1 %v6716_v42, %s4717_s24  ;;  %8239 = vst [vmem:[#allocation41_spill] sm:$0xff] %v6786_v11  ;;  %8253 = vst [vmem:[#allocation56_spill] sm:$0xff] %v6836_v10 }
 0x3a2   : > { %2837 = vrot.lane.b32.xlu0 %v6720_v37, %s4717_s24 }
 0x3a5   : > { %2843 = vrot.lane.b32.xlu1 %v2436_v25, %s4717_s24  ;;  %v6796_v25 = vld [vmem:[#allocation2 + $0x80] sm:$0xff] }
 0x3a6   : > { %2841 = vrot.lane.b32.xlu0 %v2435_v43, %s4717_s24  ;;  %8241 = vst [vmem:[#allocation101_spill] sm:$0xff] %v6796_v25 }
 0x3a7   : > { %v6794_v20 = vpop.permute.xlu1 %2699 }
 0x3a8   : > { %8240 = vst [vmem:[#allocation102_spill] sm:$0xff] %v6794_v20  ;;  %v6798_v43 = vpop.permute.xlu0 %2697  ;;  %v6824_v20 = vld [vmem:[#allocation2 + $0xa8] sm:$0xff] }
 0x3a9   : > { %2847 = vrot.lane.b32.xlu1 %v2438_v53, %s4717_s24  ;;  %8242 = vst [vmem:[#allocation46_spill] sm:$0xff] %v6798_v43  ;;  %v6800_v53 = vld [vmem:[#allocation2 + $0x78] sm:$0xff]  ;;  %8250 = vst [vmem:[#allocation50_spill] sm:$0xff] %v6824_v20 }
 0x3aa   : > { %2845 = vrot.lane.b32.xlu0 %v2437_v0, %s4717_s24 }
 0x3ad   : > { %2851 = vrot.lane.b32.xlu1 %v2440_v63, %s4717_s24  ;;  %v6808_v63 = vld [vmem:[#allocation2 + $0x98] sm:$0xff] }
 0x3ae   : > { %2849 = vrot.lane.b32.xlu0 %v2439_v58, %s4717_s24  ;;  %8244 = vst [vmem:[#allocation104_spill] sm:$0xff] %v6808_v63 }
 0x3af   : > { %v6806_v0 = vpop.permute.xlu1 %2703 }
 0x3b0   : > { %8243 = vst [vmem:[#allocation44_spill] sm:$0xff] %v6806_v0  ;;  %v6810_v58 = vpop.permute.xlu0 %2701 }
 0x3b1   : > { %2855 = vrot.lane.b32.xlu1 %v2442_v54, %s4717_s24  ;;  %8245 = vst [vmem:[#allocation103_spill] sm:$0xff] %v6810_v58  ;;  %v6812_v54 = vld [vmem:[#allocation2 + $0x90] sm:$0xff]  ;;  %v6832_v58 = vld [vmem:[#allocation2 + $0xc8] sm:$0xff] }
 0x3b2   : > { %2853 = vrot.lane.b32.xlu0 %v2441_v36, %s4717_s24  ;;  %8246 = vst [vmem:[#allocation49_spill] sm:$0xff] %v6812_v54 }
 0x3b5   : > { %2859 = vrot.lane.b32.xlu1 %v2444_v57, %s4717_s24  ;;  %v6820_v57 = vld [vmem:[#allocation2 + $0xb0] sm:$0xff] }
 0x3b6   : > { %2857 = vrot.lane.b32.xlu0 %v2443_v22, %s4717_s24  ;;  %8248 = vst [vmem:[#allocation105_spill] sm:$0xff] %v6820_v57 }
 0x3b7   : > { %v6818_v36 = vpop.permute.xlu1 %2707 }
 0x3b8   : > { %8247 = vst [vmem:[#allocation47_spill] sm:$0xff] %v6818_v36  ;;  %v6822_v22 = vpop.permute.xlu0 %2705 }
 0x3b9   : > { %2927 = vrot.lane.b32.xlu1 %v6750_v29, %s4718_s25  ;;  %8249 = vst [vmem:[#allocation52_spill] sm:$0xff] %v6822_v22  ;;  %v6844_v22 = vld [vmem:[#allocation2 + $0xe0] sm:$0xff] }
 0x3ba   : > { %2925 = vrot.lane.b32.xlu0 %v6752_v46, %s4718_s25 }
 0x3bd   : > { %2931 = vrot.lane.b32.xlu1 %v6760_v14, %s4718_s25 }
 0x3be   : > { %2929 = vrot.lane.b32.xlu0 %v6764_v56, %s4718_s25 }
 0x3bf   : > { %v6830_v0 = vpop.permute.xlu1 %2711 }
 0x3c0   : > { %8251 = vst [vmem:[#allocation83_spill] sm:$0xff] %v6830_v0  ;;  %v6834_v43 = vpop.permute.xlu0 %2709 }
 0x3c1   : > { %2935 = vrot.lane.b32.xlu1 %v6772_v28, %s4718_s25  ;;  %8252 = vst [vmem:[#allocation161_spill] sm:$0xff] %v6834_v43  ;;  %v6856_v43 = vld [vmem:[#allocation2 + $0xf8] sm:$0xff] }
 0x3c2   : > { %2933 = vrot.lane.b32.xlu0 %v6776_v24, %s4718_s25 }
 0x3c5   : > { %2939 = vrot.lane.b32.xlu1 %v6784_v26, %s4718_s25 }
 0x3c6   : > { %2937 = vrot.lane.b32.xlu0 %v6788_v4, %s4718_s25 }
 0x3c7   : > { %v6842_v36 = vpop.permute.xlu1 %2715 }
 0x3c8   : > { %8254 = vst [vmem:[#allocation107_spill] sm:$0xff] %v6842_v36  ;;  %v6846_v11 = vpop.permute.xlu0 %2713 }
 0x3c9   : > { %2943 = vrot.lane.b32.xlu1 %v6796_v25, %s4718_s25  ;;  %8255 = vst [vmem:[#allocation54_spill] sm:$0xff] %v6846_v11  ;;  %v6868_v11 = vld [vmem:[#allocation2 + $0x110] sm:$0xff] }
 0x3ca   : > { %2941 = vrot.lane.b32.xlu0 %v6800_v53, %s4718_s25  ;;  %8259 = vst [vmem:[#allocation127_spill] sm:$0xff] %v6868_v11 }
 0x3cd   : > { %2947 = vrot.lane.b32.xlu1 %v6808_v63, %s4718_s25 }
 0x3ce   : > { %2945 = vrot.lane.b32.xlu0 %v6812_v54, %s4718_s25 }
 0x3cf   : > { %v6854_v0 = vpop.permute.xlu1 %2719 }
 0x3d0   : > { %8256 = vst [vmem:[#allocation128_spill] sm:$0xff] %v6854_v0  ;;  %v6858_v17 = vpop.permute.xlu0 %2717 }
 0x3d1   : > { %2951 = vrot.lane.b32.xlu1 %v6820_v57, %s4718_s25  ;;  %8257 = vst [vmem:[#allocation106_spill] sm:$0xff] %v6858_v17 }
 0x3d2   : > { %2949 = vrot.lane.b32.xlu0 %v6824_v20, %s4718_s25 }
 0x3d5   : > { %2955 = vrot.lane.b32.xlu1 %v6832_v58, %s4718_s25 }
 0x3d6   : > { %2953 = vrot.lane.b32.xlu0 %v6836_v10, %s4718_s25 }
 0x3d7   : > { %v6866_v36 = vpop.permute.xlu1 %2723 }
 0x3d8   : > { %8258 = vst [vmem:[#allocation40_spill] sm:$0xff] %v6866_v36  ;;  %v6870_v34 = vpop.permute.xlu0 %2721  ;;  %v3917_v36 = vld [vmem:[%s7771_s2] sm:$0xff] }
 0x3d9   : > { %2959 = vrot.lane.b32.xlu1 %v6844_v22, %s4718_s25  ;;  %8260 = vst [vmem:[#allocation87_spill] sm:$0xff] %v6870_v34  ;;  %v3918_v34 = vld [vmem:[%s7771_s2 + $0x8] sm:$0xff] }
 0x3da   : > { %2957 = vrot.lane.b32.xlu0 %v6848_v6, %s4718_s25 }
 0x3dd   : > { %2963 = vrot.lane.b32.xlu1 %v6856_v43, %s4718_s25 }
 0x3de   : > { %2961 = vrot.lane.b32.xlu0 %v6860_v39, %s4718_s25 }
 0x3df   : > { %v6878_v0 = vpop.permute.xlu1 %2727 }
 0x3e0   : > { %8262 = vst [vmem:[#allocation163_spill] sm:$0xff] %v6878_v0  ;;  %v6880_v17 = vpop.permute.xlu0 %2725 }
 0x3e1   : > { %2967 = vrot.lane.b32.xlu1 %v6868_v11, %s4718_s25  ;;  %8263 = vst [vmem:[#allocation85_spill] sm:$0xff] %v6880_v17  ;;  %v4642_v11 = vpack.c.bf16 %v3918_v34, %v3917_v36 }
 0x3e2   : > { %2965 = vrot.lane.b32.xlu0 %v6872_v51, %s4718_s25  ;;  %v3920_v51 = vld [vmem:[%s7771_s2 + $0x18] sm:$0xff] }
 0x3e3   : > { %4643 = vmatprep.subr.bf16.mxu1 %v4642_v11 }
 0x3e4   : > { %4645 = vmatpush3.bf16.msra.mxu1 %v4642_v11 }
 0x3e5   : > { %3053 = vrot.lane.b32.xlu1 %v6530_v52, %s4719_s26  ;;  %v3919_v52 = vld [vmem:[%s7771_s2 + $0x10] sm:$0xff] }
 0x3e6   : > { %2969 = vrot.lane.b32.xlu0 %v6882_v7, %s4718_s25  ;;  %v4646_v34 = vpack.c.bf16 %v3920_v51, %v3919_v52 }
 0x3e7   : > { %v6894_v0 = vpop.permute.xlu1 %2731 }
 0x3e8   : > { %8265 = vst [vmem:[#allocation60_spill] sm:$0xff] %v6894_v0  ;;  %v6896_v17 = vpop.permute.xlu0 %2729  ;;  %4647 = vmatprep.subr.bf16.mxu1 %v4646_v34 }
 0x3e9   : > { %8266 = vst [vmem:[#allocation109_spill] sm:$0xff] %v6896_v17  ;;  %3181 = vrot.lane.b32.xlu1 %v6648_v27, %s4720_s27  ;;  %4649 = vmatpush3.bf16.msra.mxu1 %v4646_v34  ;;  %v3921_v27 = vld [vmem:[%s7771_s2 + $0x20] sm:$0xf] }
 0x3ea   : > { %3055 = vrot.lane.b32.xlu0 %v6525_v44, %s4719_s26  ;;  %4584 = vmatprep.subr.msk.mxu1 %vm1991_vm3, %v3921_v27 }
 0x3eb   : > { %v6908_v36 = vpop.permute.xlu1 %2799 }
 0x3ec   : > { %v6910_v0 = vpop.permute.xlu0 %2797 }
 0x3ed   : > { %3309 = vrot.lane.b32.xlu1 %v6764_v56, %s4721_s28  ;;  %4585 = vmatpush3.msk.msra.mxu1 %vm1991_vm3, %v3921_v27 }
 0x3ee   : > { %3183 = vrot.lane.b32.xlu0 %v6644_v8, %s4720_s27 }
 0x3ef   : > { %v6919_v11 = vpop.permute.xlu1 %2803 }
 0x3f0   : > { %v6922_v44 = vpop.permute.xlu0 %2801 }
 0x3f1   : > { %3437 = vrot.lane.b32.xlu1 %v6542_v62, %s4722_s7 }
 0x3f2   : > { %3311 = vrot.lane.b32.xlu0 %v6760_v14, %s4721_s28 }
 0x3f3   : > { %v6929_v51 = vpop.permute.xlu1 %2807 }
 0x3f4   : > { %v6931_v8 = vpop.permute.xlu0 %2805 }
 0x3f5   : > { %3439 = vrot.lane.b32.xlu1 %v6537_v18, %s4722_s7 }
 0x3f6   : > { %3057 = vrot.lane.b32.xlu0 %v6542_v62, %s4719_s26 }
 0x3f7   : > { %v6937_v52 = vpop.permute.xlu1 %2811 }
 0x3f8   : > { %v6939_v34 = vpop.permute.xlu0 %2809 }
 0x3f9   : > { %3059 = vrot.lane.b32.xlu1 %v6537_v18, %s4719_s26 }
 0x3fa   : > { %3565 = vrot.lane.b32.xlu0 %v6656_v16, %s4723_s14 }
 0x3fb   : > { %v6945_v27 = vpop.permute.xlu1 %2815 }
 0x3fc   : > { %8267 = vst [vmem:[#allocation58_spill] sm:$0xff] %v6945_v27  ;;  %v6947_v17 = vpop.permute.xlu0 %2813 }
 0x3fd   : > { %3567 = vrot.lane.b32.xlu1 %v6652_v55, %s4723_s14 }
 0x3fe   : > { %3185 = vrot.lane.b32.xlu0 %v6656_v16, %s4720_s27 }
 0x3ff   : > { %v6953_v62 = vpop.permute.xlu1 %2819 }
 0x400   : > { %8268 = vst [vmem:[#allocation130_spill] sm:$0xff] %v6953_v62  ;;  %v6955_v7 = vpop.permute.xlu0 %2817 }
 0x401   : > { %3313 = vrot.lane.b32.xlu1 %v6776_v24, %s4721_s28 }
 0x402   : > { %3187 = vrot.lane.b32.xlu0 %v6652_v55, %s4720_s27 }
 0x403   : > { %v6961_v18 = vpop.permute.xlu1 %2823 }
 0x404   : > { %8269 = vst [vmem:[#allocation108_spill] sm:$0xff] %v6961_v18  ;;  %v6963_v27 = vpop.permute.xlu0 %2821 }
 0x405   : > { %8270 = vst [vmem:[#allocation45_spill] sm:$0xff] %v6963_v27  ;;  %3441 = vrot.lane.b32.xlu1 %v6551_v61, %s4722_s7 }
 0x406   : > { %3315 = vrot.lane.b32.xlu0 %v6772_v28, %s4721_s28 }
 0x407   : > { %v6969_v16 = vpop.permute.xlu1 %2827 }
 0x408   : > { %8271 = vst [vmem:[#allocation129_spill] sm:$0xff] %v6969_v16  ;;  %v6971_v62 = vpop.permute.xlu0 %2825 }
 0x409   : > { %8272 = vst [vmem:[#allocation91_spill] sm:$0xff] %v6971_v62  ;;  %3443 = vrot.lane.b32.xlu1 %v6547_v45, %s4722_s7  ;;  %v2487_v62 = vld [vmem:[#allocation2 + $0x91] sm:$0xff] }
 0x40a   : > { %3061 = vrot.lane.b32.xlu0 %v6551_v61, %s4719_s26 }
 0x40b   : > { %v6977_v55 = vpop.permute.xlu1 %2831 }
 0x40c   : > { %8273 = vst [vmem:[#allocation42_spill] sm:$0xff] %v6977_v55  ;;  %v6979_v18 = vpop.permute.xlu0 %2829 }
 0x40d   : > { %8274 = vst [vmem:[#allocation165_spill] sm:$0xff] %v6979_v18  ;;  %3063 = vrot.lane.b32.xlu1 %v6547_v45, %s4719_s26  ;;  %v2582_v18 = vld [vmem:[#allocation2 + $0x99] sm:$0xff] }
 0x40e   : > { %3569 = vrot.lane.b32.xlu0 %v6664_v19, %s4723_s14 }
 0x40f   : > { %v6985_v27 = vpop.permute.xlu1 %2835 }
 0x410   : > { %8275 = vst [vmem:[#allocation89_spill] sm:$0xff] %v6985_v27  ;;  %v6987_v16 = vpop.permute.xlu0 %2833 }
 0x411   : > { %8276 = vst [vmem:[#allocation164_spill] sm:$0xff] %v6987_v16  ;;  %3571 = vrot.lane.b32.xlu1 %v6660_v12, %s4723_s14 }
 0x412   : > { %3189 = vrot.lane.b32.xlu0 %v6664_v19, %s4720_s27 }
 0x413   : > { %v6993_v61 = vpop.permute.xlu1 %2839 }
 0x414   : > { %8277 = vst [vmem:[#allocation64_spill] sm:$0xff] %v6993_v61  ;;  %v6995_v55 = vpop.permute.xlu0 %2837 }
 0x415   : > { %8278 = vst [vmem:[#allocation111_spill] sm:$0xff] %v6995_v55  ;;  %3317 = vrot.lane.b32.xlu1 %v6788_v4, %s4721_s28 }
 0x416   : > { %3191 = vrot.lane.b32.xlu0 %v6660_v12, %s4720_s27 }
 0x417   : > { %v7001_v45 = vpop.permute.xlu1 %2843 }
 0x418   : > { %8279 = vst [vmem:[#allocation62_spill] sm:$0xff] %v7001_v45  ;;  %v7003_v27 = vpop.permute.xlu0 %2841 }
 0x419   : > { %8280 = vst [vmem:[#allocation132_spill] sm:$0xff] %v7003_v27  ;;  %3445 = vrot.lane.b32.xlu1 %v6562_v13, %s4722_s7 }
 0x41a   : > { %3319 = vrot.lane.b32.xlu0 %v6784_v26, %s4721_s28 }
 0x41b   : > { %v7009_v19 = vpop.permute.xlu1 %2847 }
 0x41c   : > { %8281 = vst [vmem:[#allocation110_spill] sm:$0xff] %v7009_v19  ;;  %v7011_v61 = vpop.permute.xlu0 %2845 }
 0x41d   : > { %8282 = vst [vmem:[#allocation51_spill] sm:$0xff] %v7011_v61  ;;  %3447 = vrot.lane.b32.xlu1 %v6557_v35, %s4722_s7 }
 0x41e   : > { %3065 = vrot.lane.b32.xlu0 %v6562_v13, %s4719_s26 }
 0x41f   : > { %v7017_v12 = vpop.permute.xlu1 %2851 }
 0x420   : > { %8283 = vst [vmem:[#allocation131_spill] sm:$0xff] %v7017_v12  ;;  %v7019_v45 = vpop.permute.xlu0 %2849 }
 0x421   : > { %8284 = vst [vmem:[#allocation95_spill] sm:$0xff] %v7019_v45  ;;  %3067 = vrot.lane.b32.xlu1 %v6557_v35, %s4719_s26 }
 0x422   : > { %3573 = vrot.lane.b32.xlu0 %v6672_v3, %s4723_s14 }
 0x423   : > { %v7025_v27 = vpop.permute.xlu1 %2855 }
 0x424   : > { %8285 = vst [vmem:[#allocation48_spill] sm:$0xff] %v7025_v27  ;;  %v7027_v19 = vpop.permute.xlu0 %2853 }
 0x425   : > { %8286 = vst [vmem:[#allocation167_spill] sm:$0xff] %v7027_v19  ;;  %3575 = vrot.lane.b32.xlu1 %v6668_v40, %s4723_s14 }
 0x426   : > { %3193 = vrot.lane.b32.xlu0 %v6672_v3, %s4720_s27 }
 0x427   : > { %v7033_v13 = vpop.permute.xlu1 %2859 }
 0x428   : > { %8287 = vst [vmem:[#allocation93_spill] sm:$0xff] %v7033_v13  ;;  %v7035_v12 = vpop.permute.xlu0 %2857 }
 0x429   : > { %8288 = vst [vmem:[#allocation166_spill] sm:$0xff] %v7035_v12  ;;  %3321 = vrot.lane.b32.xlu1 %v6800_v53, %s4721_s28 }
 0x42a   : > { %3195 = vrot.lane.b32.xlu0 %v6668_v40, %s4720_s27 }
 0x42b   : > { %v7041_v35 = vpop.permute.xlu1 %2927 }
 0x42c   : > { %v7043_v27 = vpop.permute.xlu0 %2925 }
 0x42d   : > { %3449 = vrot.lane.b32.xlu1 %v6574_v32, %s4722_s7 }
 0x42e   : > { %3323 = vrot.lane.b32.xlu0 %v6796_v25, %s4721_s28  ;;  %v2585_v25 = vld [vmem:[#allocation2 + $0xc1] sm:$0xff] }
 0x42f   : > { %v7049_v3 = vpop.permute.xlu1 %2931 }
 0x430   : > { %v7051_v13 = vpop.permute.xlu0 %2929 }
 0x431   : > { %3451 = vrot.lane.b32.xlu1 %v6569_v1, %s4722_s7 }
 0x432   : > { %3069 = vrot.lane.b32.xlu0 %v6574_v32, %s4719_s26 }
 0x433   : > { %v7057_v40 = vpop.permute.xlu1 %2935 }
 0x434   : > { %v7059_v12 = vpop.permute.xlu0 %2933 }
 0x435   : > { %3071 = vrot.lane.b32.xlu1 %v6569_v1, %s4719_s26 }
 0x436   : > { %3577 = vrot.lane.b32.xlu0 %v6680_v59, %s4723_s14 }
 0x437   : > { %v7065_v19 = vpop.permute.xlu1 %2939 }
 0x438   : > { %v7067_v45 = vpop.permute.xlu0 %2937 }
 0x439   : > { %3579 = vrot.lane.b32.xlu1 %v6676_v33, %s4723_s14 }
 0x43a   : > { %3197 = vrot.lane.b32.xlu0 %v6680_v59, %s4720_s27 }
 0x43b   : > { %v7073_v32 = vpop.permute.xlu1 %2943 }
 0x43c   : > { %v7075_v61 = vpop.permute.xlu0 %2941 }
 0x43d   : > { %3325 = vrot.lane.b32.xlu1 %v6812_v54, %s4721_s28 }
 0x43e   : > { %3199 = vrot.lane.b32.xlu0 %v6676_v33, %s4720_s27 }
 0x43f   : > { %v7081_v1 = vpop.permute.xlu1 %2947 }
 0x440   : > { %8289 = vst [vmem:[#allocation68_spill] sm:$0xff] %v7081_v1  ;;  %v7083_v55 = vpop.permute.xlu0 %2945 }
 0x441   : > { %8290 = vst [vmem:[#allocation113_spill] sm:$0xff] %v7083_v55  ;;  %3453 = vrot.lane.b32.xlu1 %v6583_v47, %s4722_s7 }
 0x442   : > { %3327 = vrot.lane.b32.xlu0 %v6808_v63, %s4721_s28 }
 0x443   : > { %v7089_v59 = vpop.permute.xlu1 %2951 }
 0x444   : > { %8291 = vst [vmem:[#allocation66_spill] sm:$0xff] %v7089_v59  ;;  %v7091_v16 = vpop.permute.xlu0 %2949 }
 0x445   : > { %8292 = vst [vmem:[#allocation134_spill] sm:$0xff] %v7091_v16  ;;  %3455 = vrot.lane.b32.xlu1 %v2582_v18, %s4722_s7 }
 0x446   : > { %3073 = vrot.lane.b32.xlu0 %v2487_v62, %s4719_s26 }
 0x447   : > { %v7095_v33 = vpop.permute.xlu1 %2955 }
 0x448   : > { %8293 = vst [vmem:[#allocation112_spill] sm:$0xff] %v7095_v33  ;;  %v7097_v54 = vpop.permute.xlu0 %2953 }
 0x449   : > { %8294 = vst [vmem:[#allocation55_spill] sm:$0xff] %v7097_v54  ;;  %3075 = vrot.lane.b32.xlu1 %v2582_v18, %s4719_s26 }
 0x44a   : > { %3581 = vrot.lane.b32.xlu0 %v6688_v38, %s4723_s14 }
 0x44b   : > { %v7102_v47 = vpop.permute.xlu1 %2959 }
 0x44c   : > { %8295 = vst [vmem:[#allocation133_spill] sm:$0xff] %v7102_v47  ;;  %v7104_v59 = vpop.permute.xlu0 %2957 }
 0x44d   : > { %8296 = vst [vmem:[#allocation100_spill] sm:$0xff] %v7104_v59  ;;  %3583 = vrot.lane.b32.xlu1 %v6684_v21, %s4723_s14  ;;  %v2583_v59 = vld [vmem:[#allocation2 + $0xa9] sm:$0xff] }
 0x44e   : > { %3201 = vrot.lane.b32.xlu0 %v6688_v38, %s4720_s27 }
 0x44f   : > { %v7110_v62 = vpop.permute.xlu1 %2963 }
 0x450   : > { %8297 = vst [vmem:[#allocation53_spill] sm:$0xff] %v7110_v62  ;;  %v7112_v33 = vpop.permute.xlu0 %2961 }
 0x451   : > { %8298 = vst [vmem:[#allocation169_spill] sm:$0xff] %v7112_v33  ;;  %3329 = vrot.lane.b32.xlu1 %v6824_v20, %s4721_s28  ;;  %v2584_v33 = vld [vmem:[#allocation2 + $0xb1] sm:$0xff] }
 0x452   : > { %3203 = vrot.lane.b32.xlu0 %v6684_v21, %s4720_s27 }
 0x453   : > { %v7118_v18 = vpop.permute.xlu1 %2967 }
 0x454   : > { %8299 = vst [vmem:[#allocation97_spill] sm:$0xff] %v7118_v18  ;;  %v7120_v47 = vpop.permute.xlu0 %2965 }
 0x455   : > { %8300 = vst [vmem:[#allocation168_spill] sm:$0xff] %v7120_v47  ;;  %3457 = vrot.lane.b32.xlu1 %v2583_v59, %s4722_s7 }
 0x456   : > { %3331 = vrot.lane.b32.xlu0 %v6820_v57, %s4721_s28 }
 0x457   : > { %v3054_v38 = vpop.permute.xlu1 %3053 }
 0x458   : > { %v7125_v62 = vpop.permute.xlu0 %2969 }
 0x459   : > { %8301 = vst [vmem:[#allocation72_spill] sm:$0xff] %v7125_v62  ;;  %3459 = vrot.lane.b32.xlu1 %v2584_v33, %s4722_s7  ;;  %v2349_v62 = vld [vmem:[#allocation2] sm:$0xff] }
 0x45a   : > { %3077 = vrot.lane.b32.xlu0 %v2583_v59, %s4719_s26  ;;  %v2350_v59 = vld [vmem:[#allocation2 + $0x8] sm:$0xff] }
 0x45b   : > { %v3182_v54 = vpop.permute.xlu1 %3181  ;;  %v3662_v55 = vsel %vm234_vm0, %v2350_v59, %v6724_v41  ;;  %v2586_v59 = vld [vmem:[#allocation2 + $0xc9] sm:$0xff] }
 0x45c   : > { %v3056_v21 = vpop.permute.xlu0 %3055 }
 0x45d   : > { %3079 = vrot.lane.b32.xlu1 %v2584_v33, %s4719_s26  ;;  %v3661_v33 = vsel %vm234_vm0, %v2349_v62, %v6726_v2  ;;  %v3694_v2 = vsel %vm1658_vm4, %v3662_v55, %v6908_v36 }
 0x45e   : > { %3585 = vrot.lane.b32.xlu0 %v6696_v60, %s4723_s14  ;;  %v3693_v63 = vsel %vm1658_vm4, %v3661_v33, %v6910_v0  ;;  %v3726_v0 = vsel %vm1691_vm5, %v3694_v2, %v7041_v35  ;;  %v2587_v2 = vld [vmem:[#allocation2 + $0xd9] sm:$0xff] }
 0x45f   : > { %v3310_v18 = vpop.permute.xlu1 %3309  ;;  %v3758_v41 = vsel %vm1724_vm6, %v3726_v0, %v3056_v21  ;;  %v2588_v0 = vld [vmem:[#allocation2 + $0xe1] sm:$0xff] }
 0x460   : > { %v3184_v47 = vpop.permute.xlu0 %3183 }
 0x461   : > { %3587 = vrot.lane.b32.xlu1 %v6692_v31, %s4723_s14  ;;  %v3790_v33 = vsel %vm1757_vm7, %v3758_v41, %v3184_v47 }
 0x462   : > { %3205 = vrot.lane.b32.xlu0 %v6696_v60, %s4720_s27  ;;  %v3725_v60 = vsel %vm1691_vm5, %v3693_v63, %v7043_v27 }
 0x463   : > { %v3438_v57 = vpop.permute.xlu1 %3437 }
 0x464   : > { %v3312_v20 = vpop.permute.xlu0 %3311 }
 0x465   : > { %3333 = vrot.lane.b32.xlu1 %v6836_v10, %s4721_s28  ;;  %v3757_v10 = vsel %vm1724_vm6, %v3725_v60, %v3054_v38 }
 0x466   : > { %3207 = vrot.lane.b32.xlu0 %v6692_v31, %s4720_s27  ;;  %v3789_v31 = vsel %vm1757_vm7, %v3757_v10, %v3182_v54 }
 0x467   : > { %v3440_v16 = vpop.permute.xlu1 %3439  ;;  %v3821_v63 = vsel %vm1790_vm8, %v3789_v31, %v3310_v18 }
 0x468   : > { %v3058_v1 = vpop.permute.xlu0 %3057  ;;  %v3853_v62 = vsel %vm1823_vm9, %v3821_v63, %v3438_v57 }
 0x469   : > { %3461 = vrot.lane.b32.xlu1 %v2585_v25, %s4722_s7 }
 0x46a   : > { %3335 = vrot.lane.b32.xlu0 %v6832_v58, %s4721_s28  ;;  %v3822_v58 = vsel %vm1790_vm8, %v3790_v33, %v3312_v20 }
 0x46b   : > { %v3060_v27 = vpop.permute.xlu1 %3059  ;;  %v3854_v54 = vsel %vm1823_vm9, %v3822_v58, %v3440_v16  ;;  %v3663_v16 = vsel %vm234_vm0, %v6752_v46, %v6733_v49  ;;  %v3665_v58 = vsel %vm234_vm0, %v6764_v56, %v6740_v9 }
 0x46c   : > { %v3566_v38 = vpop.permute.xlu0 %3565  ;;  %v3695_v18 = vsel %vm1658_vm4, %v3663_v16, %v6922_v44 }
 0x46d   : > { %3463 = vrot.lane.b32.xlu1 %v2586_v59, %s4722_s7  ;;  %v3885_v10 = vsel %vm1856_vm10, %v3853_v62, %v3566_v38  ;;  %v3727_v60 = vsel %vm1691_vm5, %v3695_v18, %v7051_v13 }
 0x46e   : > { %3081 = vrot.lane.b32.xlu0 %v2585_v25, %s4719_s26  ;;  %4586 = vmatprep.mubr.msk.f32.mxu1 %vm1894_vm11, %v3885_v10  ;;  %v3759_v31 = vsel %vm1724_vm6, %v3727_v60, %v3058_v1 }
 0x46f   : > { %v3568_v36 = vpop.permute.xlu1 %3567 }
 0x470   : > { %v3886_v55 = vsel %vm1856_vm10, %v3854_v54, %v3568_v36  ;;  %v3186_v57 = vpop.permute.xlu0 %3185  ;;  %v3697_v54 = vsel %vm1658_vm4, %v3665_v58, %v6931_v8  ;;  %v2623_v58 = vld [vmem:[#allocation2 + $0x10a] sm:$0xff] }
 0x471   : > { %3083 = vrot.lane.b32.xlu1 %v2586_v59, %s4719_s26  ;;  %4587 = vmatmul.mubr.msk.f32.vlgmr.msra.gmra.mrb[0].mxu1 %vm1894_vm11, %v3886_v55  ;;  %v3791_v49 = vsel %vm1757_vm7, %v3759_v31, %v3186_v57  ;;  %v3729_v55 = vsel %vm1691_vm5, %v3697_v54, %v7059_v12  ;;  %v2589_v57 = vld [vmem:[#allocation2 + $0xf1] sm:$0xff]  ;;  %v8302_v31 = vld [vmem:[#allocation38_spill] sm:$0xff] }
 0x472   : > { %3589 = vrot.lane.b32.xlu0 %v6704_v50, %s4723_s14 }
 0x473   : > { %v3314_v35 = vpop.permute.xlu1 %3313 }
 0x474   : > { %v3188_v47 = vpop.permute.xlu0 %3187  ;;  %v3823_v44 = vsel %vm1790_vm8, %v3791_v49, %v3314_v35  ;;  %v8303_v49 = vld [vmem:[#allocation94_spill] sm:$0xff] }
 0x475   : > { %3591 = vrot.lane.b32.xlu1 %v6700_v5, %s4723_s14 }
 0x476   : > { %3209 = vrot.lane.b32.xlu0 %v6704_v50, %s4720_s27 }
 0x477   : > { %v3442_v20 = vpop.permute.xlu1 %3441 }
 0x478   : > { %v3316_v25 = vpop.permute.xlu0 %3315 }
 0x479   : > { %3337 = vrot.lane.b32.xlu1 %v6848_v6, %s4721_s28  ;;  %v3664_v6 = vsel %vm234_vm0, %v6750_v29, %v6730_v48  ;;  %v3855_v29 = vsel %vm1823_vm9, %v3823_v44, %v3442_v20  ;;  %v2590_v20 = vld [vmem:[#allocation2 + $0xf9] sm:$0xff] }
 0x47a   : > { %3211 = vrot.lane.b32.xlu0 %v6700_v5, %s4720_s27  ;;  %v3696_v5 = vsel %vm1658_vm4, %v3664_v6, %v6919_v11 }
 0x47b   : > { %v3444_v21 = vpop.permute.xlu1 %3443  ;;  %v3728_v46 = vsel %vm1691_vm5, %v3696_v5, %v7049_v3  ;;  %v2528_v5 = vld [vmem:[#allocation2 + $0xfa] sm:$0xff] }
 0x47c   : > { %v3062_v50 = vpop.permute.xlu0 %3061  ;;  %v3760_v48 = vsel %vm1724_vm6, %v3728_v46, %v3060_v27  ;;  %v3667_v46 = vsel %vm234_vm0, %v6776_v24, %v8303_v49  ;;  %v2594_v49 = vld [vmem:[#allocation2 + $0x129] sm:$0xff] }
 0x47d   : > { %3465 = vrot.lane.b32.xlu1 %v2587_v2, %s4722_s7  ;;  %v3792_v63 = vsel %vm1757_vm7, %v3760_v48, %v3188_v47  ;;  %v3761_v35 = vsel %vm1724_vm6, %v3729_v55, %v3062_v50  ;;  %v3699_v44 = vsel %vm1658_vm4, %v3667_v46, %v6939_v34  ;;  %v2591_v48 = vld [vmem:[#allocation2 + $0x109] sm:$0xff]  ;;  %v2624_v55 = vld [vmem:[#allocation2 + $0x112] sm:$0xff] }
 0x47e   : > { %3339 = vrot.lane.b32.xlu0 %v6844_v22, %s4721_s28  ;;  %v3824_v22 = vsel %vm1790_vm8, %v3792_v63, %v3316_v25  ;;  %v8305_v34 = vld [vmem:[#allocation127_spill] sm:$0xff] }
 0x47f   : > { %v3064_v13 = vpop.permute.xlu1 %3063  ;;  %v3856_v3 = vsel %vm1823_vm9, %v3824_v22, %v3444_v21 }
 0x480   : > { %v3570_v1 = vpop.permute.xlu0 %3569 }
 0x481   : > { %v3887_v11 = vsel %vm1856_vm10, %v3855_v29, %v3570_v1  ;;  %3467 = vrot.lane.b32.xlu1 %v2588_v0, %s4722_s7  ;;  %v8304_v29 = vld [vmem:[#allocation36_spill] sm:$0xff] }
 0x482   : > { %3085 = vrot.lane.b32.xlu0 %v2587_v2, %s4719_s26  ;;  %4589 = vmatprep.mubr.msk.f32.mxu1 %vm1894_vm11, %v3887_v11  ;;  %v3668_v1 = vsel %vm234_vm0, %v6772_v28, %v8304_v29 }
 0x483   : > { %v3572_v41 = vpop.permute.xlu1 %3571  ;;  %v3700_v24 = vsel %vm1658_vm4, %v3668_v1, %v6937_v52 }
 0x484   : > { %v3888_v27 = vsel %vm1856_vm10, %v3856_v3, %v3572_v41  ;;  %v3190_v62 = vpop.permute.xlu0 %3189 }
 0x485   : > { %3087 = vrot.lane.b32.xlu1 %v2588_v0, %s4719_s26  ;;  %4590 = vmatmul.mubr.msk.f32.gmra.mrb[2].mxu1 %vm1894_vm11, %v3888_v27  ;;  %v3793_v9 = vsel %vm1757_vm7, %v3761_v35, %v3190_v62  ;;  %v2592_v27 = vld [vmem:[#allocation2 + $0x111] sm:$0xff]  ;;  %v8307_v35 = vld [vmem:[#allocation39_spill] sm:$0xff] }
 0x486   : > { %3593 = vrot.lane.b32.xlu0 %v6712_v15, %s4723_s14 }
 0x487   : > { %v3318_v38 = vpop.permute.xlu1 %3317 }
 0x488   : > { %v3192_v59 = vpop.permute.xlu0 %3191  ;;  %v3825_v8 = vsel %vm1790_vm8, %v3793_v9, %v3318_v38 }
 0x489   : > { %3595 = vrot.lane.b32.xlu1 %v6708_v30, %s4723_s14 }
 0x48a   : > { %3213 = vrot.lane.b32.xlu0 %v6712_v15, %s4720_s27 }
 0x48b   : > { %v3446_v33 = vpop.permute.xlu1 %3445 }
 0x48c   : > { %v3320_v10 = vpop.permute.xlu0 %3319 }
 0x48d   : > { %3341 = vrot.lane.b32.xlu1 %v6860_v39, %s4721_s28  ;;  %v3666_v39 = vsel %vm234_vm0, %v6760_v14, %v6738_v23  ;;  %v3857_v14 = vsel %vm1823_vm9, %v3825_v8, %v3446_v33 }
 0x48e   : > { %3215 = vrot.lane.b32.xlu0 %v6708_v30, %s4720_s27  ;;  %v3698_v30 = vsel %vm1658_vm4, %v3666_v39, %v6929_v51  ;;  %v8306_v39 = vld [vmem:[#allocation162_spill] sm:$0xff] }
 0x48f   : > { %v3448_v36 = vpop.permute.xlu1 %3447  ;;  %v3730_v56 = vsel %vm1691_vm5, %v3698_v30, %v7057_v40  ;;  %v3669_v30 = vsel %vm234_vm0, %v6788_v4, %v8307_v35  ;;  %v8309_v4 = vld [vmem:[#allocation58_spill] sm:$0xff] }
 0x490   : > { %v3066_v15 = vpop.permute.xlu0 %3065  ;;  %v3762_v23 = vsel %vm1724_vm6, %v3730_v56, %v3064_v13  ;;  %v3701_v9 = vsel %vm1658_vm4, %v3669_v30, %v6947_v17 }
 0x491   : > { %3469 = vrot.lane.b32.xlu1 %v2589_v57, %s4722_s7  ;;  %v3794_v25 = vsel %vm1757_vm7, %v3762_v23, %v3192_v59  ;;  %v3733_v8 = vsel %vm1691_vm5, %v3701_v9, %v7075_v61  ;;  %v2593_v23 = vld [vmem:[#allocation2 + $0x121] sm:$0xff] }
 0x492   : > { %3343 = vrot.lane.b32.xlu0 %v6856_v43, %s4721_s28  ;;  %v3826_v43 = vsel %vm1790_vm8, %v3794_v25, %v3320_v10 }
 0x493   : > { %v3068_v12 = vpop.permute.xlu1 %3067  ;;  %v3858_v40 = vsel %vm1823_vm9, %v3826_v43, %v3448_v36 }
 0x494   : > { %v3574_v47 = vpop.permute.xlu0 %3573 }
 0x495   : > { %v3889_v51 = vsel %vm1856_vm10, %v3857_v14, %v3574_v47  ;;  %3471 = vrot.lane.b32.xlu1 %v2590_v20, %s4722_s7  ;;  %v8308_v14 = vld [vmem:[#allocation37_spill] sm:$0xff] }
 0x496   : > { %3089 = vrot.lane.b32.xlu0 %v2589_v57, %s4719_s26  ;;  %4592 = vmatprep.mubr.msk.f32.mxu1 %vm1894_vm11, %v3889_v51  ;;  %v3670_v47 = vsel %vm234_vm0, %v6784_v26, %v8308_v14  ;;  %v8316_v14 = vld [vmem:[#allocation41_spill] sm:$0xff] }
 0x497   : > { %v3576_v16 = vpop.permute.xlu1 %3575  ;;  %v3702_v51 = vsel %vm1658_vm4, %v3670_v47, %v8309_v4  ;;  %v8317_v47 = vld [vmem:[#allocation49_spill] sm:$0xff] }
 0x498   : > { %v3890_v18 = vsel %vm1856_vm10, %v3858_v40, %v3576_v16  ;;  %v3194_v21 = vpop.permute.xlu0 %3193  ;;  %v3734_v61 = vsel %vm1691_vm5, %v3702_v51, %v7073_v32  ;;  %v8318_v4 = vld [vmem:[#allocation45_spill] sm:$0xff] }
 0x499   : > { %3091 = vrot.lane.b32.xlu1 %v2590_v20, %s4719_s26  ;;  %4593 = vmatmul.mubr.msk.f32.gmra.mrb[4].mxu1 %vm1894_vm11, %v3890_v18  ;;  %v7311_v20 = vld [vmem:[#allocation2 + $0x128] sm:$0xff] }
 0x49a   : > { %3597 = vrot.lane.b32.xlu0 %v6720_v37, %s4723_s14 }
 0x49b   : > { %v3322_v60 = vpop.permute.xlu1 %3321 }
 0x49c   : > { %v3196_v50 = vpop.permute.xlu0 %3195 }
 0x49d   : > { %3599 = vrot.lane.b32.xlu1 %v6716_v42, %s4723_s14  ;;  %v3731_v42 = vsel %vm1691_vm5, %v3699_v44, %v7067_v45  ;;  %v3732_v45 = vsel %vm1691_vm5, %v3700_v24, %v7065_v19  ;;  %v7346_v24 = vld [vmem:[#allocation2 + $0x138] sm:$0xff] }
 0x49e   : > { %3217 = vrot.lane.b32.xlu0 %v6720_v37, %s4720_s27  ;;  %v3763_v0 = vsel %vm1724_vm6, %v3731_v42, %v3066_v15  ;;  %v3764_v28 = vsel %vm1724_vm6, %v3732_v45, %v3068_v12 }
 0x49f   : > { %v3450_v2 = vpop.permute.xlu1 %3449  ;;  %v3795_v63 = vsel %vm1757_vm7, %v3763_v0, %v3194_v21  ;;  %v3796_v62 = vsel %vm1757_vm7, %v3764_v28, %v3196_v50 }
 0x4a0   : > { %v3324_v6 = vpop.permute.xlu0 %3323  ;;  %v3827_v11 = vsel %vm1790_vm8, %v3795_v63, %v3322_v60  ;;  %v8311_v63 = vld [vmem:[#allocation113_spill] sm:$0xff] }
 0x4a1   : > { %3345 = vrot.lane.b32.xlu1 %v8302_v31, %s4721_s28  ;;  %v3859_v3 = vsel %vm1823_vm9, %v3827_v11, %v3450_v2  ;;  %v3828_v38 = vsel %vm1790_vm8, %v3796_v62, %v3324_v6  ;;  %v8312_v11 = vld [vmem:[#allocation99_spill] sm:$0xff] }
 0x4a2   : > { %3219 = vrot.lane.b32.xlu0 %v2528_v5, %s4720_s27  ;;  %v2625_v5 = vld [vmem:[#allocation2 + $0x122] sm:$0xff] }
 0x4a3   : > { %v3452_v13 = vpop.permute.xlu1 %3451 }
 0x4a4   : > { %v3070_v37 = vpop.permute.xlu0 %3069  ;;  %v3860_v19 = vsel %vm1823_vm9, %v3828_v38, %v3452_v13 }
 0x4a5   : > { %3473 = vrot.lane.b32.xlu1 %v2591_v48, %s4722_s7  ;;  %v3765_v25 = vsel %vm1724_vm6, %v3733_v8, %v3070_v37  ;;  %v2532_v37 = vld [vmem:[#allocation2 + $0x12a] sm:$0xff]  ;;  %v2596_v8 = vld [vmem:[#allocation2 + $0x141] sm:$0xff] }
 0x4a6   : > { %3347 = vrot.lane.b32.xlu0 %v8305_v34, %s4721_s28 }
 0x4a7   : > { %v3072_v22 = vpop.permute.xlu1 %3071 }
 0x4a8   : > { %v3578_v41 = vpop.permute.xlu0 %3577  ;;  %v3766_v40 = vsel %vm1724_vm6, %v3734_v61, %v3072_v22  ;;  %v8313_v22 = vld [vmem:[#allocation101_spill] sm:$0xff]  ;;  %v8319_v61 = vld [vmem:[#allocation134_spill] sm:$0xff] }
 0x4a9   : > { %v3891_v52 = vsel %vm1856_vm10, %v3859_v3, %v3578_v41  ;;  %3475 = vrot.lane.b32.xlu1 %v2592_v27, %s4722_s7  ;;  %v3672_v28 = vsel %vm234_vm0, %v8313_v22, %v8312_v11  ;;  %v2566_v11 = vld [vmem:[#allocation2 + $0x158] sm:$0xff] }
 0x4aa   : > { %3093 = vrot.lane.b32.xlu0 %v2591_v48, %s4719_s26  ;;  %4595 = vmatprep.mubr.msk.f32.mxu1 %vm1894_vm11, %v3891_v52  ;;  %v8310_v48 = vld [vmem:[#allocation98_spill] sm:$0xff] }
 0x4ab   : > { %v3580_v59 = vpop.permute.xlu1 %3579  ;;  %v3671_v29 = vsel %vm234_vm0, %v6800_v53, %v8310_v48  ;;  %v8314_v53 = vld [vmem:[#allocation130_spill] sm:$0xff] }
 0x4ac   : > { %v3892_v33 = vsel %vm1856_vm10, %v3860_v19, %v3580_v59  ;;  %v3198_v10 = vpop.permute.xlu0 %3197  ;;  %v3703_v1 = vsel %vm1658_vm4, %v3671_v29, %v6955_v7  ;;  %v3704_v41 = vsel %vm1658_vm4, %v3672_v28, %v8314_v53 }
 0x4ad   : > { %3095 = vrot.lane.b32.xlu1 %v2592_v27, %s4719_s26  ;;  %4596 = vmatmul.mubr.msk.f32.gmra.mrb[6].mxu1 %vm1894_vm11, %v3892_v33  ;;  %v3797_v17 = vsel %vm1757_vm7, %v3765_v25, %v3198_v10  ;;  %v3735_v34 = vsel %vm1691_vm5, %v3703_v1, %v8311_v63  ;;  %v8315_v27 = vld [vmem:[#allocation68_spill] sm:$0xff]  ;;  %v2595_v10 = vld [vmem:[#allocation2 + $0x139] sm:$0xff]  ;;  %v3673_v25 = vsel %vm234_vm0, %v8317_v47, %v8316_v14 }
 0x4ae   : > { %3601 = vrot.lane.b32.xlu0 %v2623_v58, %s4723_s14  ;;  %v3736_v62 = vsel %vm1691_vm5, %v3704_v41, %v8315_v27  ;;  %v3705_v51 = vsel %vm1658_vm4, %v3673_v25, %v8318_v4  ;;  %v2629_v41 = vld [vmem:[#allocation2 + $0x152] sm:$0xff]  ;;  %v8324_v27 = vld [vmem:[#allocation46_spill] sm:$0xff] }
 0x4af   : > { %v3326_v54 = vpop.permute.xlu1 %3325  ;;  %v2536_v47 = vld [vmem:[#allocation2 + $0x15a] sm:$0xff] }
 0x4b0   : > { %v3200_v36 = vpop.permute.xlu0 %3199  ;;  %v3829_v43 = vsel %vm1790_vm8, %v3797_v17, %v3326_v54 }
 0x4b1   : > { %3603 = vrot.lane.b32.xlu1 %v2624_v55, %s4723_s14  ;;  %v3798_v21 = vsel %vm1757_vm7, %v3766_v40, %v3200_v36  ;;  %v2564_v36 = vld [vmem:[#allocation2 + $0x140] sm:$0xff] }
 0x4b2   : > { %3221 = vrot.lane.b32.xlu0 %v2623_v58, %s4720_s27  ;;  %v2534_v40 = vld [vmem:[#allocation2 + $0x142] sm:$0xff] }
 0x4b3   : > { %v3454_v15 = vpop.permute.xlu1 %3453 }
 0x4b4   : > { %v3328_v57 = vpop.permute.xlu0 %3327  ;;  %v3861_v16 = vsel %vm1823_vm9, %v3829_v43, %v3454_v15  ;;  %v3737_v43 = vsel %vm1691_vm5, %v3705_v51, %v8319_v61 }
 0x4b5   : > { %3349 = vrot.lane.b32.xlu1 %v8306_v39, %s4721_s28  ;;  %v3830_v50 = vsel %vm1790_vm8, %v3798_v21, %v3328_v57 }
 0x4b6   : > { %3223 = vrot.lane.b32.xlu0 %v2624_v55, %s4720_s27 }
 0x4b7   : > { %v3456_v56 = vpop.permute.xlu1 %3455 }
 0x4b8   : > { %v3074_v12 = vpop.permute.xlu0 %3073  ;;  %v3862_v32 = vsel %vm1823_vm9, %v3830_v50, %v3456_v56  ;;  %v2627_v56 = vld [vmem:[#allocation2 + $0x13a] sm:$0xff]  ;;  %v8322_v50 = vld [vmem:[#allocation108_spill] sm:$0xff] }
 0x4b9   : > { %3477 = vrot.lane.b32.xlu1 %v2593_v23, %s4722_s7  ;;  %v3767_v3 = vsel %vm1724_vm6, %v3735_v34, %v3074_v12 }
 0x4ba   : > { %3351 = vrot.lane.b32.xlu0 %v7311_v20, %s4721_s28 }
 0x4bb   : > { %v3076_v26 = vpop.permute.xlu1 %3075 }
 0x4bc   : > { %v3582_v18 = vpop.permute.xlu0 %3581  ;;  %v3768_v19 = vsel %vm1724_vm6, %v3736_v62, %v3076_v26  ;;  %v8325_v62 = vld [vmem:[#allocation50_spill] sm:$0xff] }
 0x4bd   : > { %v3893_v60 = vsel %vm1856_vm10, %v3861_v16, %v3582_v18  ;;  %3097 = vrot.lane.b32.xlu1 %v2593_v23, %s4719_s26  ;;  %v8320_v16 = vld [vmem:[#allocation43_spill] sm:$0xff]  ;;  %v8321_v18 = vld [vmem:[#allocation104_spill] sm:$0xff] }
 0x4be   : > { %2971 = vrot.lane.b32.xlu0 %v7311_v20, %s4718_s25  ;;  %4598 = vmatprep.mubr.msk.f32.mxu1 %vm1894_vm11, %v3893_v60  ;;  %v3674_v21 = vsel %vm234_vm0, %v8321_v18, %v8320_v16 }
 0x4bf   : > { %v3584_v2 = vpop.permute.xlu1 %3583 }
 0x4c0   : > { %v3894_v6 = vsel %vm1856_vm10, %v3862_v32, %v3584_v2  ;;  %v3202_v31 = vpop.permute.xlu0 %3201  ;;  %v3706_v32 = vsel %vm1658_vm4, %v3674_v21, %v8322_v50  ;;  %v2599_v21 = vld [vmem:[#allocation2 + $0x169] sm:$0xff] }
 0x4c1   : > { %3605 = vrot.lane.b32.xlu1 %v2625_v5, %s4723_s14  ;;  %4599 = vmatmul.mubr.msk.f32.gmra.mrb[8].mxu1 %vm1894_vm11, %v3894_v6  ;;  %v3799_v7 = vsel %vm1757_vm7, %v3767_v3, %v3202_v31  ;;  %v8323_v6 = vld [vmem:[#allocation66_spill] sm:$0xff] }
 0x4c2   : > { %3479 = vrot.lane.b32.xlu0 %v2594_v49, %s4722_s7  ;;  %v3738_v31 = vsel %vm1691_vm5, %v3706_v32, %v8323_v6  ;;  %v8333_v6 = vld [vmem:[#allocation56_spill] sm:$0xff] }
 0x4c3   : > { %v3330_v46 = vpop.permute.xlu1 %3329 }
 0x4c4   : > { %v3204_v44 = vpop.permute.xlu0 %3203  ;;  %v3831_v52 = vsel %vm1790_vm8, %v3799_v7, %v3330_v46  ;;  %v2598_v7 = vld [vmem:[#allocation2 + $0x159] sm:$0xff] }
 0x4c5   : > { %3225 = vrot.lane.b32.xlu1 %v2625_v5, %s4720_s27  ;;  %v3800_v58 = vsel %vm1757_vm7, %v3768_v19, %v3204_v44 }
 0x4c6   : > { %3099 = vrot.lane.b32.xlu0 %v2594_v49, %s4719_s26 }
 0x4c7   : > { %v3458_v13 = vpop.permute.xlu1 %3457 }
 0x4c8   : > { %v3332_v42 = vpop.permute.xlu0 %3331  ;;  %v3863_v59 = vsel %vm1823_vm9, %v3831_v52, %v3458_v13  ;;  %v3675_v52 = vsel %vm234_vm0, %v8325_v62, %v8324_v27 }
 0x4c9   : > { %3227 = vrot.lane.b32.xlu1 %v2532_v37, %s4720_s27  ;;  %v3832_v55 = vsel %vm1790_vm8, %v3800_v58, %v3332_v42  ;;  %v2471_v42 = vld [vmem:[#allocation2 + $0x150] sm:$0xff] }
 0x4ca   : > { %3607 = vrot.lane.b32.xlu0 %v2532_v37, %s4723_s14 }
 0x4cb   : > { %v3460_v0 = vpop.permute.xlu1 %3459 }
 0x4cc   : > { %v3078_v45 = vpop.permute.xlu0 %3077  ;;  %v3864_v15 = vsel %vm1823_vm9, %v3832_v55, %v3460_v0 }
 0x4cd   : > { %2973 = vrot.lane.b32.xlu1 %v7346_v24, %s4718_s25  ;;  %v3769_v60 = vsel %vm1724_vm6, %v3737_v43, %v3078_v45  ;;  %v2597_v45 = vld [vmem:[#allocation2 + $0x151] sm:$0xff] }
 0x4ce   : > { %3353 = vrot.lane.b32.xlu0 %v7346_v24, %s4721_s28 }
 0x4cf   : > { %v3080_v38 = vpop.permute.xlu1 %3079 }
 0x4d0   : > { %v3586_v33 = vpop.permute.xlu0 %3585  ;;  %v3770_v46 = vsel %vm1724_vm6, %v3738_v31, %v3080_v38  ;;  %v8326_v38 = vld [vmem:[#allocation91_spill] sm:$0xff] }
 0x4d1   : > { %v3895_v54 = vsel %vm1856_vm10, %v3863_v59, %v3586_v33  ;;  %3481 = vrot.lane.b32.xlu1 %v2595_v10, %s4722_s7  ;;  %v3707_v19 = vsel %vm1658_vm4, %v3675_v52, %v8326_v38  ;;  %v8327_v33 = vld [vmem:[#allocation55_spill] sm:$0xff] }
 0x4d2   : > { %3355 = vrot.lane.b32.xlu0 %v2564_v36, %s4721_s28  ;;  %4601 = vmatprep.mubr.msk.f32.mxu1 %vm1894_vm11, %v3895_v54  ;;  %v8328_v54 = vld [vmem:[#allocation102_spill] sm:$0xff] }
 0x4d3   : > { %v3588_v57 = vpop.permute.xlu1 %3587 }
 0x4d4   : > { %v3896_v39 = vsel %vm1856_vm10, %v3864_v15, %v3588_v57  ;;  %v3206_v35 = vpop.permute.xlu0 %3205  ;;  %v8330_v57 = vld [vmem:[#allocation129_spill] sm:$0xff] }
 0x4d5   : > { %3101 = vrot.lane.b32.xlu1 %v2595_v10, %s4719_s26  ;;  %4602 = vmatmul.mubr.msk.f32.gmra.mrb[10].mxu1 %vm1894_vm11, %v3896_v39  ;;  %v3801_v2 = vsel %vm1757_vm7, %v3769_v60, %v3206_v35  ;;  %v3739_v10 = vsel %vm1691_vm5, %v3707_v19, %v8327_v33  ;;  %v2568_v60 = vld [vmem:[#allocation2 + $0x170] sm:$0xff] }
 0x4d6   : > { %2975 = vrot.lane.b32.xlu0 %v2564_v36, %s4718_s25  ;;  %v8329_v36 = vld [vmem:[#allocation105_spill] sm:$0xff] }
 0x4d7   : > { %v3334_v30 = vpop.permute.xlu1 %3333  ;;  %v3676_v55 = vsel %vm234_vm0, %v8329_v36, %v8328_v54 }
 0x4d8   : > { %v3208_v9 = vpop.permute.xlu0 %3207  ;;  %v3833_v5 = vsel %vm1790_vm8, %v3801_v2, %v3334_v30  ;;  %v3708_v39 = vsel %vm1658_vm4, %v3676_v55, %v8330_v57  ;;  %v8331_v30 = vld [vmem:[#allocation112_spill] sm:$0xff]  ;;  %v8332_v2 = vld [vmem:[#allocation103_spill] sm:$0xff]  ;;  %v2475_v55 = vld [vmem:[#allocation2 + $0x180] sm:$0xff] }
 0x4d9   : > { %3609 = vrot.lane.b32.xlu1 %v2627_v56, %s4723_s14  ;;  %v3802_v37 = vsel %vm1757_vm7, %v3770_v46, %v3208_v9  ;;  %v3740_v9 = vsel %vm1691_vm5, %v3708_v39, %v8331_v30  ;;  %v3677_v31 = vsel %vm234_vm0, %v8333_v6, %v8332_v2  ;;  %v2601_v39 = vld [vmem:[#allocation2 + $0x181] sm:$0xff]  ;;  %v4700_v30 = vld [vmem:[#allocation2 + $0xd8] sm:$0xff] }
 0x4da   : > { %3483 = vrot.lane.b32.xlu0 %v2596_v8, %s4722_s7  ;;  %v2633_v6 = vld [vmem:[#allocation2 + $0x182] sm:$0xff] }
 0x4db   : > { %v3462_v12 = vpop.permute.xlu1 %3461 }
 0x4dc   : > { %v3336_v23 = vpop.permute.xlu0 %3335  ;;  %v3865_v44 = vsel %vm1823_vm9, %v3833_v5, %v3462_v12  ;;  %v8334_v5 = vld [vmem:[#allocation165_spill] sm:$0xff] }
 0x4dd   : > { %3229 = vrot.lane.b32.xlu1 %v2627_v56, %s4720_s27  ;;  %v3834_v29 = vsel %vm1790_vm8, %v3802_v37, %v3336_v23  ;;  %v2631_v37 = vld [vmem:[#allocation2 + $0x16a] sm:$0xff] }
 0x4de   : > { %3103 = vrot.lane.b32.xlu0 %v2596_v8, %s4719_s26 }
 0x4df   : > { %v3464_v17 = vpop.permute.xlu1 %3463 }
 0x4e0   : > { %v3082_v26 = vpop.permute.xlu0 %3081  ;;  %v3866_v1 = vsel %vm1823_vm9, %v3834_v29, %v3464_v17  ;;  %v8336_v29 = vld [vmem:[#allocation44_spill] sm:$0xff] }
 0x4e1   : > { %3231 = vrot.lane.b32.xlu1 %v2534_v40, %s4720_s27  ;;  %v3771_v15 = vsel %vm1724_vm6, %v3739_v10, %v3082_v26 }
 0x4e2   : > { %3611 = vrot.lane.b32.xlu0 %v2534_v40, %s4723_s14  ;;  %v2473_v40 = vld [vmem:[#allocation2 + $0x168] sm:$0xff] }
 0x4e3   : > { %v3084_v49 = vpop.permute.xlu1 %3083 }
 0x4e4   : > { %v3590_v13 = vpop.permute.xlu0 %3589  ;;  %v3772_v12 = vsel %vm1724_vm6, %v3740_v9, %v3084_v49  ;;  %v3709_v49 = vsel %vm1658_vm4, %v3677_v31, %v8334_v5  ;;  %v8339_v9 = vld [vmem:[#allocation52_spill] sm:$0xff] }
 0x4e5   : > { %v3897_v48 = vsel %vm1856_vm10, %v3865_v44, %v3590_v13  ;;  %2977 = vrot.lane.b32.xlu1 %v2471_v42, %s4718_s25  ;;  %v8335_v44 = vld [vmem:[#allocation100_spill] sm:$0xff] }
 0x4e6   : > { %3357 = vrot.lane.b32.xlu0 %v2471_v42, %s4721_s28  ;;  %4604 = vmatprep.mubr.msk.f32.mxu1 %vm1894_vm11, %v3897_v48  ;;  %v3741_v13 = vsel %vm1691_vm5, %v3709_v49, %v8335_v44  ;;  %v4699_v48 = vld [vmem:[#allocation2 + $0xc8] sm:$0xff] }
 0x4e7   : > { %v3592_v0 = vpop.permute.xlu1 %3591  ;;  %v2602_v49 = vld [vmem:[#allocation2 + $0x189] sm:$0xff] }
 0x4e8   : > { %v3898_v63 = vsel %vm1856_vm10, %v3866_v1, %v3592_v0  ;;  %v3210_v34 = vpop.permute.xlu0 %3209  ;;  %v3678_v1 = vsel %vm234_vm0, %v4699_v48, %v8336_v29 }
 0x4e9   : > { %3485 = vrot.lane.b32.xlu1 %v2597_v45, %s4722_s7  ;;  %4605 = vmatmul.mubr.msk.f32.gmra.mrb[12].mxu1 %vm1894_vm11, %v3898_v63  ;;  %v3803_v35 = vsel %vm1757_vm7, %v3771_v15, %v3210_v34  ;;  %v2600_v63 = vld [vmem:[#allocation2 + $0x171] sm:$0xff]  ;;  %v8337_v34 = vld [vmem:[#allocation42_spill] sm:$0xff] }
 0x4ea   : > { %3359 = vrot.lane.b32.xlu0 %v2566_v11, %s4721_s28 }
 0x4eb   : > { %v3338_v22 = vpop.permute.xlu1 %3337 }
 0x4ec   : > { %v3212_v28 = vpop.permute.xlu0 %3211  ;;  %v3835_v56 = vsel %vm1790_vm8, %v3803_v35, %v3338_v22  ;;  %v8338_v22 = vld [vmem:[#allocation133_spill] sm:$0xff]  ;;  %v2570_v35 = vld [vmem:[#allocation2 + $0x188] sm:$0xff] }
 0x4ed   : > { %3105 = vrot.lane.b32.xlu1 %v2597_v45, %s4719_s26  ;;  %v3804_v25 = vsel %vm1757_vm7, %v3772_v12, %v3212_v28  ;;  %v3710_v45 = vsel %vm1658_vm4, %v3678_v1, %v8337_v34  ;;  %v2540_v1 = vld [vmem:[#allocation2 + $0x18a] sm:$0xff]  ;;  %v2571_v34 = vld [vmem:[#allocation2 + $0x198] sm:$0xff] }
 0x4ee   : > { %2979 = vrot.lane.b32.xlu0 %v2566_v11, %s4718_s25  ;;  %v3742_v28 = vsel %vm1691_vm5, %v3710_v45, %v8338_v22  ;;  %v8345_v22 = vld [vmem:[#allocation161_spill] sm:$0xff] }
 0x4ef   : > { %v3466_v3 = vpop.permute.xlu1 %3465 }
 0x4f0   : > { %v3340_v53 = vpop.permute.xlu0 %3339  ;;  %v3867_v23 = vsel %vm1823_vm9, %v3835_v56, %v3466_v3  ;;  %v3679_v56 = vsel %vm234_vm0, %v4700_v30, %v8339_v9  ;;  %v8349_v30 = vld [vmem:[#allocation64_spill] sm:$0xff] }
 0x4f1   : > { %3613 = vrot.lane.b32.xlu1 %v2629_v41, %s4723_s14  ;;  %v3836_v51 = vsel %vm1790_vm8, %v3804_v25, %v3340_v53 }
 0x4f2   : > { %3487 = vrot.lane.b32.xlu0 %v2598_v7, %s4722_s7 }
 0x4f3   : > { %v3468_v59 = vpop.permute.xlu1 %3467 }
 0x4f4   : > { %v3086_v58 = vpop.permute.xlu0 %3085  ;;  %v3868_v17 = vsel %vm1823_vm9, %v3836_v51, %v3468_v59  ;;  %v8342_v51 = vld [vmem:[#allocation47_spill] sm:$0xff] }
 0x4f5   : > { %3233 = vrot.lane.b32.xlu1 %v2629_v41, %s4720_s27  ;;  %v3773_v0 = vsel %vm1724_vm6, %v3741_v13, %v3086_v58  ;;  %v2538_v58 = vld [vmem:[#allocation2 + $0x172] sm:$0xff] }
 0x4f6   : > { %3107 = vrot.lane.b32.xlu0 %v2598_v7, %s4719_s26 }
 0x4f7   : > { %v3088_v8 = vpop.permute.xlu1 %3087 }
 0x4f8   : > { %v3594_v14 = vpop.permute.xlu0 %3593  ;;  %v3774_v41 = vsel %vm1724_vm6, %v3742_v28, %v3088_v8  ;;  %v8340_v8 = vld [vmem:[#allocation164_spill] sm:$0xff] }
 0x4f9   : > { %v3899_v4 = vsel %vm1856_vm10, %v3867_v23, %v3594_v14  ;;  %3235 = vrot.lane.b32.xlu1 %v2536_v47, %s4720_s27  ;;  %v3711_v12 = vsel %vm1658_vm4, %v3679_v56, %v8340_v8  ;;  %v8341_v14 = vld [vmem:[#allocation169_spill] sm:$0xff] }
 0x4fa   : > { %3615 = vrot.lane.b32.xlu0 %v2536_v47, %s4723_s14  ;;  %4607 = vmatprep.mubr.msk.f32.mxu1 %vm1894_vm11, %v3899_v4  ;;  %v3743_v47 = vsel %vm1691_vm5, %v3711_v12, %v8341_v14  ;;  %v4701_v4 = vld [vmem:[#allocation2 + $0xe0] sm:$0xff] }
 0x4fb   : > { %v3596_v61 = vpop.permute.xlu1 %3595  ;;  %v8350_v8 = vld [vmem:[#allocation97_spill] sm:$0xff] }
 0x4fc   : > { %v3900_v43 = vsel %vm1856_vm10, %v3868_v17, %v3596_v61  ;;  %v3214_v26 = vpop.permute.xlu0 %3213  ;;  %v3680_v17 = vsel %vm234_vm0, %v4701_v4, %v8342_v51 }
 0x4fd   : > { %2981 = vrot.lane.b32.xlu1 %v2473_v40, %s4718_s25  ;;  %4608 = vmatmul.mubr.msk.f32.gmra.mrb[14].mxu1 %vm1894_vm11, %v3900_v43  ;;  %v3805_v11 = vsel %vm1757_vm7, %v3773_v0, %v3214_v26  ;;  %v8343_v43 = vld [vmem:[#allocation89_spill] sm:$0xff] }
 0x4fe   : > { %3361 = vrot.lane.b32.xlu0 %v2473_v40, %s4721_s28  ;;  %v3712_v26 = vsel %vm1658_vm4, %v3680_v17, %v8343_v43  ;;  %v2572_v0 = vld [vmem:[#allocation2 + $0x1a0] sm:$0xff] }
 0x4ff   : > { %v3342_v16 = vpop.permute.xlu1 %3341 }
 0x500   : > { %v3216_v18 = vpop.permute.xlu0 %3215  ;;  %v3837_v3 = vsel %vm1790_vm8, %v3805_v11, %v3342_v16  ;;  %v8344_v16 = vld [vmem:[#allocation53_spill] sm:$0xff]  ;;  %v4702_v11 = vld [vmem:[#allocation2 + $0xf0] sm:$0xff] }
 0x501   : > { %3489 = vrot.lane.b32.xlu1 %v2599_v21, %s4722_s7  ;;  %v3806_v62 = vsel %vm1757_vm7, %v3774_v41, %v3216_v18  ;;  %v3744_v18 = vsel %vm1691_vm5, %v3712_v26, %v8344_v16  ;;  %v3681_v28 = vsel %vm234_vm0, %v4702_v11, %v8345_v22  ;;  %v2604_v41 = vld [vmem:[#allocation2 + $0x1a1] sm:$0xff]  ;;  %v4705_v11 = vld [vmem:[#allocation2 + $0x110] sm:$0xff] }
 0x502   : > { %3363 = vrot.lane.b32.xlu0 %v2568_v60, %s4721_s28  ;;  %v8356_v22 = vld [vmem:[#allocation107_spill] sm:$0xff] }
 0x503   : > { %v3470_v50 = vpop.permute.xlu1 %3469 }
 0x504   : > { %v3344_v32 = vpop.permute.xlu0 %3343  ;;  %v3869_v7 = vsel %vm1823_vm9, %v3837_v3, %v3470_v50  ;;  %v8346_v3 = vld [vmem:[#allocation111_spill] sm:$0xff] }
 0x505   : > { %3109 = vrot.lane.b32.xlu1 %v2599_v21, %s4719_s26  ;;  %v3838_v38 = vsel %vm1790_vm8, %v3806_v62, %v3344_v32 }
 0x506   : > { %2983 = vrot.lane.b32.xlu0 %v2568_v60, %s4718_s25 }
 0x507   : > { %v3472_v46 = vpop.permute.xlu1 %3471 }
 0x508   : > { %v3090_v42 = vpop.permute.xlu0 %3089  ;;  %v3870_v19 = vsel %vm1823_vm9, %v3838_v38, %v3472_v46 }
 0x509   : > { %3617 = vrot.lane.b32.xlu1 %v2631_v37, %s4723_s14  ;;  %v3775_v61 = vsel %vm1724_vm6, %v3743_v47, %v3090_v42 }
 0x50a   : > { %3491 = vrot.lane.b32.xlu0 %v2600_v63, %s4722_s7 }
 0x50b   : > { %v3092_v53 = vpop.permute.xlu1 %3091 }
 0x50c   : > { %v3598_v27 = vpop.permute.xlu0 %3597  ;;  %v3776_v50 = vsel %vm1724_vm6, %v3744_v18, %v3092_v53  ;;  %v3713_v53 = vsel %vm1658_vm4, %v3681_v28, %v8346_v3  ;;  %v3684_v28 = vsel %vm234_vm0, %v4705_v11, %v8356_v22  ;;  %v8357_v3 = vld [vmem:[#allocation62_spill] sm:$0xff]  ;;  %v8366_v22 = vld [vmem:[#allocation87_spill] sm:$0xff] }
 0x50d   : > { %v3901_v52 = vsel %vm1856_vm10, %v3869_v7, %v3598_v27  ;;  %3237 = vrot.lane.b32.xlu1 %v2631_v37, %s4720_s27  ;;  %v8347_v7 = vld [vmem:[#allocation168_spill] sm:$0xff] }
 0x50e   : > { %3111 = vrot.lane.b32.xlu0 %v2600_v63, %s4719_s26  ;;  %4610 = vmatprep.mubr.msk.f32.mxu1 %vm1894_vm11, %v3901_v52  ;;  %v3745_v27 = vsel %vm1691_vm5, %v3713_v53, %v8347_v7  ;;  %v2603_v52 = vld [vmem:[#allocation2 + $0x199] sm:$0xff]  ;;  %v3716_v53 = vsel %vm1658_vm4, %v3684_v28, %v8357_v3  ;;  %v3687_v28 = vsel %vm234_vm0, %v7346_v24, %v8366_v22  ;;  %v8367_v3 = vld [vmem:[#allocation95_spill] sm:$0xff] }
 0x50f   : > { %v3600_v59 = vpop.permute.xlu1 %3599 }
 0x510   : > { %v3902_v33 = vsel %vm1856_vm10, %v3870_v19, %v3600_v59  ;;  %v3218_v10 = vpop.permute.xlu0 %3217 }
 0x511   : > { %3239 = vrot.lane.b32.xlu1 %v2538_v58, %s4720_s27  ;;  %4611 = vmatmul.mubr.msk.f32.gmra.mrb[16].mxu1 %vm1894_vm11, %v3902_v33  ;;  %v3807_v40 = vsel %vm1757_vm7, %v3775_v61, %v3218_v10  ;;  %v2636_v10 = vld [vmem:[#allocation2 + $0x1a2] sm:$0xff] }
 0x512   : > { %3619 = vrot.lane.b32.xlu0 %v2538_v58, %s4723_s14 }
 0x513   : > { %v3346_v54 = vpop.permute.xlu1 %3345 }
 0x514   : > { %v3220_v36 = vpop.permute.xlu0 %3219  ;;  %v3839_v21 = vsel %vm1790_vm8, %v3807_v40, %v3346_v54 }
 0x515   : > { %2985 = vrot.lane.b32.xlu1 %v2475_v55, %s4718_s25  ;;  %v3808_v31 = vsel %vm1757_vm7, %v3776_v50, %v3220_v36  ;;  %v2635_v36 = vld [vmem:[#allocation2 + $0x19a] sm:$0xff] }
 0x516   : > { %3365 = vrot.lane.b32.xlu0 %v2475_v55, %s4721_s28 }
 0x517   : > { %v3474_v15 = vpop.permute.xlu1 %3473 }
 0x518   : > { %v3348_v57 = vpop.permute.xlu0 %3347  ;;  %v3871_v32 = vsel %vm1823_vm9, %v3839_v21, %v3474_v15  ;;  %v4704_v21 = vld [vmem:[#allocation2 + $0x108] sm:$0xff] }
 0x519   : > { %3493 = vrot.lane.b32.xlu1 %v2601_v39, %s4722_s7  ;;  %v3840_v46 = vsel %vm1790_vm8, %v3808_v31, %v3348_v57  ;;  %v4703_v57 = vld [vmem:[#allocation2 + $0xf8] sm:$0xff] }
 0x51a   : > { %3367 = vrot.lane.b32.xlu0 %v2570_v35, %s4721_s28  ;;  %v8353_v31 = vld [vmem:[#allocation132_spill] sm:$0xff] }
 0x51b   : > { %v3476_v23 = vpop.permute.xlu1 %3475 }
 0x51c   : > { %v3094_v25 = vpop.permute.xlu0 %3093  ;;  %v3872_v44 = vsel %vm1823_vm9, %v3840_v46, %v3476_v23 }
 0x51d   : > { %3113 = vrot.lane.b32.xlu1 %v2601_v39, %s4719_s26  ;;  %v3777_v38 = vsel %vm1724_vm6, %v3745_v27, %v3094_v25  ;;  %v8348_v39 = vld [vmem:[#allocation83_spill] sm:$0xff] }
 0x51e   : > { %2987 = vrot.lane.b32.xlu0 %v2570_v35, %s4718_s25  ;;  %v3682_v35 = vsel %vm234_vm0, %v4703_v57, %v8348_v39  ;;  %v8359_v39 = vld [vmem:[#allocation5_spill] sm:$0xff] }
 0x51f   : > { %v3096_v60 = vpop.permute.xlu1 %3095  ;;  %v3714_v9 = vsel %vm1658_vm4, %v3682_v35, %v8349_v30 }
 0x520   : > { %v3602_v2 = vpop.permute.xlu0 %3601  ;;  %v3746_v12 = vsel %vm1691_vm5, %v3714_v9, %v8350_v8  ;;  %v8360_v8 = vld [vmem:[#allocation106_spill] sm:$0xff] }
 0x521   : > { %v3903_v5 = vsel %vm1856_vm10, %v3871_v32, %v3602_v2  ;;  %3621 = vrot.lane.b32.xlu1 %v2633_v6, %s4723_s14  ;;  %v3778_v14 = vsel %vm1724_vm6, %v3746_v12, %v3096_v60  ;;  %v8351_v60 = vld [vmem:[#allocation54_spill] sm:$0xff] }
 0x522   : > { %4613 = vmatprep.mubr.msk.f32.mxu1 %vm1894_vm11, %v3903_v5  ;;  %3495 = vrot.lane.b32.xlu0 %v2602_v49, %s4722_s7  ;;  %v3683_v50 = vsel %vm234_vm0, %v4704_v21, %v8351_v60  ;;  %v8352_v32 = vld [vmem:[#allocation6_spill] sm:$0xff]  ;;  %v8362_v21 = vld [vmem:[#allocation128_spill] sm:$0xff] }
 0x523   : > { %v3604_v13 = vpop.permute.xlu1 %3603  ;;  %v3715_v5 = vsel %vm1658_vm4, %v3683_v50, %v8353_v31  ;;  %v8363_v60 = vld [vmem:[#allocation110_spill] sm:$0xff] }
 0x524   : > { %v3904_v42 = vsel %vm1856_vm10, %v3872_v44, %v3604_v13  ;;  %v3222_v37 = vpop.permute.xlu0 %3221  ;;  %v8355_v44 = vld [vmem:[#allocation72_spill] sm:$0xff] }
 0x525   : > { %4614 = vmatmul.mubr.msk.f32.gmra.mrb[18].mxu1 %vm1894_vm11, %v3904_v42  ;;  %3241 = vrot.lane.b32.xlu1 %v2633_v6, %s4720_s27  ;;  %v3809_v59 = vsel %vm1757_vm7, %v3777_v38, %v3222_v37  ;;  %v3747_v13 = vsel %vm1691_vm5, %v3715_v5, %v8355_v44 }
 0x526   : > { %3115 = vrot.lane.b32.xlu0 %v2602_v49, %s4719_s26  ;;  %v8354_v49 = vld [vmem:[#allocation4_spill] sm:$0xff] }
 0x527   : > { %v3350_v48 = vpop.permute.xlu1 %3349 }
 0x528   : > { %v3224_v29 = vpop.permute.xlu0 %3223  ;;  %v3841_v33 = vsel %vm1790_vm8, %v3809_v59, %v3350_v48 }
 0x529   : > { %3243 = vrot.lane.b32.xlu1 %v2540_v1, %s4720_s27  ;;  %v3810_v47 = vsel %vm1757_vm7, %v3778_v14, %v3224_v29  ;;  %s7555_s27 = scalar_lea.vmem %s7773_s4, %s4442_s19 }
 0x52a   : > { %3623 = vrot.lane.b32.xlu0 %v2540_v1, %s4723_s14 }
 0x52b   : > { %v3478_v63 = vpop.permute.xlu1 %3477 }
 0x52c   : > { %v3352_v45 = vpop.permute.xlu0 %3351  ;;  %v3873_v58 = vsel %vm1823_vm9, %v3841_v33, %v3478_v63 }
 0x52d   : > { %3371 = vrot.lane.b32.xlu1 %v2572_v0, %s4721_s28  ;;  %v3842_v25 = vsel %vm1790_vm8, %v3810_v47, %v3352_v45 }
 0x52e   : > { %3369 = vrot.lane.b32.xlu0 %v2571_v34, %s4721_s28 }
 0x52f   : > { %v3098_v62 = vpop.permute.xlu1 %3097 }
 0x530   : > { %v2972_v19 = vpop.permute.xlu0 %2971  ;;  %v3779_v37 = vsel %vm1724_vm6, %v3747_v13, %v3098_v62 }
 0x531   : > { %3499 = vrot.lane.b32.xlu1 %v2604_v41, %s4722_s7  ;;  %v3748_v7 = vsel %vm1691_vm5, %v3716_v53, %v2972_v19  ;;  %v3719_v53 = vsel %vm1658_vm4, %v3687_v28, %v8367_v3 }
 0x532   : > { %3497 = vrot.lane.b32.xlu0 %v2603_v52, %s4722_s7 }
 0x533   : > { %v3606_v54 = vpop.permute.xlu1 %3605 }
 0x534   : > { %v3905_v55 = vsel %vm1856_vm10, %v3873_v58, %v3606_v54  ;;  %v3480_v15 = vpop.permute.xlu0 %3479 }
 0x535   : > { %4616 = vmatprep.mubr.msk.f32.mxu1 %vm1894_vm11, %v3905_v55  ;;  %3627 = vrot.lane.b32.xlu1 %v2636_v10, %s4723_s14  ;;  %v3874_v51 = vsel %vm1823_vm9, %v3842_v25, %v3480_v15  ;;  %v8358_v55 = vld [vmem:[#allocation8_spill] sm:$0xff] }
 0x536   : > { %3625 = vrot.lane.b32.xlu0 %v2635_v36, %s4723_s14 }
 0x537   : > { %v3226_v56 = vpop.permute.xlu1 %3225 }
 0x538   : > { %v3100_v23 = vpop.permute.xlu0 %3099  ;;  %v3811_v29 = vsel %vm1757_vm7, %v3779_v37, %v3226_v56  ;;  %v4706_v56 = vld [vmem:[#allocation2 + $0x120] sm:$0xff] }
 0x539   : > { %v3780_v62 = vsel %vm1724_vm6, %v3748_v7, %v3100_v23  ;;  %v3685_v12 = vsel %vm234_vm0, %v4706_v56, %v8360_v8  ;;  %v8361_v23 = vld [vmem:[#allocation51_spill] sm:$0xff] }
 0x53a   : > { %v3717_v14 = vsel %vm1658_vm4, %v3685_v12, %v8361_v23  ;;  %v8371_v23 = vld [vmem:[#allocation9_spill] sm:$0xff] }
 0x53b   : > { %v3228_v4 = vpop.permute.xlu1 %3227 }
 0x53c   : > { %v3608_v17 = vpop.permute.xlu0 %3607  ;;  %v3812_v52 = vsel %vm1757_vm7, %v3780_v62, %v3228_v4 }
 0x53d   : > { %v3906_v61 = vsel %vm1856_vm10, %v3874_v51, %v3608_v17 }
 0x53e   : > { %4617 = vmatmul.mubr.msk.f32.gmra.mrb[20].mxu1 %vm1894_vm11, %v3906_v61 }
 0x53f   : > { %v2974_v43 = vpop.permute.xlu1 %2973 }
 0x540   : > { %v3354_v26 = vpop.permute.xlu0 %3353  ;;  %v3749_v47 = vsel %vm1691_vm5, %v3717_v14, %v2974_v43  ;;  %v3686_v43 = vsel %vm234_vm0, %v7311_v20, %v8362_v21  ;;  %v8372_v21 = vld [vmem:[#allocation85_spill] sm:$0xff] }
 0x541   : > { %v3843_v1 = vsel %vm1790_vm8, %v3811_v29, %v3354_v26  ;;  %v3718_v50 = vsel %vm1658_vm4, %v3686_v43, %v8363_v60  ;;  %v8373_v60 = vld [vmem:[#allocation167_spill] sm:$0xff] }
 0x543   : > { %v3482_v40 = vpop.permute.xlu1 %3481 }
 0x544   : > { %v4588_v16 = vpop.f32.mrb[0].mxu1  ;;  %v3356_v18 = vpop.permute.xlu0 %3355  ;;  %v3875_v0 = vsel %vm1823_vm9, %v3843_v1, %v3482_v40 }
 0x545   : > { %v4247_v2 = vadd.f32 %v4588_v16, %v8352_v32  ;;  %v4087_v6 = vpop.f32.mrb[1].mxu1  ;;  %v3844_v38 = vsel %vm1790_vm8, %v3812_v52, %v3356_v18 }
 0x546   : > { %v4246_v46 = vadd.f32 %v4087_v6, %v8354_v49 }
 0x547   : > { %4279 = vst.msk [vmem:[%s7555_s27 + $0x8] sm:$0xff] %vm234_vm0, %v4247_v2  ;;  %v3102_v42 = vpop.permute.xlu1 %3101 }
 0x548   : > { %4278 = vst.msk [vmem:[%s7555_s27] sm:$0xff] %vm234_vm0, %v4246_v46  ;;  %v2976_v48 = vpop.permute.xlu0 %2975  ;;  %v3781_v4 = vsel %vm1724_vm6, %v3749_v47, %v3102_v42  ;;  %v8364_v42 = vld [vmem:[#allocation10_spill] sm:$0xff] }
 0x549   : > { %v3750_v2 = vsel %vm1691_vm5, %v3718_v50, %v2976_v48 }
 0x54b   : > { %v3610_v63 = vpop.permute.xlu1 %3609 }
 0x54c   : > { %v3907_v34 = vsel %vm1856_vm10, %v3875_v0, %v3610_v63  ;;  %v3484_v45 = vpop.permute.xlu0 %3483  ;;  %v8365_v0 = vld [vmem:[#allocation7_spill] sm:$0xff] }
 0x54d   : > { %4619 = vmatprep.mubr.msk.f32.mxu1 %vm1894_vm11, %v3907_v34  ;;  %v3876_v33 = vsel %vm1823_vm9, %v3844_v38, %v3484_v45 }
 0x54f   : > { %v3230_v41 = vpop.permute.xlu1 %3229 }
 0x550   : > { %v3104_v27 = vpop.permute.xlu0 %3103  ;;  %v3813_v17 = vsel %vm1757_vm7, %v3781_v4, %v3230_v41 }
 0x551   : > { %v3782_v31 = vsel %vm1724_vm6, %v3750_v2, %v3104_v27 }
 0x553   : > { %v3232_v59 = vpop.permute.xlu1 %3231 }
 0x554   : > { %v3612_v10 = vpop.permute.xlu0 %3611  ;;  %v3814_v5 = vsel %vm1757_vm7, %v3782_v31, %v3232_v59 }
 0x555   : > { %v3908_v58 = vsel %vm1856_vm10, %v3876_v33, %v3612_v10 }
 0x556   : > { %4620 = vmatmul.mubr.msk.f32.gmra.mrb[22].mxu1 %vm1894_vm11, %v3908_v58  ;;  %v2376_v58 = vld [vmem:[#allocation2 + $0x140] sm:$0xff] }
 0x557   : > { %v2978_v54 = vpop.permute.xlu1 %2977 }
 0x558   : > { %v4591_v36 = vpop.f32.mrb[2].mxu1  ;;  %v3358_v19 = vpop.permute.xlu0 %3357  ;;  %v3751_v41 = vsel %vm1691_vm5, %v3719_v53, %v2978_v54 }
 0x559   : > { %v4249_v15 = vadd.f32 %v4591_v36, %v8358_v55  ;;  %v4097_v57 = vpop.f32.mrb[3].mxu1  ;;  %v3845_v61 = vsel %vm1790_vm8, %v3813_v17, %v3358_v19  ;;  %v8368_v36 = vld [vmem:[#allocation40_spill] sm:$0xff]  ;;  %v8369_v19 = vld [vmem:[#allocation131_spill] sm:$0xff] }
 0x55a   : > { %v4248_v35 = vadd.f32 %v4097_v57, %v8359_v39  ;;  %v3688_v54 = vsel %vm234_vm0, %v2376_v58, %v8368_v36  ;;  %v2380_v58 = vld [vmem:[#allocation2 + $0x170] sm:$0xff]  ;;  %v8378_v36 = vld [vmem:[#allocation109_spill] sm:$0xff] }
 0x55b   : > { %4281 = vst.msk [vmem:[%s7555_s27 + $0x18] sm:$0xff] %vm234_vm0, %v4249_v15  ;;  %v3486_v30 = vpop.permute.xlu1 %3485  ;;  %v3720_v55 = vsel %vm1658_vm4, %v3688_v54, %v8369_v19  ;;  %v8379_v19 = vld [vmem:[#allocation60_spill] sm:$0xff] }
 0x55c   : > { %4280 = vst.msk [vmem:[%s7555_s27 + $0x10] sm:$0xff] %vm234_vm0, %v4248_v35  ;;  %v3360_v9 = vpop.permute.xlu0 %3359  ;;  %v3877_v26 = vsel %vm1823_vm9, %v3845_v61, %v3486_v30 }
 0x55d   : > { %v3846_v49 = vsel %vm1790_vm8, %v3814_v5, %v3360_v9  ;;  %v8370_v9 = vld [vmem:[#allocation12_spill] sm:$0xff] }
 0x55f   : > { %v3106_v25 = vpop.permute.xlu1 %3105 }
 0x560   : > { %v2980_v51 = vpop.permute.xlu0 %2979  ;;  %v3783_v27 = vsel %vm1724_vm6, %v3751_v41, %v3106_v25 }
 0x561   : > { %v3752_v57 = vsel %vm1691_vm5, %v3720_v55, %v2980_v51  ;;  %v3692_v55 = vsel %vm234_vm0, %v2380_v58, %v8379_v19 }
 0x563   : > { %v3614_v40 = vpop.permute.xlu1 %3613 }
 0x564   : > { %v3909_v16 = vsel %vm1856_vm10, %v3877_v26, %v3614_v40  ;;  %v3488_v18 = vpop.permute.xlu0 %3487 }
 0x565   : > { %4622 = vmatprep.mubr.msk.f32.mxu1 %vm1894_vm11, %v3909_v16  ;;  %v3878_v44 = vsel %vm1823_vm9, %v3846_v49, %v3488_v18  ;;  %v2377_v16 = vld [vmem:[#allocation2 + $0x150] sm:$0xff] }
 0x566   : > { %v3689_v43 = vsel %vm234_vm0, %v2377_v16, %v8372_v21  ;;  %v8382_v16 = vld [vmem:[#allocation16_spill] sm:$0xff] }
 0x567   : > { %v3234_v32 = vpop.permute.xlu1 %3233  ;;  %v3721_v50 = vsel %vm1658_vm4, %v3689_v43, %v8373_v60 }
 0x568   : > { %v3108_v6 = vpop.permute.xlu0 %3107  ;;  %v3815_v52 = vsel %vm1757_vm7, %v3783_v27, %v3234_v32 }
 0x569   : > { %v3784_v30 = vsel %vm1724_vm6, %v3752_v57, %v3108_v6 }
 0x56b   : > { %v3236_v46 = vpop.permute.xlu1 %3235 }
 0x56c   : > { %v4594_v13 = vpop.f32.mrb[4].mxu1  ;;  %v3616_v20 = vpop.permute.xlu0 %3615  ;;  %v3816_v12 = vsel %vm1757_vm7, %v3784_v30, %v3236_v46 }
 0x56d   : > { %v4251_v37 = vadd.f32 %v4594_v13, %v8364_v42  ;;  %v3910_v29 = vsel %vm1856_vm10, %v3878_v44, %v3616_v20  ;;  %v4107_v1 = vpop.f32.mrb[5].mxu1 }
 0x56e   : > { %v4250_v48 = vadd.f32 %v4107_v1, %v8365_v0  ;;  %4623 = vmatmul.mubr.msk.f32.gmra.mrb[24].mxu1 %vm1894_vm11, %v3910_v29  ;;  %v8374_v29 = vld [vmem:[#allocation14_spill] sm:$0xff] }
 0x56f   : > { %4283 = vst.msk [vmem:[%s7555_s27 + $0x28] sm:$0xff] %vm234_vm0, %v4251_v37  ;;  %v2982_v63 = vpop.permute.xlu1 %2981  ;;  %v2378_v37 = vld [vmem:[#allocation2 + $0x158] sm:$0xff] }
 0x570   : > { %4282 = vst.msk [vmem:[%s7555_s27 + $0x20] sm:$0xff] %vm234_vm0, %v4250_v48  ;;  %v3362_v34 = vpop.permute.xlu0 %3361  ;;  %v3753_v32 = vsel %vm1691_vm5, %v3721_v50, %v2982_v63  ;;  %v8375_v48 = vld [vmem:[#allocation163_spill] sm:$0xff]  ;;  %v8383_v50 = vld [vmem:[#allocation13_spill] sm:$0xff] }
 0x571   : > { %v3847_v38 = vsel %vm1790_vm8, %v3815_v52, %v3362_v34  ;;  %v3690_v63 = vsel %vm234_vm0, %v2378_v37, %v8375_v48  ;;  %v8376_v34 = vld [vmem:[#allocation11_spill] sm:$0xff]  ;;  %v8387_v37 = vld [vmem:[#allocation17_spill] sm:$0xff] }
 0x573   : > { %v3490_v45 = vpop.permute.xlu1 %3489 }
 0x574   : > { %v3364_v11 = vpop.permute.xlu0 %3363  ;;  %v3879_v59 = vsel %vm1823_vm9, %v3847_v38, %v3490_v45 }
 0x575   : > { %v3848_v47 = vsel %vm1790_vm8, %v3816_v12, %v3364_v11  ;;  %v8377_v11 = vld [vmem:[#allocation48_spill] sm:$0xff] }
 0x576   : > { %v3722_v22 = vsel %vm1658_vm4, %v3690_v63, %v8377_v11 }
 0x577   : > { %v3110_v7 = vpop.permute.xlu1 %3109 }
 0x578   : > { %v2984_v62 = vpop.permute.xlu0 %2983  ;;  %v3785_v6 = vsel %vm1724_vm6, %v3753_v32, %v3110_v7 }
 0x579   : > { %v3754_v3 = vsel %vm1691_vm5, %v3722_v22, %v2984_v62  ;;  %v2379_v62 = vld [vmem:[#allocation2 + $0x168] sm:$0xff]  ;;  %v8390_v22 = vld [vmem:[#allocation24_spill] sm:$0xff] }
 0x57a   : > { %v3691_v54 = vsel %vm234_vm0, %v2379_v62, %v8378_v36  ;;  %v8395_v36 = vld [vmem:[#allocation25_spill] sm:$0xff] }
 0x57b   : > { %v3618_v33 = vpop.permute.xlu1 %3617 }
 0x57c   : > { %v3911_v10 = vsel %vm1856_vm10, %v3879_v59, %v3618_v33  ;;  %v3492_v24 = vpop.permute.xlu0 %3491 }
 0x57d   : > { %4625 = vmatprep.mubr.msk.f32.mxu1 %vm1894_vm11, %v3911_v10  ;;  %v3880_v4 = vsel %vm1823_vm9, %v3848_v47, %v3492_v24 }
 0x57f   : > { %v3238_v15 = vpop.permute.xlu1 %3237 }
 0x580   : > { %v4597_v39 = vpop.f32.mrb[6].mxu1  ;;  %v3112_v35 = vpop.permute.xlu0 %3111  ;;  %v3817_v5 = vsel %vm1757_vm7, %v3785_v6, %v3238_v15  ;;  %v8380_v15 = vld [vmem:[#allocation166_spill] sm:$0xff] }
 0x581   : > { %v4253_v56 = vadd.f32 %v4597_v39, %v8370_v9  ;;  %v4117_v8 = vpop.f32.mrb[7].mxu1  ;;  %v3786_v41 = vsel %vm1724_vm6, %v3754_v3, %v3112_v35  ;;  %v3723_v57 = vsel %vm1658_vm4, %v3691_v54, %v8380_v15  ;;  %v8381_v35 = vld [vmem:[#allocation93_spill] sm:$0xff]  ;;  %v8384_v6 = vld [vmem:[#allocation18_spill] sm:$0xff] }
 0x582   : > { %v4252_v14 = vadd.f32 %v4117_v8, %v8371_v23  ;;  %v3724_v30 = vsel %vm1658_vm4, %v3692_v55, %v8381_v35  ;;  %v8396_v55 = vld [vmem:[#allocation30_spill] sm:$0xff] }
 0x583   : > { %4285 = vst.msk [vmem:[%s7555_s27 + $0x38] sm:$0xff] %vm234_vm0, %v4253_v56  ;;  %v3240_v25 = vpop.permute.xlu1 %3239 }
 0x584   : > { %4284 = vst.msk [vmem:[%s7555_s27 + $0x30] sm:$0xff] %vm234_vm0, %v4252_v14  ;;  %v3620_v51 = vpop.permute.xlu0 %3619  ;;  %v3818_v7 = vsel %vm1757_vm7, %v3786_v41, %v3240_v25 }
 0x585   : > { %v3912_v17 = vsel %vm1856_vm10, %v3880_v4, %v3620_v51 }
 0x586   : > { %4626 = vmatmul.mubr.msk.f32.gmra.mrb[26].mxu1 %vm1894_vm11, %v3912_v17 }
 0x587   : > { %v2986_v61 = vpop.permute.xlu1 %2985 }
 0x588   : > { %v3366_v26 = vpop.permute.xlu0 %3365  ;;  %v3755_v9 = vsel %vm1691_vm5, %v3723_v57, %v2986_v61 }
 0x589   : > { %v3849_v49 = vsel %vm1790_vm8, %v3817_v5, %v3366_v26 }
 0x58b   : > { %v3494_v40 = vpop.permute.xlu1 %3493 }
 0x58c   : > { %v3368_v18 = vpop.permute.xlu0 %3367  ;;  %v3881_v46 = vsel %vm1823_vm9, %v3849_v49, %v3494_v40  ;;  %v8385_v49 = vld [vmem:[#allocation15_spill] sm:$0xff] }
 0x58d   : > { %v3850_v27 = vsel %vm1790_vm8, %v3818_v7, %v3368_v18 }
 0x58f   : > { %v3114_v2 = vpop.permute.xlu1 %3113 }
 0x590   : > { %v2988_v31 = vpop.permute.xlu0 %2987  ;;  %v3787_v8 = vsel %vm1724_vm6, %v3755_v9, %v3114_v2  ;;  %v8398_v9 = vld [vmem:[#allocation32_spill] sm:$0xff] }
 0x591   : > { %v3756_v12 = vsel %vm1691_vm5, %v3724_v30, %v2988_v31 }
 0x593   : > { %v3622_v44 = vpop.permute.xlu1 %3621 }
 0x594   : > { %v3913_v13 = vsel %vm1856_vm10, %v3881_v46, %v3622_v44  ;;  %v4600_v20 = vpop.f32.mrb[8].mxu1  ;;  %v3496_v42 = vpop.permute.xlu0 %3495 }
 0x595   : > { %v4255_v1 = vadd.f32 %v4600_v20, %v8374_v29  ;;  %v4127_v0 = vpop.f32.mrb[9].mxu1  ;;  %4628 = vmatprep.mubr.msk.f32.mxu1 %vm1894_vm11, %v3913_v13  ;;  %v3882_v38 = vsel %vm1823_vm9, %v3850_v27, %v3496_v42  ;;  %v8386_v13 = vld [vmem:[#allocation20_spill] sm:$0xff]  ;;  %v8392_v27 = vld [vmem:[#allocation26_spill] sm:$0xff] }
 0x596   : > { %v4254_v45 = vadd.f32 %v4127_v0, %v8376_v34  ;;  %v8388_v0 = vld [vmem:[#allocation22_spill] sm:$0xff]  ;;  %v8389_v34 = vld [vmem:[#allocation19_spill] sm:$0xff] }
 0x597   : > { %4287 = vst.msk [vmem:[%s7555_s27 + $0x48] sm:$0xff] %vm234_vm0, %v4255_v1  ;;  %v3242_v28 = vpop.permute.xlu1 %3241 }
 0x598   : > { %4286 = vst.msk [vmem:[%s7555_s27 + $0x40] sm:$0xff] %vm234_vm0, %v4254_v45  ;;  %v3116_v53 = vpop.permute.xlu0 %3115  ;;  %v3819_v23 = vsel %vm1757_vm7, %v3787_v8, %v3242_v28 }
 0x599   : > { %v3788_v14 = vsel %vm1724_vm6, %v3756_v12, %v3116_v53  ;;  %v8391_v53 = vld [vmem:[#allocation21_spill] sm:$0xff] }
 0x59a   : > { %v8399_v12 = vld [vmem:[#allocation29_spill] sm:$0xff] }
 0x59b   : > { %v3244_v52 = vpop.permute.xlu1 %3243 }
 0x59c   : > { %v3624_v59 = vpop.permute.xlu0 %3623  ;;  %v3820_v47 = vsel %vm1757_vm7, %v3788_v14, %v3244_v52 }
 0x59d   : > { %v3914_v33 = vsel %vm1856_vm10, %v3882_v38, %v3624_v59  ;;  %v8393_v59 = vld [vmem:[#allocation23_spill] sm:$0xff] }
 0x59e   : > { %4629 = vmatmul.mubr.msk.f32.gmra.mrb[28].mxu1 %vm1894_vm11, %v3914_v33 }
 0x59f   : > { %v3372_v10 = vpop.permute.xlu1 %3371 }
 0x5a0   : > { %v3370_v24 = vpop.permute.xlu0 %3369  ;;  %v3852_v51 = vsel %vm1790_vm8, %v3820_v47, %v3372_v10  ;;  %v8400_v47 = vld [vmem:[#allocation33_spill] sm:$0xff] }
 0x5a1   : > { %v3851_v25 = vsel %vm1790_vm8, %v3819_v23, %v3370_v24  ;;  %v8394_v24 = vld [vmem:[#allocation28_spill] sm:$0xff] }
 0x5a3   : > { %v3500_v39 = vpop.permute.xlu1 %3499 }
 0x5a4   : > { %v3498_v56 = vpop.permute.xlu0 %3497  ;;  %v3884_v40 = vsel %vm1823_vm9, %v3852_v51, %v3500_v39  ;;  %v8397_v39 = vld [vmem:[#allocation27_spill] sm:$0xff] }
 0x5a5   : > { %v3883_v17 = vsel %vm1823_vm9, %v3851_v25, %v3498_v56  ;;  %v8401_v51 = vld [vmem:[#allocation31_spill] sm:$0xff] }
 0x5a7   : > { %v3628_v4 = vpop.permute.xlu1 %3627 }
 0x5a8   : > { %v4603_v61 = vpop.f32.mrb[10].mxu1  ;;  %v3626_v26 = vpop.permute.xlu0 %3625  ;;  %v3916_v60 = vsel %vm1856_vm10, %v3884_v40, %v3628_v4 }
 0x5a9   : > { %v4257_v18 = vadd.f32 %v4603_v61, %v8382_v16  ;;  %v3915_v21 = vsel %vm1856_vm10, %v3883_v17, %v3626_v26  ;;  %v4137_v43 = vpop.f32.mrb[11].mxu1  ;;  %v8402_v26 = vld [vmem:[#allocation35_spill] sm:$0xff] }
 0x5aa   : > { %v4256_v32 = vadd.f32 %v4137_v43, %v8383_v50  ;;  %4631 = vmatprep.mubr.msk.f32.mxu1 %vm1894_vm11, %v3915_v21 }
 0x5ab   : > { %4289 = vst.msk [vmem:[%s7555_s27 + $0x58] sm:$0xff] %vm234_vm0, %v4257_v18  ;;  %4632 = vmatmul.mubr.msk.f32.gmra.mrb[30].mxu1 %vm1894_vm11, %v3916_v60  ;;  %v8403_v18 = vld [vmem:[#allocation34_spill] sm:$0xff] }
 0x5ac   : > { %4288 = vst.msk [vmem:[%s7555_s27 + $0x50] sm:$0xff] %vm234_vm0, %v4256_v32 }
 0x5bc   : > { %v4606_v2 = vpop.f32.mrb[12].mxu1 }
 0x5bd   : > { %v4259_v31 = vadd.f32 %v4606_v2, %v8384_v6  ;;  %v4147_v5 = vpop.f32.mrb[13].mxu1 }
 0x5be   : > { %v4258_v46 = vadd.f32 %v4147_v5, %v8385_v49 }
 0x5bf   : > { %4291 = vst.msk [vmem:[%s7555_s27 + $0x68] sm:$0xff] %vm234_vm0, %v4259_v31 }
 0x5c0   : > { %4290 = vst.msk [vmem:[%s7555_s27 + $0x60] sm:$0xff] %vm234_vm0, %v4258_v46 }
 0x5d0   : > { %v4609_v44 = vpop.f32.mrb[14].mxu1 }
 0x5d1   : > { %v4261_v20 = vadd.f32 %v4609_v44, %v8386_v13  ;;  %v4157_v42 = vpop.f32.mrb[15].mxu1 }
 0x5d2   : > { %v4260_v29 = vadd.f32 %v4157_v42, %v8387_v37 }
 0x5d3   : > { %4293 = vst.msk [vmem:[%s7555_s27 + $0x78] sm:$0xff] %vm234_vm0, %v4261_v20 }
 0x5d4   : > { %4292 = vst.msk [vmem:[%s7555_s27 + $0x70] sm:$0xff] %vm234_vm0, %v4260_v29 }
 0x5e4   : > { %v4612_v1 = vpop.f32.mrb[16].mxu1 }
 0x5e5   : > { %v4263_v48 = vadd.f32 %v4612_v1, %v8388_v0  ;;  %v4167_v63 = vpop.f32.mrb[17].mxu1 }
 0x5e6   : > { %v4262_v45 = vadd.f32 %v4167_v63, %v8389_v34 }
 0x5e7   : > { %4295 = vst.msk [vmem:[%s7555_s27 + $0x88] sm:$0xff] %vm234_vm0, %v4263_v48 }
 0x5e8   : > { %4294 = vst.msk [vmem:[%s7555_s27 + $0x80] sm:$0xff] %vm234_vm0, %v4262_v45 }
 0x5f8   : > { %v4615_v11 = vpop.f32.mrb[18].mxu1 }
 0x5f9   : > { %v4265_v28 = vadd.f32 %v4615_v11, %v8390_v22  ;;  %v4177_v3 = vpop.f32.mrb[19].mxu1 }
 0x5fa   : > { %v4264_v41 = vadd.f32 %v4177_v3, %v8391_v53 }
 0x5fb   : > { %4297 = vst.msk [vmem:[%s7555_s27 + $0x98] sm:$0xff] %vm234_vm0, %v4265_v28 }
 0x5fc   : > { %4296 = vst.msk [vmem:[%s7555_s27 + $0x90] sm:$0xff] %vm234_vm0, %v4264_v41 }
 0x611   : > { %v4618_v7 = vpop.f32.mrb[20].mxu1 }
 0x612   : > { %v4267_v52 = vadd.f32 %v4618_v7, %v8392_v27  ;;  %v4187_v38 = vpop.f32.mrb[21].mxu1 }
 0x613   : > { %v4266_v33 = vadd.f32 %v4187_v38, %v8393_v59 }
 0x614   : > { %4299 = vst.msk [vmem:[%s7555_s27 + $0xa8] sm:$0xff] %vm234_vm0, %v4267_v52 }
 0x615   : > { %4298 = vst.msk [vmem:[%s7555_s27 + $0xa0] sm:$0xff] %vm234_vm0, %v4266_v33 }
 0x629   : > { %v4621_v10 = vpop.f32.mrb[22].mxu1 }
 0x62a   : > { %v4269_v62 = vadd.f32 %v4621_v10, %v8394_v24  ;;  %v4197_v58 = vpop.f32.mrb[23].mxu1 }
 0x62b   : > { %v4268_v54 = vadd.f32 %v4197_v58, %v8395_v36 }
 0x62c   : > { %4301 = vst.msk [vmem:[%s7555_s27 + $0xb8] sm:$0xff] %vm234_vm0, %v4269_v62 }
 0x62d   : > { %4300 = vst.msk [vmem:[%s7555_s27 + $0xb0] sm:$0xff] %vm234_vm0, %v4268_v54 }
 0x641   : > { %v4624_v19 = vpop.f32.mrb[24].mxu1 }
 0x642   : > { %v4271_v15 = vadd.f32 %v4624_v19, %v8396_v55  ;;  %v4207_v57 = vpop.f32.mrb[25].mxu1 }
 0x643   : > { %v4270_v35 = vadd.f32 %v4207_v57, %v8397_v39 }
 0x644   : > { %4303 = vst.msk [vmem:[%s7555_s27 + $0xc8] sm:$0xff] %vm234_vm0, %v4271_v15 }
 0x645   : > { %4302 = vst.msk [vmem:[%s7555_s27 + $0xc0] sm:$0xff] %vm234_vm0, %v4270_v35 }
 0x659   : > { %v4627_v30 = vpop.f32.mrb[26].mxu1 }
 0x65a   : > { %v4273_v56 = vadd.f32 %v4627_v30, %v8398_v9  ;;  %v4217_v8 = vpop.f32.mrb[27].mxu1 }
 0x65b   : > { %v4272_v23 = vadd.f32 %v4217_v8, %v8399_v12 }
 0x65c   : > { %4305 = vst.msk [vmem:[%s7555_s27 + $0xd8] sm:$0xff] %vm234_vm0, %v4273_v56 }
 0x65d   : > { %4304 = vst.msk [vmem:[%s7555_s27 + $0xd0] sm:$0xff] %vm234_vm0, %v4272_v23 }
 0x671   : > { %v4630_v14 = vpop.f32.mrb[28].mxu1 }
 0x672   : > { %v4275_v25 = vadd.f32 %v4630_v14, %v8400_v47  ;;  %v4227_v4 = vpop.f32.mrb[29].mxu1 }
 0x673   : > { %v4274_v17 = vadd.f32 %v4227_v4, %v8401_v51 }
 0x674   : > { %4307 = vst.msk [vmem:[%s7555_s27 + $0xe8] sm:$0xff] %vm234_vm0, %v4275_v25 }
 0x675   : > { %4306 = vst.msk [vmem:[%s7555_s27 + $0xe0] sm:$0xff] %vm234_vm0, %v4274_v17 }
 0x67e   : > { %v4633_v61 = vpop.f32.mrb[30].mxu1 }
 0x67f   : > { %v4277_v40 = vadd.f32 %v4633_v61, %v8402_v26  ;;  %v4237_v16 = vpop.f32.mrb[31].mxu1 }
 0x680   : > { %v4276_v21 = vadd.f32 %v4237_v16, %v8403_v18 }
 0x681   : > { %4309 = vst.msk [vmem:[%s7555_s27 + $0xf8] sm:$0xff] %vm234_vm0, %v4277_v40 }
 0x682   : > { %4308 = vst.msk [vmem:[%s7555_s27 + $0xf0] sm:$0xff] %vm234_vm0, %v4276_v21 }
 0x683 PF: > { %s16_s17 = sadd.s32 1, %s4713_s17  }
 0x684   : > { %p13_p4 = scmp.ge.s32.totalorder %s16_s17, 4  }
 0x686   :  { %15 = sbr.rel (!%p13_p4) target bundleno = 3 (0x3), region = 69 }

</bundles_post_ra>
